<compile_context>
chip_gen: v7x
topology: tpu7x:2x2x1
jax: 0.10.0
libtpu: 0.0.40
codegen_flags: <defaults>
</compile_context>

<pallas_src>
import functools

import jax
import jax.numpy as jnp
from jax.experimental import pallas as pl
from jax.experimental.pallas import tpu as pltpu

KERNEL_SIZE = 7
PAD = KERNEL_SIZE // 2          # 3
_N_TAPS = 2 * KERNEL_SIZE * KERNEL_SIZE  # 98


# ---------------------------------------------------------------------------
# Sizing helpers
# ---------------------------------------------------------------------------
def _vmem_budget_bytes():
    """Usable VMEM budget: ~75% of physical per-core VMEM (48 MiB on v7x,
    96 MiB on v5e/v6e); conservative v7x default if the query is unavailable."""
    cap = None
    try:
        cap = getattr(pltpu.get_tpu_info(), "vmem_capacity_bytes", None)
    except Exception:
        cap = None
    if not cap:
        cap = 64 * 1024 * 1024
    return int(cap) * 3 // 4


def _fused_vmem_bytes(C, HW, H, W, in_item, out_item):
    blk = C * HW
    return (2 * blk * in_item              # x block, double-buffered
            + 2 * blk * out_item           # out block, double-buffered
            + blk * 4                      # f32 temporaries (reduce / multiply)
            + 2 * (H + 2 * PAD) * (W + 2 * PAD) * 4   # padded conv scratch
            + HW * 4                       # flattened attention scratch
            + (1 << 20))                   # compiler headroom


def _channel_tile(C, HW, itemsize, budget_bytes, sublane_mult):
    """Two-pass path channel tile: largest multiple of `sublane_mult` dividing
    C such that ~5 block copies (in/out double-buffered + f32 temp) fit the
    VMEM budget.  Falls back to C (always a legal block dim)."""
    if C <= sublane_mult:
        return C
    bytes_per_row = HW * itemsize
    max_ct = max(sublane_mult, (budget_bytes - (2 << 20)) // (5 * bytes_per_row))
    if max_ct >= C:
        return C
    ct = int(max_ct) - int(max_ct) % sublane_mult
    while ct >= sublane_mult:
        if C % ct == 0:
            return ct
        ct -= sublane_mult
    # No sublane-aligned divisor fits the budget; ct == C keeps the block legal
    # (block dim equal to full array dim) at the cost of VMEM.
    return C


# ---------------------------------------------------------------------------
# In-kernel building blocks (shared by fused and fallback paths)
# ---------------------------------------------------------------------------
def _fill_padded(pad_ref, mean_flat, max_flat, H, W):
    """Write [avg, max] maps into the interior of the (2, H+6, W+6) scratch.
    The scratch is zeroed with a single full unmasked store first."""
    Hp, Wp = H + 2 * PAD, W + 2 * PAD
    pad_ref[...] = jnp.zeros((2, Hp, Wp), jnp.float32)
    for h in range(H):
        pad_ref[0, PAD + h:PAD + h + 1, PAD:PAD + W] = mean_flat[:, h * W:(h + 1) * W]
        pad_ref[1, PAD + h:PAD + h + 1, PAD:PAD + W] = max_flat[:, h * W:(h + 1) * W]


def _conv7x7_sigmoid(pad_ref, w_ref, H, W):
    """7x7 cross-correlation (2 in-ch -> 1 out-ch, no bias) on the padded
    scratch, then sigmoid.  Each padded row band is loaded once (14 ref loads);
    4 independent accumulators keep the VALU dependence chain shallow.
    Deliberately kept on the VPU — im2col->MXU would waste the array on a
    1-wide output and the op is HBM-bound anyway."""
    accs = [jnp.zeros((H, W), jnp.float32) for _ in range(4)]
    t = 0
    for ci in range(2):
        for kh in range(KERNEL_SIZE):
            band = pad_ref[ci, kh:kh + H, :]                  # (H, W + 6)
            for kw in range(KERNEL_SIZE):
                wgt = w_ref[ci * KERNEL_SIZE * KERNEL_SIZE + kh * KERNEL_SIZE + kw]
                accs[t % 4] = accs[t % 4] + wgt * band[:, kw:kw + W]
                t += 1
    return jax.nn.sigmoid((accs[0] + accs[1]) + (accs[2] + accs[3]))


def _store_rows_flat(dst_ref, att2d, H, W):
    """Flatten the (H, W) attention map row-by-row into a (1, H*W) ref."""
    for h in range(H):
        dst_ref[0:1, h * W:(h + 1) * W] = att2d[h:h + 1, :]


# ---------------------------------------------------------------------------
# Fused single-pass kernel: reduce + conv + sigmoid + multiply, x read once.
# ---------------------------------------------------------------------------
def _fused_kernel(x_ref, w_ref, o_ref, pad_ref, att_ref, *, C, H, W):
    # x_ref : (1, C, HW)   w_ref: (98,) SMEM   o_ref: (1, C, HW)
    # pad_ref: (2, H+6, W+6) f32   att_ref: (1, HW) f32
    inv_c = 1.0 / C
    x = x_ref[0].astype(jnp.float32)                          # (C, HW)
    mean_flat = jnp.sum(x, axis=0, keepdims=True) * inv_c     # (1, HW)
    max_flat = jnp.max(x, axis=0, keepdims=True)              # (1, HW)

    _fill_padded(pad_ref, mean_flat, max_flat, H, W)
    att2d = _conv7x7_sigmoid(pad_ref, w_ref, H, W)            # (H, W)
    _store_rows_flat(att_ref, att2d, H, W)

    # Re-index x_ref so the full f32 slab need not stay live across the conv.
    o_ref[0] = (x_ref[0].astype(jnp.float32) * att_ref[...]).astype(o_ref.dtype)


# ---------------------------------------------------------------------------
# Fallback pass A: channel reduce with conv + sigmoid fused into finalize.
# ---------------------------------------------------------------------------
def _reduce_conv_kernel(x_ref, w_ref, att_out_ref, red_ref, pad_ref, *, H, W, inv_c):
    # x_ref: (1, ct, HW)   w_ref: (98,) SMEM   att_out_ref: (1, 1, HW)
    # red_ref: (2, HW) f32 scratch (running sum, running max)
    # pad_ref: (2, H+6, W+6) f32 scratch
    HW = H * W
    c = pl.program_id(1)

    @pl.when(c == 0)
    def _():
        red_ref[0:1, :] = jnp.zeros((1, HW), jnp.float32)
        red_ref[1:2, :] = jnp.full((1, HW), -jnp.inf, jnp.float32)

    x = x_ref[0].astype(jnp.float32)                          # (ct, HW)
    red_ref[0:1, :] = red_ref[0:1, :] + jnp.sum(x, axis=0, keepdims=True)
    red_ref[1:2, :] = jnp.maximum(red_ref[1:2, :],
                                  jnp.max(x, axis=0, keepdims=True))

    @pl.when(c == pl.num_programs(1) - 1)
    def _():
        mean_flat = red_ref[0:1, :] * inv_c
        max_flat = red_ref[1:2, :]
        _fill_padded(pad_ref, mean_flat, max_flat, H, W)
        att2d = _conv7x7_sigmoid(pad_ref, w_ref, H, W)
        _store_rows_flat(att_out_ref.at[0], att2d, H, W)


# ---------------------------------------------------------------------------
# Fallback pass B: lane-dense broadcast multiply.
# ---------------------------------------------------------------------------
def _apply_kernel(x_ref, att_ref, o_ref):
    # x_ref: (1, ct, HW); att_ref: (1, 1, HW) f32; o_ref: (1, ct, HW)
    x = x_ref[...].astype(jnp.float32)
    o_ref[...] = (x * att_ref[...]).astype(o_ref.dtype)


# ---------------------------------------------------------------------------
# Wrapper
# ---------------------------------------------------------------------------
def spatial_attention(x, conv_weight, *, force_two_pass=False):
    """x: (B, C, H, W) float32/bfloat16.  conv_weight: (1, 2, 7, 7) OIHW."""
    B, C, H, W = x.shape
    HW = H * W
    itemsize = jnp.dtype(x.dtype).itemsize
    sublane_mult = 8 * max(1, 4 // itemsize)       # 8 f32, 16 bf16, 32 int8

    x_flat = x.reshape(B, C, HW)                           # lane-dense view (free)
    w_flat = conv_weight.reshape(-1).astype(jnp.float32)   # (98,) SMEM scalars

    budget = _vmem_budget_bytes()
    pad_shape = (2, H + 2 * PAD, W + 2 * PAD)

    fused_ok = (not force_two_pass and
                _fused_vmem_bytes(C, HW, H, W, itemsize, itemsize) <= budget)

    if fused_ok:
        # ---- Single pass: x read from HBM exactly once --------------------
        out_flat = pl.pallas_call(
            functools.partial(_fused_kernel, C=C, H=H, W=W),
            out_shape=jax.ShapeDtypeStruct((B, C, HW), x.dtype),
            grid=(B,),
            in_specs=[
                pl.BlockSpec((1, C, HW), lambda b: (b, 0, 0)),
                pl.BlockSpec(memory_space=pltpu.MemorySpace.SMEM),
            ],
            out_specs=pl.BlockSpec((1, C, HW), lambda b: (b, 0, 0)),
            scratch_shapes=[
                pltpu.VMEM(pad_shape, jnp.float32),
                pltpu.VMEM((1, HW), jnp.float32),
            ],
            compiler_params=pltpu.CompilerParams(
                dimension_semantics=("parallel",),
                vmem_limit_bytes=budget),
            cost_estimate=pl.CostEstimate(
                flops=B * (3 * C * HW + 2 * _N_TAPS * HW),
                transcendentals=B * HW,
                bytes_accessed=2 * B * C * HW * itemsize),
        )(x_flat, w_flat)
        return out_flat.reshape(B, C, H, W)

    # ---- Two-pass fallback (per-batch slab too large for VMEM) ------------
    ct = _channel_tile(C, HW, itemsize, budget, sublane_mult)

    att = pl.pallas_call(
        functools.partial(_reduce_conv_kernel, H=H, W=W, inv_c=1.0 / C),
        out_shape=jax.ShapeDtypeStruct((B, 1, HW), jnp.float32),
        grid=(B, C // ct),
        in_specs=[
            pl.BlockSpec((1, ct, HW), lambda b, c: (b, c, 0)),
            pl.BlockSpec(memory_space=pltpu.MemorySpace.SMEM),
        ],
        out_specs=pl.BlockSpec((1, 1, HW), lambda b, c: (b, 0, 0)),
        scratch_shapes=[
            pltpu.VMEM((2, HW), jnp.float32),
            pltpu.VMEM(pad_shape, jnp.float32),
        ],
        compiler_params=pltpu.CompilerParams(
            dimension_semantics=("parallel", "arbitrary"),
            vmem_limit_bytes=budget),
        cost_estimate=pl.CostEstimate(
            flops=B * (2 * C * HW + 2 * _N_TAPS * HW),
            transcendentals=B * HW,
            bytes_accessed=B * C * HW * itemsize + B * HW * 4),
    )(x_flat, w_flat)

    out_flat = pl.pallas_call(
        _apply_kernel,
        out_shape=jax.ShapeDtypeStruct((B, C, HW), x.dtype),
        grid=(B, C // ct),
        in_specs=[
            pl.BlockSpec((1, ct, HW), lambda b, c: (b, c, 0)),
            pl.BlockSpec((1, 1, HW), lambda b, c: (b, 0, 0)),
        ],
        out_specs=pl.BlockSpec((1, ct, HW), lambda b, c: (b, c, 0)),
        compiler_params=pltpu.CompilerParams(
            dimension_semantics=("parallel", "parallel"),
            vmem_limit_bytes=budget),
        cost_estimate=pl.CostEstimate(
            flops=B * C * HW,
            transcendentals=0,
            bytes_accessed=2 * B * C * HW * itemsize + B * HW * 4),
    )(x_flat, att)

    return out_flat.reshape(B, C, H, W)


# ---------------------------------------------------------------------------
# Reference + test
# ---------------------------------------------------------------------------
def _reference(x, conv_weight):
    avg_out = jnp.mean(x, axis=1, keepdims=True)
    max_out = jnp.max(x, axis=1, keepdims=True)
    combined = jnp.concatenate([avg_out, max_out], axis=1)
    conv = jax.lax.conv_general_dilated(
        combined, conv_weight, window_strides=(1, 1),
        padding=[(PAD, PAD), (PAD, PAD)],
        dimension_numbers=("NCHW", "OIHW", "NCHW"))
    return x * jax.nn.sigmoid(conv)


if __name__ == "__main__":
    key = jax.random.PRNGKey(0)
    kx, kw = jax.random.split(key)

    B, C, H, W = 2, 4, 16, 16
    x = jax.random.normal(kx, (B, C, H, W), dtype=jnp.float32)
    # Deterministic synthetic weight, shape of nn.Conv2d(2, 1, 7, bias=False).
    conv_weight = 0.1 * jax.random.normal(
        kw, (1, 2, KERNEL_SIZE, KERNEL_SIZE), dtype=jnp.float32)

    ref = _reference(x, conv_weight)

    # Fused single-pass path (slab easily fits VMEM at this size).
    out = jax.block_until_ready(spatial_attention(x, conv_weight))
    assert out.shape == (B, C, H, W)
    assert jnp.allclose(out, ref, atol=1e-4, rtol=1e-4)

    # Two-pass fallback path, exercised explicitly so both paths stay healthy.
    out2 = jax.block_until_ready(
        spatial_attention(x, conv_weight, force_two_pass=True))
    assert jnp.allclose(out2, ref, atol=1e-4, rtol=1e-4)

    print("KERNEL_OK")
</pallas_src>

<mosaic_0001>
module attributes {stable_mosaic.version = 11 : i64} {
  func.func @_fused_kernel(%arg0: i32, %arg1: memref<1x4x256xf32, #tpu.memory_space<vmem>>, %arg2: memref<98xf32, #tpu.memory_space<smem>>, %arg3: memref<1x4x256xf32, #tpu.memory_space<vmem>>, %arg4: memref<2x22x22xf32, #tpu.memory_space<vmem>>, %arg5: memref<1x256xf32, #tpu.memory_space<vmem>>) attributes {dimension_semantics = [#tpu.dimension_semantics<parallel>], iteration_bounds = array<i64: 2>, scalar_prefetch = 0 : i64, scratch_operands = 2 : i64, tpu.core_type = #tpu.core_type<tc>, window_params = [{transform_indices = @transform_0, window_bounds = array<i64: 1, 4, 256>}, {transform_indices = @transform_1, window_bounds = array<i64: 98>}, {transform_indices = @transform_2, window_bounds = array<i64: 1, 4, 256>}]} {
    %c0 = arith.constant 0 : index
    %c0_0 = arith.constant 0 : index
    %c0_1 = arith.constant 0 : index
    %0 = vector.load %arg1[%c0, %c0_0, %c0_1] : memref<1x4x256xf32, #tpu.memory_space<vmem>>, vector<1x4x256xf32>
    %1 = vector.shape_cast %0 : vector<1x4x256xf32> to vector<4x256xf32>
    %cst = arith.constant dense<0.000000e+00> : vector<256xf32>
    %2 = vector.multi_reduction <add>, %1, %cst [0] : vector<4x256xf32> to vector<256xf32>
    %3 = vector.shape_cast %2 : vector<256xf32> to vector<1x256xf32>
    %cst_2 = arith.constant 2.500000e-01 : f32
    %4 = vector.broadcast %cst_2 : f32 to vector<1x256xf32>
    %5 = arith.mulf %3, %4 : vector<1x256xf32>
    %cst_3 = arith.constant dense<0xFF800000> : vector<256xf32>
    %6 = vector.multi_reduction <maximumf>, %1, %cst_3 [0] : vector<4x256xf32> to vector<256xf32>
    %7 = vector.shape_cast %6 : vector<256xf32> to vector<1x256xf32>
    %cst_4 = arith.constant 0.000000e+00 : f32
    %8 = vector.broadcast %cst_4 : f32 to vector<2x22x22xf32>
    %c0_5 = arith.constant 0 : index
    %c0_6 = arith.constant 0 : index
    %c0_7 = arith.constant 0 : index
    %9 = vector.load %arg4[%c0_5, %c0_6, %c0_7] : memref<2x22x22xf32, #tpu.memory_space<vmem>>, vector<2x22x22xf32>
    tpu.vector_store %arg4[%c0_5, %c0_6, %c0_7], %8 {strides = array<i32>} : memref<2x22x22xf32, #tpu.memory_space<vmem>>, vector<2x22x22xf32>,
    %10 = vector.extract_strided_slice %5 {offsets = [0, 0], sizes = [1, 16], strides = [1, 1]} : vector<1x256xf32> to vector<1x16xf32>
    %c0_8 = arith.constant 0 : index
    %c3 = arith.constant 3 : index
    %c3_9 = arith.constant 3 : index
    %11 = vector.load %arg4[%c0_8, %c3, %c3_9] : memref<2x22x22xf32, #tpu.memory_space<vmem>>, vector<1x1x16xf32>
    %12 = vector.shape_cast %11 : vector<1x1x16xf32> to vector<1x16xf32>
    %13 = vector.shape_cast %10 : vector<1x16xf32> to vector<1x1x16xf32>
    tpu.vector_store %arg4[%c0_8, %c3, %c3_9], %13 {strides = array<i32>} : memref<2x22x22xf32, #tpu.memory_space<vmem>>, vector<1x1x16xf32>,
    %14 = vector.extract_strided_slice %7 {offsets = [0, 0], sizes = [1, 16], strides = [1, 1]} : vector<1x256xf32> to vector<1x16xf32>
    %c1 = arith.constant 1 : index
    %c3_10 = arith.constant 3 : index
    %c3_11 = arith.constant 3 : index
    %15 = vector.load %arg4[%c1, %c3_10, %c3_11] : memref<2x22x22xf32, #tpu.memory_space<vmem>>, vector<1x1x16xf32>
    %16 = vector.shape_cast %15 : vector<1x1x16xf32> to vector<1x16xf32>
    %17 = vector.shape_cast %14 : vector<1x16xf32> to vector<1x1x16xf32>
    tpu.vector_store %arg4[%c1, %c3_10, %c3_11], %17 {strides = array<i32>} : memref<2x22x22xf32, #tpu.memory_space<vmem>>, vector<1x1x16xf32>,
    %18 = vector.extract_strided_slice %5 {offsets = [0, 16], sizes = [1, 16], strides = [1, 1]} : vector<1x256xf32> to vector<1x16xf32>
    %c0_12 = arith.constant 0 : index
    %c4 = arith.constant 4 : index
    %c3_13 = arith.constant 3 : index
    %19 = vector.load %arg4[%c0_12, %c4, %c3_13] : memref<2x22x22xf32, #tpu.memory_space<vmem>>, vector<1x1x16xf32>
    %20 = vector.shape_cast %19 : vector<1x1x16xf32> to vector<1x16xf32>
    %21 = vector.shape_cast %18 : vector<1x16xf32> to vector<1x1x16xf32>
    tpu.vector_store %arg4[%c0_12, %c4, %c3_13], %21 {strides = array<i32>} : memref<2x22x22xf32, #tpu.memory_space<vmem>>, vector<1x1x16xf32>,
    %22 = vector.extract_strided_slice %7 {offsets = [0, 16], sizes = [1, 16], strides = [1, 1]} : vector<1x256xf32> to vector<1x16xf32>
    %c1_14 = arith.constant 1 : index
    %c4_15 = arith.constant 4 : index
    %c3_16 = arith.constant 3 : index
    %23 = vector.load %arg4[%c1_14, %c4_15, %c3_16] : memref<2x22x22xf32, #tpu.memory_space<vmem>>, vector<1x1x16xf32>
    %24 = vector.shape_cast %23 : vector<1x1x16xf32> to vector<1x16xf32>
    %25 = vector.shape_cast %22 : vector<1x16xf32> to vector<1x1x16xf32>
    tpu.vector_store %arg4[%c1_14, %c4_15, %c3_16], %25 {strides = array<i32>} : memref<2x22x22xf32, #tpu.memory_space<vmem>>, vector<1x1x16xf32>,
    %26 = vector.extract_strided_slice %5 {offsets = [0, 32], sizes = [1, 16], strides = [1, 1]} : vector<1x256xf32> to vector<1x16xf32>
    %c0_17 = arith.constant 0 : index
    %c5 = arith.constant 5 : index
    %c3_18 = arith.constant 3 : index
    %27 = vector.load %arg4[%c0_17, %c5, %c3_18] : memref<2x22x22xf32, #tpu.memory_space<vmem>>, vector<1x1x16xf32>
    %28 = vector.shape_cast %27 : vector<1x1x16xf32> to vector<1x16xf32>
    %29 = vector.shape_cast %26 : vector<1x16xf32> to vector<1x1x16xf32>
    tpu.vector_store %arg4[%c0_17, %c5, %c3_18], %29 {strides = array<i32>} : memref<2x22x22xf32, #tpu.memory_space<vmem>>, vector<1x1x16xf32>,
    %30 = vector.extract_strided_slice %7 {offsets = [0, 32], sizes = [1, 16], strides = [1, 1]} : vector<1x256xf32> to vector<1x16xf32>
    %c1_19 = arith.constant 1 : index
    %c5_20 = arith.constant 5 : index
    %c3_21 = arith.constant 3 : index
    %31 = vector.load %arg4[%c1_19, %c5_20, %c3_21] : memref<2x22x22xf32, #tpu.memory_space<vmem>>, vector<1x1x16xf32>
    %32 = vector.shape_cast %31 : vector<1x1x16xf32> to vector<1x16xf32>
    %33 = vector.shape_cast %30 : vector<1x16xf32> to vector<1x1x16xf32>
    tpu.vector_store %arg4[%c1_19, %c5_20, %c3_21], %33 {strides = array<i32>} : memref<2x22x22xf32, #tpu.memory_space<vmem>>, vector<1x1x16xf32>,
    %34 = vector.extract_strided_slice %5 {offsets = [0, 48], sizes = [1, 16], strides = [1, 1]} : vector<1x256xf32> to vector<1x16xf32>
    %c0_22 = arith.constant 0 : index
    %c6 = arith.constant 6 : index
    %c3_23 = arith.constant 3 : index
    %35 = vector.load %arg4[%c0_22, %c6, %c3_23] : memref<2x22x22xf32, #tpu.memory_space<vmem>>, vector<1x1x16xf32>
    %36 = vector.shape_cast %35 : vector<1x1x16xf32> to vector<1x16xf32>
    %37 = vector.shape_cast %34 : vector<1x16xf32> to vector<1x1x16xf32>
    tpu.vector_store %arg4[%c0_22, %c6, %c3_23], %37 {strides = array<i32>} : memref<2x22x22xf32, #tpu.memory_space<vmem>>, vector<1x1x16xf32>,
    %38 = vector.extract_strided_slice %7 {offsets = [0, 48], sizes = [1, 16], strides = [1, 1]} : vector<1x256xf32> to vector<1x16xf32>
    %c1_24 = arith.constant 1 : index
    %c6_25 = arith.constant 6 : index
    %c3_26 = arith.constant 3 : index
    %39 = vector.load %arg4[%c1_24, %c6_25, %c3_26] : memref<2x22x22xf32, #tpu.memory_space<vmem>>, vector<1x1x16xf32>
    %40 = vector.shape_cast %39 : vector<1x1x16xf32> to vector<1x16xf32>
    %41 = vector.shape_cast %38 : vector<1x16xf32> to vector<1x1x16xf32>
    tpu.vector_store %arg4[%c1_24, %c6_25, %c3_26], %41 {strides = array<i32>} : memref<2x22x22xf32, #tpu.memory_space<vmem>>, vector<1x1x16xf32>,
    %42 = vector.extract_strided_slice %5 {offsets = [0, 64], sizes = [1, 16], strides = [1, 1]} : vector<1x256xf32> to vector<1x16xf32>
    %c0_27 = arith.constant 0 : index
    %c7 = arith.constant 7 : index
    %c3_28 = arith.constant 3 : index
    %43 = vector.load %arg4[%c0_27, %c7, %c3_28] : memref<2x22x22xf32, #tpu.memory_space<vmem>>, vector<1x1x16xf32>
    %44 = vector.shape_cast %43 : vector<1x1x16xf32> to vector<1x16xf32>
    %45 = vector.shape_cast %42 : vector<1x16xf32> to vector<1x1x16xf32>
    tpu.vector_store %arg4[%c0_27, %c7, %c3_28], %45 {strides = array<i32>} : memref<2x22x22xf32, #tpu.memory_space<vmem>>, vector<1x1x16xf32>,
    %46 = vector.extract_strided_slice %7 {offsets = [0, 64], sizes = [1, 16], strides = [1, 1]} : vector<1x256xf32> to vector<1x16xf32>
    %c1_29 = arith.constant 1 : index
    %c7_30 = arith.constant 7 : index
    %c3_31 = arith.constant 3 : index
    %47 = vector.load %arg4[%c1_29, %c7_30, %c3_31] : memref<2x22x22xf32, #tpu.memory_space<vmem>>, vector<1x1x16xf32>
    %48 = vector.shape_cast %47 : vector<1x1x16xf32> to vector<1x16xf32>
    %49 = vector.shape_cast %46 : vector<1x16xf32> to vector<1x1x16xf32>
    tpu.vector_store %arg4[%c1_29, %c7_30, %c3_31], %49 {strides = array<i32>} : memref<2x22x22xf32, #tpu.memory_space<vmem>>, vector<1x1x16xf32>,
    %50 = vector.extract_strided_slice %5 {offsets = [0, 80], sizes = [1, 16], strides = [1, 1]} : vector<1x256xf32> to vector<1x16xf32>
    %c0_32 = arith.constant 0 : index
    %c8 = arith.constant 8 : index
    %c3_33 = arith.constant 3 : index
    %51 = vector.load %arg4[%c0_32, %c8, %c3_33] : memref<2x22x22xf32, #tpu.memory_space<vmem>>, vector<1x1x16xf32>
    %52 = vector.shape_cast %51 : vector<1x1x16xf32> to vector<1x16xf32>
    %53 = vector.shape_cast %50 : vector<1x16xf32> to vector<1x1x16xf32>
    tpu.vector_store %arg4[%c0_32, %c8, %c3_33], %53 {strides = array<i32>} : memref<2x22x22xf32, #tpu.memory_space<vmem>>, vector<1x1x16xf32>,
    %54 = vector.extract_strided_slice %7 {offsets = [0, 80], sizes = [1, 16], strides = [1, 1]} : vector<1x256xf32> to vector<1x16xf32>
    %c1_34 = arith.constant 1 : index
    %c8_35 = arith.constant 8 : index
    %c3_36 = arith.constant 3 : index
    %55 = vector.load %arg4[%c1_34, %c8_35, %c3_36] : memref<2x22x22xf32, #tpu.memory_space<vmem>>, vector<1x1x16xf32>
    %56 = vector.shape_cast %55 : vector<1x1x16xf32> to vector<1x16xf32>
    %57 = vector.shape_cast %54 : vector<1x16xf32> to vector<1x1x16xf32>
    tpu.vector_store %arg4[%c1_34, %c8_35, %c3_36], %57 {strides = array<i32>} : memref<2x22x22xf32, #tpu.memory_space<vmem>>, vector<1x1x16xf32>,
    %58 = vector.extract_strided_slice %5 {offsets = [0, 96], sizes = [1, 16], strides = [1, 1]} : vector<1x256xf32> to vector<1x16xf32>
    %c0_37 = arith.constant 0 : index
    %c9 = arith.constant 9 : index
    %c3_38 = arith.constant 3 : index
    %59 = vector.load %arg4[%c0_37, %c9, %c3_38] : memref<2x22x22xf32, #tpu.memory_space<vmem>>, vector<1x1x16xf32>
    %60 = vector.shape_cast %59 : vector<1x1x16xf32> to vector<1x16xf32>
    %61 = vector.shape_cast %58 : vector<1x16xf32> to vector<1x1x16xf32>
    tpu.vector_store %arg4[%c0_37, %c9, %c3_38], %61 {strides = array<i32>} : memref<2x22x22xf32, #tpu.memory_space<vmem>>, vector<1x1x16xf32>,
    %62 = vector.extract_strided_slice %7 {offsets = [0, 96], sizes = [1, 16], strides = [1, 1]} : vector<1x256xf32> to vector<1x16xf32>
    %c1_39 = arith.constant 1 : index
    %c9_40 = arith.constant 9 : index
    %c3_41 = arith.constant 3 : index
    %63 = vector.load %arg4[%c1_39, %c9_40, %c3_41] : memref<2x22x22xf32, #tpu.memory_space<vmem>>, vector<1x1x16xf32>
    %64 = vector.shape_cast %63 : vector<1x1x16xf32> to vector<1x16xf32>
    %65 = vector.shape_cast %62 : vector<1x16xf32> to vector<1x1x16xf32>
    tpu.vector_store %arg4[%c1_39, %c9_40, %c3_41], %65 {strides = array<i32>} : memref<2x22x22xf32, #tpu.memory_space<vmem>>, vector<1x1x16xf32>,
    %66 = vector.extract_strided_slice %5 {offsets = [0, 112], sizes = [1, 16], strides = [1, 1]} : vector<1x256xf32> to vector<1x16xf32>
    %c0_42 = arith.constant 0 : index
    %c10 = arith.constant 10 : index
    %c3_43 = arith.constant 3 : index
    %67 = vector.load %arg4[%c0_42, %c10, %c3_43] : memref<2x22x22xf32, #tpu.memory_space<vmem>>, vector<1x1x16xf32>
    %68 = vector.shape_cast %67 : vector<1x1x16xf32> to vector<1x16xf32>
    %69 = vector.shape_cast %66 : vector<1x16xf32> to vector<1x1x16xf32>
    tpu.vector_store %arg4[%c0_42, %c10, %c3_43], %69 {strides = array<i32>} : memref<2x22x22xf32, #tpu.memory_space<vmem>>, vector<1x1x16xf32>,
    %70 = vector.extract_strided_slice %7 {offsets = [0, 112], sizes = [1, 16], strides = [1, 1]} : vector<1x256xf32> to vector<1x16xf32>
    %c1_44 = arith.constant 1 : index
    %c10_45 = arith.constant 10 : index
    %c3_46 = arith.constant 3 : index
    %71 = vector.load %arg4[%c1_44, %c10_45, %c3_46] : memref<2x22x22xf32, #tpu.memory_space<vmem>>, vector<1x1x16xf32>
    %72 = vector.shape_cast %71 : vector<1x1x16xf32> to vector<1x16xf32>
    %73 = vector.shape_cast %70 : vector<1x16xf32> to vector<1x1x16xf32>
    tpu.vector_store %arg4[%c1_44, %c10_45, %c3_46], %73 {strides = array<i32>} : memref<2x22x22xf32, #tpu.memory_space<vmem>>, vector<1x1x16xf32>,
    %74 = vector.extract_strided_slice %5 {offsets = [0, 128], sizes = [1, 16], strides = [1, 1]} : vector<1x256xf32> to vector<1x16xf32>
    %c0_47 = arith.constant 0 : index
    %c11 = arith.constant 11 : index
    %c3_48 = arith.constant 3 : index
    %75 = vector.load %arg4[%c0_47, %c11, %c3_48] : memref<2x22x22xf32, #tpu.memory_space<vmem>>, vector<1x1x16xf32>
    %76 = vector.shape_cast %75 : vector<1x1x16xf32> to vector<1x16xf32>
    %77 = vector.shape_cast %74 : vector<1x16xf32> to vector<1x1x16xf32>
    tpu.vector_store %arg4[%c0_47, %c11, %c3_48], %77 {strides = array<i32>} : memref<2x22x22xf32, #tpu.memory_space<vmem>>, vector<1x1x16xf32>,
    %78 = vector.extract_strided_slice %7 {offsets = [0, 128], sizes = [1, 16], strides = [1, 1]} : vector<1x256xf32> to vector<1x16xf32>
    %c1_49 = arith.constant 1 : index
    %c11_50 = arith.constant 11 : index
    %c3_51 = arith.constant 3 : index
    %79 = vector.load %arg4[%c1_49, %c11_50, %c3_51] : memref<2x22x22xf32, #tpu.memory_space<vmem>>, vector<1x1x16xf32>
    %80 = vector.shape_cast %79 : vector<1x1x16xf32> to vector<1x16xf32>
    %81 = vector.shape_cast %78 : vector<1x16xf32> to vector<1x1x16xf32>
    tpu.vector_store %arg4[%c1_49, %c11_50, %c3_51], %81 {strides = array<i32>} : memref<2x22x22xf32, #tpu.memory_space<vmem>>, vector<1x1x16xf32>,
    %82 = vector.extract_strided_slice %5 {offsets = [0, 144], sizes = [1, 16], strides = [1, 1]} : vector<1x256xf32> to vector<1x16xf32>
    %c0_52 = arith.constant 0 : index
    %c12 = arith.constant 12 : index
    %c3_53 = arith.constant 3 : index
    %83 = vector.load %arg4[%c0_52, %c12, %c3_53] : memref<2x22x22xf32, #tpu.memory_space<vmem>>, vector<1x1x16xf32>
    %84 = vector.shape_cast %83 : vector<1x1x16xf32> to vector<1x16xf32>
    %85 = vector.shape_cast %82 : vector<1x16xf32> to vector<1x1x16xf32>
    tpu.vector_store %arg4[%c0_52, %c12, %c3_53], %85 {strides = array<i32>} : memref<2x22x22xf32, #tpu.memory_space<vmem>>, vector<1x1x16xf32>,
    %86 = vector.extract_strided_slice %7 {offsets = [0, 144], sizes = [1, 16], strides = [1, 1]} : vector<1x256xf32> to vector<1x16xf32>
    %c1_54 = arith.constant 1 : index
    %c12_55 = arith.constant 12 : index
    %c3_56 = arith.constant 3 : index
    %87 = vector.load %arg4[%c1_54, %c12_55, %c3_56] : memref<2x22x22xf32, #tpu.memory_space<vmem>>, vector<1x1x16xf32>
    %88 = vector.shape_cast %87 : vector<1x1x16xf32> to vector<1x16xf32>
    %89 = vector.shape_cast %86 : vector<1x16xf32> to vector<1x1x16xf32>
    tpu.vector_store %arg4[%c1_54, %c12_55, %c3_56], %89 {strides = array<i32>} : memref<2x22x22xf32, #tpu.memory_space<vmem>>, vector<1x1x16xf32>,
    %90 = vector.extract_strided_slice %5 {offsets = [0, 160], sizes = [1, 16], strides = [1, 1]} : vector<1x256xf32> to vector<1x16xf32>
    %c0_57 = arith.constant 0 : index
    %c13 = arith.constant 13 : index
    %c3_58 = arith.constant 3 : index
    %91 = vector.load %arg4[%c0_57, %c13, %c3_58] : memref<2x22x22xf32, #tpu.memory_space<vmem>>, vector<1x1x16xf32>
    %92 = vector.shape_cast %91 : vector<1x1x16xf32> to vector<1x16xf32>
    %93 = vector.shape_cast %90 : vector<1x16xf32> to vector<1x1x16xf32>
    tpu.vector_store %arg4[%c0_57, %c13, %c3_58], %93 {strides = array<i32>} : memref<2x22x22xf32, #tpu.memory_space<vmem>>, vector<1x1x16xf32>,
    %94 = vector.extract_strided_slice %7 {offsets = [0, 160], sizes = [1, 16], strides = [1, 1]} : vector<1x256xf32> to vector<1x16xf32>
    %c1_59 = arith.constant 1 : index
    %c13_60 = arith.constant 13 : index
    %c3_61 = arith.constant 3 : index
    %95 = vector.load %arg4[%c1_59, %c13_60, %c3_61] : memref<2x22x22xf32, #tpu.memory_space<vmem>>, vector<1x1x16xf32>
    %96 = vector.shape_cast %95 : vector<1x1x16xf32> to vector<1x16xf32>
    %97 = vector.shape_cast %94 : vector<1x16xf32> to vector<1x1x16xf32>
    tpu.vector_store %arg4[%c1_59, %c13_60, %c3_61], %97 {strides = array<i32>} : memref<2x22x22xf32, #tpu.memory_space<vmem>>, vector<1x1x16xf32>,
    %98 = vector.extract_strided_slice %5 {offsets = [0, 176], sizes = [1, 16], strides = [1, 1]} : vector<1x256xf32> to vector<1x16xf32>
    %c0_62 = arith.constant 0 : index
    %c14 = arith.constant 14 : index
    %c3_63 = arith.constant 3 : index
    %99 = vector.load %arg4[%c0_62, %c14, %c3_63] : memref<2x22x22xf32, #tpu.memory_space<vmem>>, vector<1x1x16xf32>
    %100 = vector.shape_cast %99 : vector<1x1x16xf32> to vector<1x16xf32>
    %101 = vector.shape_cast %98 : vector<1x16xf32> to vector<1x1x16xf32>
    tpu.vector_store %arg4[%c0_62, %c14, %c3_63], %101 {strides = array<i32>} : memref<2x22x22xf32, #tpu.memory_space<vmem>>, vector<1x1x16xf32>,
    %102 = vector.extract_strided_slice %7 {offsets = [0, 176], sizes = [1, 16], strides = [1, 1]} : vector<1x256xf32> to vector<1x16xf32>
    %c1_64 = arith.constant 1 : index
    %c14_65 = arith.constant 14 : index
    %c3_66 = arith.constant 3 : index
    %103 = vector.load %arg4[%c1_64, %c14_65, %c3_66] : memref<2x22x22xf32, #tpu.memory_space<vmem>>, vector<1x1x16xf32>
    %104 = vector.shape_cast %103 : vector<1x1x16xf32> to vector<1x16xf32>
    %105 = vector.shape_cast %102 : vector<1x16xf32> to vector<1x1x16xf32>
    tpu.vector_store %arg4[%c1_64, %c14_65, %c3_66], %105 {strides = array<i32>} : memref<2x22x22xf32, #tpu.memory_space<vmem>>, vector<1x1x16xf32>,
    %106 = vector.extract_strided_slice %5 {offsets = [0, 192], sizes = [1, 16], strides = [1, 1]} : vector<1x256xf32> to vector<1x16xf32>
    %c0_67 = arith.constant 0 : index
    %c15 = arith.constant 15 : index
    %c3_68 = arith.constant 3 : index
    %107 = vector.load %arg4[%c0_67, %c15, %c3_68] : memref<2x22x22xf32, #tpu.memory_space<vmem>>, vector<1x1x16xf32>
    %108 = vector.shape_cast %107 : vector<1x1x16xf32> to vector<1x16xf32>
    %109 = vector.shape_cast %106 : vector<1x16xf32> to vector<1x1x16xf32>
    tpu.vector_store %arg4[%c0_67, %c15, %c3_68], %109 {strides = array<i32>} : memref<2x22x22xf32, #tpu.memory_space<vmem>>, vector<1x1x16xf32>,
    %110 = vector.extract_strided_slice %7 {offsets = [0, 192], sizes = [1, 16], strides = [1, 1]} : vector<1x256xf32> to vector<1x16xf32>
    %c1_69 = arith.constant 1 : index
    %c15_70 = arith.constant 15 : index
    %c3_71 = arith.constant 3 : index
    %111 = vector.load %arg4[%c1_69, %c15_70, %c3_71] : memref<2x22x22xf32, #tpu.memory_space<vmem>>, vector<1x1x16xf32>
    %112 = vector.shape_cast %111 : vector<1x1x16xf32> to vector<1x16xf32>
    %113 = vector.shape_cast %110 : vector<1x16xf32> to vector<1x1x16xf32>
    tpu.vector_store %arg4[%c1_69, %c15_70, %c3_71], %113 {strides = array<i32>} : memref<2x22x22xf32, #tpu.memory_space<vmem>>, vector<1x1x16xf32>,
    %114 = vector.extract_strided_slice %5 {offsets = [0, 208], sizes = [1, 16], strides = [1, 1]} : vector<1x256xf32> to vector<1x16xf32>
    %c0_72 = arith.constant 0 : index
    %c16 = arith.constant 16 : index
    %c3_73 = arith.constant 3 : index
    %115 = vector.load %arg4[%c0_72, %c16, %c3_73] : memref<2x22x22xf32, #tpu.memory_space<vmem>>, vector<1x1x16xf32>
    %116 = vector.shape_cast %115 : vector<1x1x16xf32> to vector<1x16xf32>
    %117 = vector.shape_cast %114 : vector<1x16xf32> to vector<1x1x16xf32>
    tpu.vector_store %arg4[%c0_72, %c16, %c3_73], %117 {strides = array<i32>} : memref<2x22x22xf32, #tpu.memory_space<vmem>>, vector<1x1x16xf32>,
    %118 = vector.extract_strided_slice %7 {offsets = [0, 208], sizes = [1, 16], strides = [1, 1]} : vector<1x256xf32> to vector<1x16xf32>
    %c1_74 = arith.constant 1 : index
    %c16_75 = arith.constant 16 : index
    %c3_76 = arith.constant 3 : index
    %119 = vector.load %arg4[%c1_74, %c16_75, %c3_76] : memref<2x22x22xf32, #tpu.memory_space<vmem>>, vector<1x1x16xf32>
    %120 = vector.shape_cast %119 : vector<1x1x16xf32> to vector<1x16xf32>
    %121 = vector.shape_cast %118 : vector<1x16xf32> to vector<1x1x16xf32>
    tpu.vector_store %arg4[%c1_74, %c16_75, %c3_76], %121 {strides = array<i32>} : memref<2x22x22xf32, #tpu.memory_space<vmem>>, vector<1x1x16xf32>,
    %122 = vector.extract_strided_slice %5 {offsets = [0, 224], sizes = [1, 16], strides = [1, 1]} : vector<1x256xf32> to vector<1x16xf32>
    %c0_77 = arith.constant 0 : index
    %c17 = arith.constant 17 : index
    %c3_78 = arith.constant 3 : index
    %123 = vector.load %arg4[%c0_77, %c17, %c3_78] : memref<2x22x22xf32, #tpu.memory_space<vmem>>, vector<1x1x16xf32>
    %124 = vector.shape_cast %123 : vector<1x1x16xf32> to vector<1x16xf32>
    %125 = vector.shape_cast %122 : vector<1x16xf32> to vector<1x1x16xf32>
    tpu.vector_store %arg4[%c0_77, %c17, %c3_78], %125 {strides = array<i32>} : memref<2x22x22xf32, #tpu.memory_space<vmem>>, vector<1x1x16xf32>,
    %126 = vector.extract_strided_slice %7 {offsets = [0, 224], sizes = [1, 16], strides = [1, 1]} : vector<1x256xf32> to vector<1x16xf32>
    %c1_79 = arith.constant 1 : index
    %c17_80 = arith.constant 17 : index
    %c3_81 = arith.constant 3 : index
    %127 = vector.load %arg4[%c1_79, %c17_80, %c3_81] : memref<2x22x22xf32, #tpu.memory_space<vmem>>, vector<1x1x16xf32>
    %128 = vector.shape_cast %127 : vector<1x1x16xf32> to vector<1x16xf32>
    %129 = vector.shape_cast %126 : vector<1x16xf32> to vector<1x1x16xf32>
    tpu.vector_store %arg4[%c1_79, %c17_80, %c3_81], %129 {strides = array<i32>} : memref<2x22x22xf32, #tpu.memory_space<vmem>>, vector<1x1x16xf32>,
    %130 = vector.extract_strided_slice %5 {offsets = [0, 240], sizes = [1, 16], strides = [1, 1]} : vector<1x256xf32> to vector<1x16xf32>
    %c0_82 = arith.constant 0 : index
    %c18 = arith.constant 18 : index
    %c3_83 = arith.constant 3 : index
    %131 = vector.load %arg4[%c0_82, %c18, %c3_83] : memref<2x22x22xf32, #tpu.memory_space<vmem>>, vector<1x1x16xf32>
    %132 = vector.shape_cast %131 : vector<1x1x16xf32> to vector<1x16xf32>
    %133 = vector.shape_cast %130 : vector<1x16xf32> to vector<1x1x16xf32>
    tpu.vector_store %arg4[%c0_82, %c18, %c3_83], %133 {strides = array<i32>} : memref<2x22x22xf32, #tpu.memory_space<vmem>>, vector<1x1x16xf32>,
    %134 = vector.extract_strided_slice %7 {offsets = [0, 240], sizes = [1, 16], strides = [1, 1]} : vector<1x256xf32> to vector<1x16xf32>
    %c1_84 = arith.constant 1 : index
    %c18_85 = arith.constant 18 : index
    %c3_86 = arith.constant 3 : index
    %135 = vector.load %arg4[%c1_84, %c18_85, %c3_86] : memref<2x22x22xf32, #tpu.memory_space<vmem>>, vector<1x1x16xf32>
    %136 = vector.shape_cast %135 : vector<1x1x16xf32> to vector<1x16xf32>
    %137 = vector.shape_cast %134 : vector<1x16xf32> to vector<1x1x16xf32>
    tpu.vector_store %arg4[%c1_84, %c18_85, %c3_86], %137 {strides = array<i32>} : memref<2x22x22xf32, #tpu.memory_space<vmem>>, vector<1x1x16xf32>,
    %cst_87 = arith.constant 0.000000e+00 : f32
    %138 = vector.broadcast %cst_87 : f32 to vector<16x16xf32>
    %cst_88 = arith.constant 0.000000e+00 : f32
    %139 = vector.broadcast %cst_88 : f32 to vector<16x16xf32>
    %cst_89 = arith.constant 0.000000e+00 : f32
    %140 = vector.broadcast %cst_89 : f32 to vector<16x16xf32>
    %cst_90 = arith.constant 0.000000e+00 : f32
    %141 = vector.broadcast %cst_90 : f32 to vector<16x16xf32>
    %c0_91 = arith.constant 0 : index
    %c0_92 = arith.constant 0 : index
    %c0_93 = arith.constant 0 : index
    %142 = vector.load %arg4[%c0_91, %c0_92, %c0_93] : memref<2x22x22xf32, #tpu.memory_space<vmem>>, vector<1x16x22xf32>
    %143 = vector.shape_cast %142 : vector<1x16x22xf32> to vector<16x22xf32>
    %c0_94 = arith.constant 0 : index
    %144 = memref.load %arg2[%c0_94] : memref<98xf32, #tpu.memory_space<smem>>
    %145 = vector.extract_strided_slice %143 {offsets = [0, 0], sizes = [16, 16], strides = [1, 1]} : vector<16x22xf32> to vector<16x16xf32>
    %146 = vector.broadcast %144 : f32 to vector<16x16xf32>
    %147 = arith.mulf %146, %145 : vector<16x16xf32>
    %148 = arith.addf %138, %147 : vector<16x16xf32>
    %c1_95 = arith.constant 1 : index
    %149 = memref.load %arg2[%c1_95] : memref<98xf32, #tpu.memory_space<smem>>
    %150 = vector.extract_strided_slice %143 {offsets = [0, 1], sizes = [16, 16], strides = [1, 1]} : vector<16x22xf32> to vector<16x16xf32>
    %151 = vector.broadcast %149 : f32 to vector<16x16xf32>
    %152 = arith.mulf %151, %150 : vector<16x16xf32>
    %153 = arith.addf %139, %152 : vector<16x16xf32>
    %c2 = arith.constant 2 : index
    %154 = memref.load %arg2[%c2] : memref<98xf32, #tpu.memory_space<smem>>
    %155 = vector.extract_strided_slice %143 {offsets = [0, 2], sizes = [16, 16], strides = [1, 1]} : vector<16x22xf32> to vector<16x16xf32>
    %156 = vector.broadcast %154 : f32 to vector<16x16xf32>
    %157 = arith.mulf %156, %155 : vector<16x16xf32>
    %158 = arith.addf %140, %157 : vector<16x16xf32>
    %c3_96 = arith.constant 3 : index
    %159 = memref.load %arg2[%c3_96] : memref<98xf32, #tpu.memory_space<smem>>
    %160 = vector.extract_strided_slice %143 {offsets = [0, 3], sizes = [16, 16], strides = [1, 1]} : vector<16x22xf32> to vector<16x16xf32>
    %161 = vector.broadcast %159 : f32 to vector<16x16xf32>
    %162 = arith.mulf %161, %160 : vector<16x16xf32>
    %163 = arith.addf %141, %162 : vector<16x16xf32>
    %c4_97 = arith.constant 4 : index
    %164 = memref.load %arg2[%c4_97] : memref<98xf32, #tpu.memory_space<smem>>
    %165 = vector.extract_strided_slice %143 {offsets = [0, 4], sizes = [16, 16], strides = [1, 1]} : vector<16x22xf32> to vector<16x16xf32>
    %166 = vector.broadcast %164 : f32 to vector<16x16xf32>
    %167 = arith.mulf %166, %165 : vector<16x16xf32>
    %168 = arith.addf %148, %167 : vector<16x16xf32>
    %c5_98 = arith.constant 5 : index
    %169 = memref.load %arg2[%c5_98] : memref<98xf32, #tpu.memory_space<smem>>
    %170 = vector.extract_strided_slice %143 {offsets = [0, 5], sizes = [16, 16], strides = [1, 1]} : vector<16x22xf32> to vector<16x16xf32>
    %171 = vector.broadcast %169 : f32 to vector<16x16xf32>
    %172 = arith.mulf %171, %170 : vector<16x16xf32>
    %173 = arith.addf %153, %172 : vector<16x16xf32>
    %c6_99 = arith.constant 6 : index
    %174 = memref.load %arg2[%c6_99] : memref<98xf32, #tpu.memory_space<smem>>
    %175 = vector.extract_strided_slice %143 {offsets = [0, 6], sizes = [16, 16], strides = [1, 1]} : vector<16x22xf32> to vector<16x16xf32>
    %176 = vector.broadcast %174 : f32 to vector<16x16xf32>
    %177 = arith.mulf %176, %175 : vector<16x16xf32>
    %178 = arith.addf %158, %177 : vector<16x16xf32>
    %c0_100 = arith.constant 0 : index
    %c1_101 = arith.constant 1 : index
    %c0_102 = arith.constant 0 : index
    %179 = vector.load %arg4[%c0_100, %c1_101, %c0_102] : memref<2x22x22xf32, #tpu.memory_space<vmem>>, vector<1x16x22xf32>
    %180 = vector.shape_cast %179 : vector<1x16x22xf32> to vector<16x22xf32>
    %c7_103 = arith.constant 7 : index
    %181 = memref.load %arg2[%c7_103] : memref<98xf32, #tpu.memory_space<smem>>
    %182 = vector.extract_strided_slice %180 {offsets = [0, 0], sizes = [16, 16], strides = [1, 1]} : vector<16x22xf32> to vector<16x16xf32>
    %183 = vector.broadcast %181 : f32 to vector<16x16xf32>
    %184 = arith.mulf %183, %182 : vector<16x16xf32>
    %185 = arith.addf %163, %184 : vector<16x16xf32>
    %c8_104 = arith.constant 8 : index
    %186 = memref.load %arg2[%c8_104] : memref<98xf32, #tpu.memory_space<smem>>
    %187 = vector.extract_strided_slice %180 {offsets = [0, 1], sizes = [16, 16], strides = [1, 1]} : vector<16x22xf32> to vector<16x16xf32>
    %188 = vector.broadcast %186 : f32 to vector<16x16xf32>
    %189 = arith.mulf %188, %187 : vector<16x16xf32>
    %190 = arith.addf %168, %189 : vector<16x16xf32>
    %c9_105 = arith.constant 9 : index
    %191 = memref.load %arg2[%c9_105] : memref<98xf32, #tpu.memory_space<smem>>
    %192 = vector.extract_strided_slice %180 {offsets = [0, 2], sizes = [16, 16], strides = [1, 1]} : vector<16x22xf32> to vector<16x16xf32>
    %193 = vector.broadcast %191 : f32 to vector<16x16xf32>
    %194 = arith.mulf %193, %192 : vector<16x16xf32>
    %195 = arith.addf %173, %194 : vector<16x16xf32>
    %c10_106 = arith.constant 10 : index
    %196 = memref.load %arg2[%c10_106] : memref<98xf32, #tpu.memory_space<smem>>
    %197 = vector.extract_strided_slice %180 {offsets = [0, 3], sizes = [16, 16], strides = [1, 1]} : vector<16x22xf32> to vector<16x16xf32>
    %198 = vector.broadcast %196 : f32 to vector<16x16xf32>
    %199 = arith.mulf %198, %197 : vector<16x16xf32>
    %200 = arith.addf %178, %199 : vector<16x16xf32>
    %c11_107 = arith.constant 11 : index
    %201 = memref.load %arg2[%c11_107] : memref<98xf32, #tpu.memory_space<smem>>
    %202 = vector.extract_strided_slice %180 {offsets = [0, 4], sizes = [16, 16], strides = [1, 1]} : vector<16x22xf32> to vector<16x16xf32>
    %203 = vector.broadcast %201 : f32 to vector<16x16xf32>
    %204 = arith.mulf %203, %202 : vector<16x16xf32>
    %205 = arith.addf %185, %204 : vector<16x16xf32>
    %c12_108 = arith.constant 12 : index
    %206 = memref.load %arg2[%c12_108] : memref<98xf32, #tpu.memory_space<smem>>
    %207 = vector.extract_strided_slice %180 {offsets = [0, 5], sizes = [16, 16], strides = [1, 1]} : vector<16x22xf32> to vector<16x16xf32>
    %208 = vector.broadcast %206 : f32 to vector<16x16xf32>
    %209 = arith.mulf %208, %207 : vector<16x16xf32>
    %210 = arith.addf %190, %209 : vector<16x16xf32>
    %c13_109 = arith.constant 13 : index
    %211 = memref.load %arg2[%c13_109] : memref<98xf32, #tpu.memory_space<smem>>
    %212 = vector.extract_strided_slice %180 {offsets = [0, 6], sizes = [16, 16], strides = [1, 1]} : vector<16x22xf32> to vector<16x16xf32>
    %213 = vector.broadcast %211 : f32 to vector<16x16xf32>
    %214 = arith.mulf %213, %212 : vector<16x16xf32>
    %215 = arith.addf %195, %214 : vector<16x16xf32>
    %c0_110 = arith.constant 0 : index
    %c2_111 = arith.constant 2 : index
    %c0_112 = arith.constant 0 : index
    %216 = vector.load %arg4[%c0_110, %c2_111, %c0_112] : memref<2x22x22xf32, #tpu.memory_space<vmem>>, vector<1x16x22xf32>
    %217 = vector.shape_cast %216 : vector<1x16x22xf32> to vector<16x22xf32>
    %c14_113 = arith.constant 14 : index
    %218 = memref.load %arg2[%c14_113] : memref<98xf32, #tpu.memory_space<smem>>
    %219 = vector.extract_strided_slice %217 {offsets = [0, 0], sizes = [16, 16], strides = [1, 1]} : vector<16x22xf32> to vector<16x16xf32>
    %220 = vector.broadcast %218 : f32 to vector<16x16xf32>
    %221 = arith.mulf %220, %219 : vector<16x16xf32>
    %222 = arith.addf %200, %221 : vector<16x16xf32>
    %c15_114 = arith.constant 15 : index
    %223 = memref.load %arg2[%c15_114] : memref<98xf32, #tpu.memory_space<smem>>
    %224 = vector.extract_strided_slice %217 {offsets = [0, 1], sizes = [16, 16], strides = [1, 1]} : vector<16x22xf32> to vector<16x16xf32>
    %225 = vector.broadcast %223 : f32 to vector<16x16xf32>
    %226 = arith.mulf %225, %224 : vector<16x16xf32>
    %227 = arith.addf %205, %226 : vector<16x16xf32>
    %c16_115 = arith.constant 16 : index
    %228 = memref.load %arg2[%c16_115] : memref<98xf32, #tpu.memory_space<smem>>
    %229 = vector.extract_strided_slice %217 {offsets = [0, 2], sizes = [16, 16], strides = [1, 1]} : vector<16x22xf32> to vector<16x16xf32>
    %230 = vector.broadcast %228 : f32 to vector<16x16xf32>
    %231 = arith.mulf %230, %229 : vector<16x16xf32>
    %232 = arith.addf %210, %231 : vector<16x16xf32>
    %c17_116 = arith.constant 17 : index
    %233 = memref.load %arg2[%c17_116] : memref<98xf32, #tpu.memory_space<smem>>
    %234 = vector.extract_strided_slice %217 {offsets = [0, 3], sizes = [16, 16], strides = [1, 1]} : vector<16x22xf32> to vector<16x16xf32>
    %235 = vector.broadcast %233 : f32 to vector<16x16xf32>
    %236 = arith.mulf %235, %234 : vector<16x16xf32>
    %237 = arith.addf %215, %236 : vector<16x16xf32>
    %c18_117 = arith.constant 18 : index
    %238 = memref.load %arg2[%c18_117] : memref<98xf32, #tpu.memory_space<smem>>
    %239 = vector.extract_strided_slice %217 {offsets = [0, 4], sizes = [16, 16], strides = [1, 1]} : vector<16x22xf32> to vector<16x16xf32>
    %240 = vector.broadcast %238 : f32 to vector<16x16xf32>
    %241 = arith.mulf %240, %239 : vector<16x16xf32>
    %242 = arith.addf %222, %241 : vector<16x16xf32>
    %c19 = arith.constant 19 : index
    %243 = memref.load %arg2[%c19] : memref<98xf32, #tpu.memory_space<smem>>
    %244 = vector.extract_strided_slice %217 {offsets = [0, 5], sizes = [16, 16], strides = [1, 1]} : vector<16x22xf32> to vector<16x16xf32>
    %245 = vector.broadcast %243 : f32 to vector<16x16xf32>
    %246 = arith.mulf %245, %244 : vector<16x16xf32>
    %247 = arith.addf %227, %246 : vector<16x16xf32>
    %c20 = arith.constant 20 : index
    %248 = memref.load %arg2[%c20] : memref<98xf32, #tpu.memory_space<smem>>
    %249 = vector.extract_strided_slice %217 {offsets = [0, 6], sizes = [16, 16], strides = [1, 1]} : vector<16x22xf32> to vector<16x16xf32>
    %250 = vector.broadcast %248 : f32 to vector<16x16xf32>
    %251 = arith.mulf %250, %249 : vector<16x16xf32>
    %252 = arith.addf %232, %251 : vector<16x16xf32>
    %c0_118 = arith.constant 0 : index
    %c3_119 = arith.constant 3 : index
    %c0_120 = arith.constant 0 : index
    %253 = vector.load %arg4[%c0_118, %c3_119, %c0_120] : memref<2x22x22xf32, #tpu.memory_space<vmem>>, vector<1x16x22xf32>
    %254 = vector.shape_cast %253 : vector<1x16x22xf32> to vector<16x22xf32>
    %c21 = arith.constant 21 : index
    %255 = memref.load %arg2[%c21] : memref<98xf32, #tpu.memory_space<smem>>
    %256 = vector.extract_strided_slice %254 {offsets = [0, 0], sizes = [16, 16], strides = [1, 1]} : vector<16x22xf32> to vector<16x16xf32>
    %257 = vector.broadcast %255 : f32 to vector<16x16xf32>
    %258 = arith.mulf %257, %256 : vector<16x16xf32>
    %259 = arith.addf %237, %258 : vector<16x16xf32>
    %c22 = arith.constant 22 : index
    %260 = memref.load %arg2[%c22] : memref<98xf32, #tpu.memory_space<smem>>
    %261 = vector.extract_strided_slice %254 {offsets = [0, 1], sizes = [16, 16], strides = [1, 1]} : vector<16x22xf32> to vector<16x16xf32>
    %262 = vector.broadcast %260 : f32 to vector<16x16xf32>
    %263 = arith.mulf %262, %261 : vector<16x16xf32>
    %264 = arith.addf %242, %263 : vector<16x16xf32>
    %c23 = arith.constant 23 : index
    %265 = memref.load %arg2[%c23] : memref<98xf32, #tpu.memory_space<smem>>
    %266 = vector.extract_strided_slice %254 {offsets = [0, 2], sizes = [16, 16], strides = [1, 1]} : vector<16x22xf32> to vector<16x16xf32>
    %267 = vector.broadcast %265 : f32 to vector<16x16xf32>
    %268 = arith.mulf %267, %266 : vector<16x16xf32>
    %269 = arith.addf %247, %268 : vector<16x16xf32>
    %c24 = arith.constant 24 : index
    %270 = memref.load %arg2[%c24] : memref<98xf32, #tpu.memory_space<smem>>
    %271 = vector.extract_strided_slice %254 {offsets = [0, 3], sizes = [16, 16], strides = [1, 1]} : vector<16x22xf32> to vector<16x16xf32>
    %272 = vector.broadcast %270 : f32 to vector<16x16xf32>
    %273 = arith.mulf %272, %271 : vector<16x16xf32>
    %274 = arith.addf %252, %273 : vector<16x16xf32>
    %c25 = arith.constant 25 : index
    %275 = memref.load %arg2[%c25] : memref<98xf32, #tpu.memory_space<smem>>
    %276 = vector.extract_strided_slice %254 {offsets = [0, 4], sizes = [16, 16], strides = [1, 1]} : vector<16x22xf32> to vector<16x16xf32>
    %277 = vector.broadcast %275 : f32 to vector<16x16xf32>
    %278 = arith.mulf %277, %276 : vector<16x16xf32>
    %279 = arith.addf %259, %278 : vector<16x16xf32>
    %c26 = arith.constant 26 : index
    %280 = memref.load %arg2[%c26] : memref<98xf32, #tpu.memory_space<smem>>
    %281 = vector.extract_strided_slice %254 {offsets = [0, 5], sizes = [16, 16], strides = [1, 1]} : vector<16x22xf32> to vector<16x16xf32>
    %282 = vector.broadcast %280 : f32 to vector<16x16xf32>
    %283 = arith.mulf %282, %281 : vector<16x16xf32>
    %284 = arith.addf %264, %283 : vector<16x16xf32>
    %c27 = arith.constant 27 : index
    %285 = memref.load %arg2[%c27] : memref<98xf32, #tpu.memory_space<smem>>
    %286 = vector.extract_strided_slice %254 {offsets = [0, 6], sizes = [16, 16], strides = [1, 1]} : vector<16x22xf32> to vector<16x16xf32>
    %287 = vector.broadcast %285 : f32 to vector<16x16xf32>
    %288 = arith.mulf %287, %286 : vector<16x16xf32>
    %289 = arith.addf %269, %288 : vector<16x16xf32>
    %c0_121 = arith.constant 0 : index
    %c4_122 = arith.constant 4 : index
    %c0_123 = arith.constant 0 : index
    %290 = vector.load %arg4[%c0_121, %c4_122, %c0_123] : memref<2x22x22xf32, #tpu.memory_space<vmem>>, vector<1x16x22xf32>
    %291 = vector.shape_cast %290 : vector<1x16x22xf32> to vector<16x22xf32>
    %c28 = arith.constant 28 : index
    %292 = memref.load %arg2[%c28] : memref<98xf32, #tpu.memory_space<smem>>
    %293 = vector.extract_strided_slice %291 {offsets = [0, 0], sizes = [16, 16], strides = [1, 1]} : vector<16x22xf32> to vector<16x16xf32>
    %294 = vector.broadcast %292 : f32 to vector<16x16xf32>
    %295 = arith.mulf %294, %293 : vector<16x16xf32>
    %296 = arith.addf %274, %295 : vector<16x16xf32>
    %c29 = arith.constant 29 : index
    %297 = memref.load %arg2[%c29] : memref<98xf32, #tpu.memory_space<smem>>
    %298 = vector.extract_strided_slice %291 {offsets = [0, 1], sizes = [16, 16], strides = [1, 1]} : vector<16x22xf32> to vector<16x16xf32>
    %299 = vector.broadcast %297 : f32 to vector<16x16xf32>
    %300 = arith.mulf %299, %298 : vector<16x16xf32>
    %301 = arith.addf %279, %300 : vector<16x16xf32>
    %c30 = arith.constant 30 : index
    %302 = memref.load %arg2[%c30] : memref<98xf32, #tpu.memory_space<smem>>
    %303 = vector.extract_strided_slice %291 {offsets = [0, 2], sizes = [16, 16], strides = [1, 1]} : vector<16x22xf32> to vector<16x16xf32>
    %304 = vector.broadcast %302 : f32 to vector<16x16xf32>
    %305 = arith.mulf %304, %303 : vector<16x16xf32>
    %306 = arith.addf %284, %305 : vector<16x16xf32>
    %c31 = arith.constant 31 : index
    %307 = memref.load %arg2[%c31] : memref<98xf32, #tpu.memory_space<smem>>
    %308 = vector.extract_strided_slice %291 {offsets = [0, 3], sizes = [16, 16], strides = [1, 1]} : vector<16x22xf32> to vector<16x16xf32>
    %309 = vector.broadcast %307 : f32 to vector<16x16xf32>
    %310 = arith.mulf %309, %308 : vector<16x16xf32>
    %311 = arith.addf %289, %310 : vector<16x16xf32>
    %c32 = arith.constant 32 : index
    %312 = memref.load %arg2[%c32] : memref<98xf32, #tpu.memory_space<smem>>
    %313 = vector.extract_strided_slice %291 {offsets = [0, 4], sizes = [16, 16], strides = [1, 1]} : vector<16x22xf32> to vector<16x16xf32>
    %314 = vector.broadcast %312 : f32 to vector<16x16xf32>
    %315 = arith.mulf %314, %313 : vector<16x16xf32>
    %316 = arith.addf %296, %315 : vector<16x16xf32>
    %c33 = arith.constant 33 : index
    %317 = memref.load %arg2[%c33] : memref<98xf32, #tpu.memory_space<smem>>
    %318 = vector.extract_strided_slice %291 {offsets = [0, 5], sizes = [16, 16], strides = [1, 1]} : vector<16x22xf32> to vector<16x16xf32>
    %319 = vector.broadcast %317 : f32 to vector<16x16xf32>
    %320 = arith.mulf %319, %318 : vector<16x16xf32>
    %321 = arith.addf %301, %320 : vector<16x16xf32>
    %c34 = arith.constant 34 : index
    %322 = memref.load %arg2[%c34] : memref<98xf32, #tpu.memory_space<smem>>
    %323 = vector.extract_strided_slice %291 {offsets = [0, 6], sizes = [16, 16], strides = [1, 1]} : vector<16x22xf32> to vector<16x16xf32>
    %324 = vector.broadcast %322 : f32 to vector<16x16xf32>
    %325 = arith.mulf %324, %323 : vector<16x16xf32>
    %326 = arith.addf %306, %325 : vector<16x16xf32>
    %c0_124 = arith.constant 0 : index
    %c5_125 = arith.constant 5 : index
    %c0_126 = arith.constant 0 : index
    %327 = vector.load %arg4[%c0_124, %c5_125, %c0_126] : memref<2x22x22xf32, #tpu.memory_space<vmem>>, vector<1x16x22xf32>
    %328 = vector.shape_cast %327 : vector<1x16x22xf32> to vector<16x22xf32>
    %c35 = arith.constant 35 : index
    %329 = memref.load %arg2[%c35] : memref<98xf32, #tpu.memory_space<smem>>
    %330 = vector.extract_strided_slice %328 {offsets = [0, 0], sizes = [16, 16], strides = [1, 1]} : vector<16x22xf32> to vector<16x16xf32>
    %331 = vector.broadcast %329 : f32 to vector<16x16xf32>
    %332 = arith.mulf %331, %330 : vector<16x16xf32>
    %333 = arith.addf %311, %332 : vector<16x16xf32>
    %c36 = arith.constant 36 : index
    %334 = memref.load %arg2[%c36] : memref<98xf32, #tpu.memory_space<smem>>
    %335 = vector.extract_strided_slice %328 {offsets = [0, 1], sizes = [16, 16], strides = [1, 1]} : vector<16x22xf32> to vector<16x16xf32>
    %336 = vector.broadcast %334 : f32 to vector<16x16xf32>
    %337 = arith.mulf %336, %335 : vector<16x16xf32>
    %338 = arith.addf %316, %337 : vector<16x16xf32>
    %c37 = arith.constant 37 : index
    %339 = memref.load %arg2[%c37] : memref<98xf32, #tpu.memory_space<smem>>
    %340 = vector.extract_strided_slice %328 {offsets = [0, 2], sizes = [16, 16], strides = [1, 1]} : vector<16x22xf32> to vector<16x16xf32>
    %341 = vector.broadcast %339 : f32 to vector<16x16xf32>
    %342 = arith.mulf %341, %340 : vector<16x16xf32>
    %343 = arith.addf %321, %342 : vector<16x16xf32>
    %c38 = arith.constant 38 : index
    %344 = memref.load %arg2[%c38] : memref<98xf32, #tpu.memory_space<smem>>
    %345 = vector.extract_strided_slice %328 {offsets = [0, 3], sizes = [16, 16], strides = [1, 1]} : vector<16x22xf32> to vector<16x16xf32>
    %346 = vector.broadcast %344 : f32 to vector<16x16xf32>
    %347 = arith.mulf %346, %345 : vector<16x16xf32>
    %348 = arith.addf %326, %347 : vector<16x16xf32>
    %c39 = arith.constant 39 : index
    %349 = memref.load %arg2[%c39] : memref<98xf32, #tpu.memory_space<smem>>
    %350 = vector.extract_strided_slice %328 {offsets = [0, 4], sizes = [16, 16], strides = [1, 1]} : vector<16x22xf32> to vector<16x16xf32>
    %351 = vector.broadcast %349 : f32 to vector<16x16xf32>
    %352 = arith.mulf %351, %350 : vector<16x16xf32>
    %353 = arith.addf %333, %352 : vector<16x16xf32>
    %c40 = arith.constant 40 : index
    %354 = memref.load %arg2[%c40] : memref<98xf32, #tpu.memory_space<smem>>
    %355 = vector.extract_strided_slice %328 {offsets = [0, 5], sizes = [16, 16], strides = [1, 1]} : vector<16x22xf32> to vector<16x16xf32>
    %356 = vector.broadcast %354 : f32 to vector<16x16xf32>
    %357 = arith.mulf %356, %355 : vector<16x16xf32>
    %358 = arith.addf %338, %357 : vector<16x16xf32>
    %c41 = arith.constant 41 : index
    %359 = memref.load %arg2[%c41] : memref<98xf32, #tpu.memory_space<smem>>
    %360 = vector.extract_strided_slice %328 {offsets = [0, 6], sizes = [16, 16], strides = [1, 1]} : vector<16x22xf32> to vector<16x16xf32>
    %361 = vector.broadcast %359 : f32 to vector<16x16xf32>
    %362 = arith.mulf %361, %360 : vector<16x16xf32>
    %363 = arith.addf %343, %362 : vector<16x16xf32>
    %c0_127 = arith.constant 0 : index
    %c6_128 = arith.constant 6 : index
    %c0_129 = arith.constant 0 : index
    %364 = vector.load %arg4[%c0_127, %c6_128, %c0_129] : memref<2x22x22xf32, #tpu.memory_space<vmem>>, vector<1x16x22xf32>
    %365 = vector.shape_cast %364 : vector<1x16x22xf32> to vector<16x22xf32>
    %c42 = arith.constant 42 : index
    %366 = memref.load %arg2[%c42] : memref<98xf32, #tpu.memory_space<smem>>
    %367 = vector.extract_strided_slice %365 {offsets = [0, 0], sizes = [16, 16], strides = [1, 1]} : vector<16x22xf32> to vector<16x16xf32>
    %368 = vector.broadcast %366 : f32 to vector<16x16xf32>
    %369 = arith.mulf %368, %367 : vector<16x16xf32>
    %370 = arith.addf %348, %369 : vector<16x16xf32>
    %c43 = arith.constant 43 : index
    %371 = memref.load %arg2[%c43] : memref<98xf32, #tpu.memory_space<smem>>
    %372 = vector.extract_strided_slice %365 {offsets = [0, 1], sizes = [16, 16], strides = [1, 1]} : vector<16x22xf32> to vector<16x16xf32>
    %373 = vector.broadcast %371 : f32 to vector<16x16xf32>
    %374 = arith.mulf %373, %372 : vector<16x16xf32>
    %375 = arith.addf %353, %374 : vector<16x16xf32>
    %c44 = arith.constant 44 : index
    %376 = memref.load %arg2[%c44] : memref<98xf32, #tpu.memory_space<smem>>
    %377 = vector.extract_strided_slice %365 {offsets = [0, 2], sizes = [16, 16], strides = [1, 1]} : vector<16x22xf32> to vector<16x16xf32>
    %378 = vector.broadcast %376 : f32 to vector<16x16xf32>
    %379 = arith.mulf %378, %377 : vector<16x16xf32>
    %380 = arith.addf %358, %379 : vector<16x16xf32>
    %c45 = arith.constant 45 : index
    %381 = memref.load %arg2[%c45] : memref<98xf32, #tpu.memory_space<smem>>
    %382 = vector.extract_strided_slice %365 {offsets = [0, 3], sizes = [16, 16], strides = [1, 1]} : vector<16x22xf32> to vector<16x16xf32>
    %383 = vector.broadcast %381 : f32 to vector<16x16xf32>
    %384 = arith.mulf %383, %382 : vector<16x16xf32>
    %385 = arith.addf %363, %384 : vector<16x16xf32>
    %c46 = arith.constant 46 : index
    %386 = memref.load %arg2[%c46] : memref<98xf32, #tpu.memory_space<smem>>
    %387 = vector.extract_strided_slice %365 {offsets = [0, 4], sizes = [16, 16], strides = [1, 1]} : vector<16x22xf32> to vector<16x16xf32>
    %388 = vector.broadcast %386 : f32 to vector<16x16xf32>
    %389 = arith.mulf %388, %387 : vector<16x16xf32>
    %390 = arith.addf %370, %389 : vector<16x16xf32>
    %c47 = arith.constant 47 : index
    %391 = memref.load %arg2[%c47] : memref<98xf32, #tpu.memory_space<smem>>
    %392 = vector.extract_strided_slice %365 {offsets = [0, 5], sizes = [16, 16], strides = [1, 1]} : vector<16x22xf32> to vector<16x16xf32>
    %393 = vector.broadcast %391 : f32 to vector<16x16xf32>
    %394 = arith.mulf %393, %392 : vector<16x16xf32>
    %395 = arith.addf %375, %394 : vector<16x16xf32>
    %c48 = arith.constant 48 : index
    %396 = memref.load %arg2[%c48] : memref<98xf32, #tpu.memory_space<smem>>
    %397 = vector.extract_strided_slice %365 {offsets = [0, 6], sizes = [16, 16], strides = [1, 1]} : vector<16x22xf32> to vector<16x16xf32>
    %398 = vector.broadcast %396 : f32 to vector<16x16xf32>
    %399 = arith.mulf %398, %397 : vector<16x16xf32>
    %400 = arith.addf %380, %399 : vector<16x16xf32>
    %c1_130 = arith.constant 1 : index
    %c0_131 = arith.constant 0 : index
    %c0_132 = arith.constant 0 : index
    %401 = vector.load %arg4[%c1_130, %c0_131, %c0_132] : memref<2x22x22xf32, #tpu.memory_space<vmem>>, vector<1x16x22xf32>
    %402 = vector.shape_cast %401 : vector<1x16x22xf32> to vector<16x22xf32>
    %c49 = arith.constant 49 : index
    %403 = memref.load %arg2[%c49] : memref<98xf32, #tpu.memory_space<smem>>
    %404 = vector.extract_strided_slice %402 {offsets = [0, 0], sizes = [16, 16], strides = [1, 1]} : vector<16x22xf32> to vector<16x16xf32>
    %405 = vector.broadcast %403 : f32 to vector<16x16xf32>
    %406 = arith.mulf %405, %404 : vector<16x16xf32>
    %407 = arith.addf %385, %406 : vector<16x16xf32>
    %c50 = arith.constant 50 : index
    %408 = memref.load %arg2[%c50] : memref<98xf32, #tpu.memory_space<smem>>
    %409 = vector.extract_strided_slice %402 {offsets = [0, 1], sizes = [16, 16], strides = [1, 1]} : vector<16x22xf32> to vector<16x16xf32>
    %410 = vector.broadcast %408 : f32 to vector<16x16xf32>
    %411 = arith.mulf %410, %409 : vector<16x16xf32>
    %412 = arith.addf %390, %411 : vector<16x16xf32>
    %c51 = arith.constant 51 : index
    %413 = memref.load %arg2[%c51] : memref<98xf32, #tpu.memory_space<smem>>
    %414 = vector.extract_strided_slice %402 {offsets = [0, 2], sizes = [16, 16], strides = [1, 1]} : vector<16x22xf32> to vector<16x16xf32>
    %415 = vector.broadcast %413 : f32 to vector<16x16xf32>
    %416 = arith.mulf %415, %414 : vector<16x16xf32>
    %417 = arith.addf %395, %416 : vector<16x16xf32>
    %c52 = arith.constant 52 : index
    %418 = memref.load %arg2[%c52] : memref<98xf32, #tpu.memory_space<smem>>
    %419 = vector.extract_strided_slice %402 {offsets = [0, 3], sizes = [16, 16], strides = [1, 1]} : vector<16x22xf32> to vector<16x16xf32>
    %420 = vector.broadcast %418 : f32 to vector<16x16xf32>
    %421 = arith.mulf %420, %419 : vector<16x16xf32>
    %422 = arith.addf %400, %421 : vector<16x16xf32>
    %c53 = arith.constant 53 : index
    %423 = memref.load %arg2[%c53] : memref<98xf32, #tpu.memory_space<smem>>
    %424 = vector.extract_strided_slice %402 {offsets = [0, 4], sizes = [16, 16], strides = [1, 1]} : vector<16x22xf32> to vector<16x16xf32>
    %425 = vector.broadcast %423 : f32 to vector<16x16xf32>
    %426 = arith.mulf %425, %424 : vector<16x16xf32>
    %427 = arith.addf %407, %426 : vector<16x16xf32>
    %c54 = arith.constant 54 : index
    %428 = memref.load %arg2[%c54] : memref<98xf32, #tpu.memory_space<smem>>
    %429 = vector.extract_strided_slice %402 {offsets = [0, 5], sizes = [16, 16], strides = [1, 1]} : vector<16x22xf32> to vector<16x16xf32>
    %430 = vector.broadcast %428 : f32 to vector<16x16xf32>
    %431 = arith.mulf %430, %429 : vector<16x16xf32>
    %432 = arith.addf %412, %431 : vector<16x16xf32>
    %c55 = arith.constant 55 : index
    %433 = memref.load %arg2[%c55] : memref<98xf32, #tpu.memory_space<smem>>
    %434 = vector.extract_strided_slice %402 {offsets = [0, 6], sizes = [16, 16], strides = [1, 1]} : vector<16x22xf32> to vector<16x16xf32>
    %435 = vector.broadcast %433 : f32 to vector<16x16xf32>
    %436 = arith.mulf %435, %434 : vector<16x16xf32>
    %437 = arith.addf %417, %436 : vector<16x16xf32>
    %c1_133 = arith.constant 1 : index
    %c1_134 = arith.constant 1 : index
    %c0_135 = arith.constant 0 : index
    %438 = vector.load %arg4[%c1_133, %c1_134, %c0_135] : memref<2x22x22xf32, #tpu.memory_space<vmem>>, vector<1x16x22xf32>
    %439 = vector.shape_cast %438 : vector<1x16x22xf32> to vector<16x22xf32>
    %c56 = arith.constant 56 : index
    %440 = memref.load %arg2[%c56] : memref<98xf32, #tpu.memory_space<smem>>
    %441 = vector.extract_strided_slice %439 {offsets = [0, 0], sizes = [16, 16], strides = [1, 1]} : vector<16x22xf32> to vector<16x16xf32>
    %442 = vector.broadcast %440 : f32 to vector<16x16xf32>
    %443 = arith.mulf %442, %441 : vector<16x16xf32>
    %444 = arith.addf %422, %443 : vector<16x16xf32>
    %c57 = arith.constant 57 : index
    %445 = memref.load %arg2[%c57] : memref<98xf32, #tpu.memory_space<smem>>
    %446 = vector.extract_strided_slice %439 {offsets = [0, 1], sizes = [16, 16], strides = [1, 1]} : vector<16x22xf32> to vector<16x16xf32>
    %447 = vector.broadcast %445 : f32 to vector<16x16xf32>
    %448 = arith.mulf %447, %446 : vector<16x16xf32>
    %449 = arith.addf %427, %448 : vector<16x16xf32>
    %c58 = arith.constant 58 : index
    %450 = memref.load %arg2[%c58] : memref<98xf32, #tpu.memory_space<smem>>
    %451 = vector.extract_strided_slice %439 {offsets = [0, 2], sizes = [16, 16], strides = [1, 1]} : vector<16x22xf32> to vector<16x16xf32>
    %452 = vector.broadcast %450 : f32 to vector<16x16xf32>
    %453 = arith.mulf %452, %451 : vector<16x16xf32>
    %454 = arith.addf %432, %453 : vector<16x16xf32>
    %c59 = arith.constant 59 : index
    %455 = memref.load %arg2[%c59] : memref<98xf32, #tpu.memory_space<smem>>
    %456 = vector.extract_strided_slice %439 {offsets = [0, 3], sizes = [16, 16], strides = [1, 1]} : vector<16x22xf32> to vector<16x16xf32>
    %457 = vector.broadcast %455 : f32 to vector<16x16xf32>
    %458 = arith.mulf %457, %456 : vector<16x16xf32>
    %459 = arith.addf %437, %458 : vector<16x16xf32>
    %c60 = arith.constant 60 : index
    %460 = memref.load %arg2[%c60] : memref<98xf32, #tpu.memory_space<smem>>
    %461 = vector.extract_strided_slice %439 {offsets = [0, 4], sizes = [16, 16], strides = [1, 1]} : vector<16x22xf32> to vector<16x16xf32>
    %462 = vector.broadcast %460 : f32 to vector<16x16xf32>
    %463 = arith.mulf %462, %461 : vector<16x16xf32>
    %464 = arith.addf %444, %463 : vector<16x16xf32>
    %c61 = arith.constant 61 : index
    %465 = memref.load %arg2[%c61] : memref<98xf32, #tpu.memory_space<smem>>
    %466 = vector.extract_strided_slice %439 {offsets = [0, 5], sizes = [16, 16], strides = [1, 1]} : vector<16x22xf32> to vector<16x16xf32>
    %467 = vector.broadcast %465 : f32 to vector<16x16xf32>
    %468 = arith.mulf %467, %466 : vector<16x16xf32>
    %469 = arith.addf %449, %468 : vector<16x16xf32>
    %c62 = arith.constant 62 : index
    %470 = memref.load %arg2[%c62] : memref<98xf32, #tpu.memory_space<smem>>
    %471 = vector.extract_strided_slice %439 {offsets = [0, 6], sizes = [16, 16], strides = [1, 1]} : vector<16x22xf32> to vector<16x16xf32>
    %472 = vector.broadcast %470 : f32 to vector<16x16xf32>
    %473 = arith.mulf %472, %471 : vector<16x16xf32>
    %474 = arith.addf %454, %473 : vector<16x16xf32>
    %c1_136 = arith.constant 1 : index
    %c2_137 = arith.constant 2 : index
    %c0_138 = arith.constant 0 : index
    %475 = vector.load %arg4[%c1_136, %c2_137, %c0_138] : memref<2x22x22xf32, #tpu.memory_space<vmem>>, vector<1x16x22xf32>
    %476 = vector.shape_cast %475 : vector<1x16x22xf32> to vector<16x22xf32>
    %c63 = arith.constant 63 : index
    %477 = memref.load %arg2[%c63] : memref<98xf32, #tpu.memory_space<smem>>
    %478 = vector.extract_strided_slice %476 {offsets = [0, 0], sizes = [16, 16], strides = [1, 1]} : vector<16x22xf32> to vector<16x16xf32>
    %479 = vector.broadcast %477 : f32 to vector<16x16xf32>
    %480 = arith.mulf %479, %478 : vector<16x16xf32>
    %481 = arith.addf %459, %480 : vector<16x16xf32>
    %c64 = arith.constant 64 : index
    %482 = memref.load %arg2[%c64] : memref<98xf32, #tpu.memory_space<smem>>
    %483 = vector.extract_strided_slice %476 {offsets = [0, 1], sizes = [16, 16], strides = [1, 1]} : vector<16x22xf32> to vector<16x16xf32>
    %484 = vector.broadcast %482 : f32 to vector<16x16xf32>
    %485 = arith.mulf %484, %483 : vector<16x16xf32>
    %486 = arith.addf %464, %485 : vector<16x16xf32>
    %c65 = arith.constant 65 : index
    %487 = memref.load %arg2[%c65] : memref<98xf32, #tpu.memory_space<smem>>
    %488 = vector.extract_strided_slice %476 {offsets = [0, 2], sizes = [16, 16], strides = [1, 1]} : vector<16x22xf32> to vector<16x16xf32>
    %489 = vector.broadcast %487 : f32 to vector<16x16xf32>
    %490 = arith.mulf %489, %488 : vector<16x16xf32>
    %491 = arith.addf %469, %490 : vector<16x16xf32>
    %c66 = arith.constant 66 : index
    %492 = memref.load %arg2[%c66] : memref<98xf32, #tpu.memory_space<smem>>
    %493 = vector.extract_strided_slice %476 {offsets = [0, 3], sizes = [16, 16], strides = [1, 1]} : vector<16x22xf32> to vector<16x16xf32>
    %494 = vector.broadcast %492 : f32 to vector<16x16xf32>
    %495 = arith.mulf %494, %493 : vector<16x16xf32>
    %496 = arith.addf %474, %495 : vector<16x16xf32>
    %c67 = arith.constant 67 : index
    %497 = memref.load %arg2[%c67] : memref<98xf32, #tpu.memory_space<smem>>
    %498 = vector.extract_strided_slice %476 {offsets = [0, 4], sizes = [16, 16], strides = [1, 1]} : vector<16x22xf32> to vector<16x16xf32>
    %499 = vector.broadcast %497 : f32 to vector<16x16xf32>
    %500 = arith.mulf %499, %498 : vector<16x16xf32>
    %501 = arith.addf %481, %500 : vector<16x16xf32>
    %c68 = arith.constant 68 : index
    %502 = memref.load %arg2[%c68] : memref<98xf32, #tpu.memory_space<smem>>
    %503 = vector.extract_strided_slice %476 {offsets = [0, 5], sizes = [16, 16], strides = [1, 1]} : vector<16x22xf32> to vector<16x16xf32>
    %504 = vector.broadcast %502 : f32 to vector<16x16xf32>
    %505 = arith.mulf %504, %503 : vector<16x16xf32>
    %506 = arith.addf %486, %505 : vector<16x16xf32>
    %c69 = arith.constant 69 : index
    %507 = memref.load %arg2[%c69] : memref<98xf32, #tpu.memory_space<smem>>
    %508 = vector.extract_strided_slice %476 {offsets = [0, 6], sizes = [16, 16], strides = [1, 1]} : vector<16x22xf32> to vector<16x16xf32>
    %509 = vector.broadcast %507 : f32 to vector<16x16xf32>
    %510 = arith.mulf %509, %508 : vector<16x16xf32>
    %511 = arith.addf %491, %510 : vector<16x16xf32>
    %c1_139 = arith.constant 1 : index
    %c3_140 = arith.constant 3 : index
    %c0_141 = arith.constant 0 : index
    %512 = vector.load %arg4[%c1_139, %c3_140, %c0_141] : memref<2x22x22xf32, #tpu.memory_space<vmem>>, vector<1x16x22xf32>
    %513 = vector.shape_cast %512 : vector<1x16x22xf32> to vector<16x22xf32>
    %c70 = arith.constant 70 : index
    %514 = memref.load %arg2[%c70] : memref<98xf32, #tpu.memory_space<smem>>
    %515 = vector.extract_strided_slice %513 {offsets = [0, 0], sizes = [16, 16], strides = [1, 1]} : vector<16x22xf32> to vector<16x16xf32>
    %516 = vector.broadcast %514 : f32 to vector<16x16xf32>
    %517 = arith.mulf %516, %515 : vector<16x16xf32>
    %518 = arith.addf %496, %517 : vector<16x16xf32>
    %c71 = arith.constant 71 : index
    %519 = memref.load %arg2[%c71] : memref<98xf32, #tpu.memory_space<smem>>
    %520 = vector.extract_strided_slice %513 {offsets = [0, 1], sizes = [16, 16], strides = [1, 1]} : vector<16x22xf32> to vector<16x16xf32>
    %521 = vector.broadcast %519 : f32 to vector<16x16xf32>
    %522 = arith.mulf %521, %520 : vector<16x16xf32>
    %523 = arith.addf %501, %522 : vector<16x16xf32>
    %c72 = arith.constant 72 : index
    %524 = memref.load %arg2[%c72] : memref<98xf32, #tpu.memory_space<smem>>
    %525 = vector.extract_strided_slice %513 {offsets = [0, 2], sizes = [16, 16], strides = [1, 1]} : vector<16x22xf32> to vector<16x16xf32>
    %526 = vector.broadcast %524 : f32 to vector<16x16xf32>
    %527 = arith.mulf %526, %525 : vector<16x16xf32>
    %528 = arith.addf %506, %527 : vector<16x16xf32>
    %c73 = arith.constant 73 : index
    %529 = memref.load %arg2[%c73] : memref<98xf32, #tpu.memory_space<smem>>
    %530 = vector.extract_strided_slice %513 {offsets = [0, 3], sizes = [16, 16], strides = [1, 1]} : vector<16x22xf32> to vector<16x16xf32>
    %531 = vector.broadcast %529 : f32 to vector<16x16xf32>
    %532 = arith.mulf %531, %530 : vector<16x16xf32>
    %533 = arith.addf %511, %532 : vector<16x16xf32>
    %c74 = arith.constant 74 : index
    %534 = memref.load %arg2[%c74] : memref<98xf32, #tpu.memory_space<smem>>
    %535 = vector.extract_strided_slice %513 {offsets = [0, 4], sizes = [16, 16], strides = [1, 1]} : vector<16x22xf32> to vector<16x16xf32>
    %536 = vector.broadcast %534 : f32 to vector<16x16xf32>
    %537 = arith.mulf %536, %535 : vector<16x16xf32>
    %538 = arith.addf %518, %537 : vector<16x16xf32>
    %c75 = arith.constant 75 : index
    %539 = memref.load %arg2[%c75] : memref<98xf32, #tpu.memory_space<smem>>
    %540 = vector.extract_strided_slice %513 {offsets = [0, 5], sizes = [16, 16], strides = [1, 1]} : vector<16x22xf32> to vector<16x16xf32>
    %541 = vector.broadcast %539 : f32 to vector<16x16xf32>
    %542 = arith.mulf %541, %540 : vector<16x16xf32>
    %543 = arith.addf %523, %542 : vector<16x16xf32>
    %c76 = arith.constant 76 : index
    %544 = memref.load %arg2[%c76] : memref<98xf32, #tpu.memory_space<smem>>
    %545 = vector.extract_strided_slice %513 {offsets = [0, 6], sizes = [16, 16], strides = [1, 1]} : vector<16x22xf32> to vector<16x16xf32>
    %546 = vector.broadcast %544 : f32 to vector<16x16xf32>
    %547 = arith.mulf %546, %545 : vector<16x16xf32>
    %548 = arith.addf %528, %547 : vector<16x16xf32>
    %c1_142 = arith.constant 1 : index
    %c4_143 = arith.constant 4 : index
    %c0_144 = arith.constant 0 : index
    %549 = vector.load %arg4[%c1_142, %c4_143, %c0_144] : memref<2x22x22xf32, #tpu.memory_space<vmem>>, vector<1x16x22xf32>
    %550 = vector.shape_cast %549 : vector<1x16x22xf32> to vector<16x22xf32>
    %c77 = arith.constant 77 : index
    %551 = memref.load %arg2[%c77] : memref<98xf32, #tpu.memory_space<smem>>
    %552 = vector.extract_strided_slice %550 {offsets = [0, 0], sizes = [16, 16], strides = [1, 1]} : vector<16x22xf32> to vector<16x16xf32>
    %553 = vector.broadcast %551 : f32 to vector<16x16xf32>
    %554 = arith.mulf %553, %552 : vector<16x16xf32>
    %555 = arith.addf %533, %554 : vector<16x16xf32>
    %c78 = arith.constant 78 : index
    %556 = memref.load %arg2[%c78] : memref<98xf32, #tpu.memory_space<smem>>
    %557 = vector.extract_strided_slice %550 {offsets = [0, 1], sizes = [16, 16], strides = [1, 1]} : vector<16x22xf32> to vector<16x16xf32>
    %558 = vector.broadcast %556 : f32 to vector<16x16xf32>
    %559 = arith.mulf %558, %557 : vector<16x16xf32>
    %560 = arith.addf %538, %559 : vector<16x16xf32>
    %c79 = arith.constant 79 : index
    %561 = memref.load %arg2[%c79] : memref<98xf32, #tpu.memory_space<smem>>
    %562 = vector.extract_strided_slice %550 {offsets = [0, 2], sizes = [16, 16], strides = [1, 1]} : vector<16x22xf32> to vector<16x16xf32>
    %563 = vector.broadcast %561 : f32 to vector<16x16xf32>
    %564 = arith.mulf %563, %562 : vector<16x16xf32>
    %565 = arith.addf %543, %564 : vector<16x16xf32>
    %c80 = arith.constant 80 : index
    %566 = memref.load %arg2[%c80] : memref<98xf32, #tpu.memory_space<smem>>
    %567 = vector.extract_strided_slice %550 {offsets = [0, 3], sizes = [16, 16], strides = [1, 1]} : vector<16x22xf32> to vector<16x16xf32>
    %568 = vector.broadcast %566 : f32 to vector<16x16xf32>
    %569 = arith.mulf %568, %567 : vector<16x16xf32>
    %570 = arith.addf %548, %569 : vector<16x16xf32>
    %c81 = arith.constant 81 : index
    %571 = memref.load %arg2[%c81] : memref<98xf32, #tpu.memory_space<smem>>
    %572 = vector.extract_strided_slice %550 {offsets = [0, 4], sizes = [16, 16], strides = [1, 1]} : vector<16x22xf32> to vector<16x16xf32>
    %573 = vector.broadcast %571 : f32 to vector<16x16xf32>
    %574 = arith.mulf %573, %572 : vector<16x16xf32>
    %575 = arith.addf %555, %574 : vector<16x16xf32>
    %c82 = arith.constant 82 : index
    %576 = memref.load %arg2[%c82] : memref<98xf32, #tpu.memory_space<smem>>
    %577 = vector.extract_strided_slice %550 {offsets = [0, 5], sizes = [16, 16], strides = [1, 1]} : vector<16x22xf32> to vector<16x16xf32>
    %578 = vector.broadcast %576 : f32 to vector<16x16xf32>
    %579 = arith.mulf %578, %577 : vector<16x16xf32>
    %580 = arith.addf %560, %579 : vector<16x16xf32>
    %c83 = arith.constant 83 : index
    %581 = memref.load %arg2[%c83] : memref<98xf32, #tpu.memory_space<smem>>
    %582 = vector.extract_strided_slice %550 {offsets = [0, 6], sizes = [16, 16], strides = [1, 1]} : vector<16x22xf32> to vector<16x16xf32>
    %583 = vector.broadcast %581 : f32 to vector<16x16xf32>
    %584 = arith.mulf %583, %582 : vector<16x16xf32>
    %585 = arith.addf %565, %584 : vector<16x16xf32>
    %c1_145 = arith.constant 1 : index
    %c5_146 = arith.constant 5 : index
    %c0_147 = arith.constant 0 : index
    %586 = vector.load %arg4[%c1_145, %c5_146, %c0_147] : memref<2x22x22xf32, #tpu.memory_space<vmem>>, vector<1x16x22xf32>
    %587 = vector.shape_cast %586 : vector<1x16x22xf32> to vector<16x22xf32>
    %c84 = arith.constant 84 : index
    %588 = memref.load %arg2[%c84] : memref<98xf32, #tpu.memory_space<smem>>
    %589 = vector.extract_strided_slice %587 {offsets = [0, 0], sizes = [16, 16], strides = [1, 1]} : vector<16x22xf32> to vector<16x16xf32>
    %590 = vector.broadcast %588 : f32 to vector<16x16xf32>
    %591 = arith.mulf %590, %589 : vector<16x16xf32>
    %592 = arith.addf %570, %591 : vector<16x16xf32>
    %c85 = arith.constant 85 : index
    %593 = memref.load %arg2[%c85] : memref<98xf32, #tpu.memory_space<smem>>
    %594 = vector.extract_strided_slice %587 {offsets = [0, 1], sizes = [16, 16], strides = [1, 1]} : vector<16x22xf32> to vector<16x16xf32>
    %595 = vector.broadcast %593 : f32 to vector<16x16xf32>
    %596 = arith.mulf %595, %594 : vector<16x16xf32>
    %597 = arith.addf %575, %596 : vector<16x16xf32>
    %c86 = arith.constant 86 : index
    %598 = memref.load %arg2[%c86] : memref<98xf32, #tpu.memory_space<smem>>
    %599 = vector.extract_strided_slice %587 {offsets = [0, 2], sizes = [16, 16], strides = [1, 1]} : vector<16x22xf32> to vector<16x16xf32>
    %600 = vector.broadcast %598 : f32 to vector<16x16xf32>
    %601 = arith.mulf %600, %599 : vector<16x16xf32>
    %602 = arith.addf %580, %601 : vector<16x16xf32>
    %c87 = arith.constant 87 : index
    %603 = memref.load %arg2[%c87] : memref<98xf32, #tpu.memory_space<smem>>
    %604 = vector.extract_strided_slice %587 {offsets = [0, 3], sizes = [16, 16], strides = [1, 1]} : vector<16x22xf32> to vector<16x16xf32>
    %605 = vector.broadcast %603 : f32 to vector<16x16xf32>
    %606 = arith.mulf %605, %604 : vector<16x16xf32>
    %607 = arith.addf %585, %606 : vector<16x16xf32>
    %c88 = arith.constant 88 : index
    %608 = memref.load %arg2[%c88] : memref<98xf32, #tpu.memory_space<smem>>
    %609 = vector.extract_strided_slice %587 {offsets = [0, 4], sizes = [16, 16], strides = [1, 1]} : vector<16x22xf32> to vector<16x16xf32>
    %610 = vector.broadcast %608 : f32 to vector<16x16xf32>
    %611 = arith.mulf %610, %609 : vector<16x16xf32>
    %612 = arith.addf %592, %611 : vector<16x16xf32>
    %c89 = arith.constant 89 : index
    %613 = memref.load %arg2[%c89] : memref<98xf32, #tpu.memory_space<smem>>
    %614 = vector.extract_strided_slice %587 {offsets = [0, 5], sizes = [16, 16], strides = [1, 1]} : vector<16x22xf32> to vector<16x16xf32>
    %615 = vector.broadcast %613 : f32 to vector<16x16xf32>
    %616 = arith.mulf %615, %614 : vector<16x16xf32>
    %617 = arith.addf %597, %616 : vector<16x16xf32>
    %c90 = arith.constant 90 : index
    %618 = memref.load %arg2[%c90] : memref<98xf32, #tpu.memory_space<smem>>
    %619 = vector.extract_strided_slice %587 {offsets = [0, 6], sizes = [16, 16], strides = [1, 1]} : vector<16x22xf32> to vector<16x16xf32>
    %620 = vector.broadcast %618 : f32 to vector<16x16xf32>
    %621 = arith.mulf %620, %619 : vector<16x16xf32>
    %622 = arith.addf %602, %621 : vector<16x16xf32>
    %c1_148 = arith.constant 1 : index
    %c6_149 = arith.constant 6 : index
    %c0_150 = arith.constant 0 : index
    %623 = vector.load %arg4[%c1_148, %c6_149, %c0_150] : memref<2x22x22xf32, #tpu.memory_space<vmem>>, vector<1x16x22xf32>
    %624 = vector.shape_cast %623 : vector<1x16x22xf32> to vector<16x22xf32>
    %c91 = arith.constant 91 : index
    %625 = memref.load %arg2[%c91] : memref<98xf32, #tpu.memory_space<smem>>
    %626 = vector.extract_strided_slice %624 {offsets = [0, 0], sizes = [16, 16], strides = [1, 1]} : vector<16x22xf32> to vector<16x16xf32>
    %627 = vector.broadcast %625 : f32 to vector<16x16xf32>
    %628 = arith.mulf %627, %626 : vector<16x16xf32>
    %629 = arith.addf %607, %628 : vector<16x16xf32>
    %c92 = arith.constant 92 : index
    %630 = memref.load %arg2[%c92] : memref<98xf32, #tpu.memory_space<smem>>
    %631 = vector.extract_strided_slice %624 {offsets = [0, 1], sizes = [16, 16], strides = [1, 1]} : vector<16x22xf32> to vector<16x16xf32>
    %632 = vector.broadcast %630 : f32 to vector<16x16xf32>
    %633 = arith.mulf %632, %631 : vector<16x16xf32>
    %634 = arith.addf %612, %633 : vector<16x16xf32>
    %c93 = arith.constant 93 : index
    %635 = memref.load %arg2[%c93] : memref<98xf32, #tpu.memory_space<smem>>
    %636 = vector.extract_strided_slice %624 {offsets = [0, 2], sizes = [16, 16], strides = [1, 1]} : vector<16x22xf32> to vector<16x16xf32>
    %637 = vector.broadcast %635 : f32 to vector<16x16xf32>
    %638 = arith.mulf %637, %636 : vector<16x16xf32>
    %639 = arith.addf %617, %638 : vector<16x16xf32>
    %c94 = arith.constant 94 : index
    %640 = memref.load %arg2[%c94] : memref<98xf32, #tpu.memory_space<smem>>
    %641 = vector.extract_strided_slice %624 {offsets = [0, 3], sizes = [16, 16], strides = [1, 1]} : vector<16x22xf32> to vector<16x16xf32>
    %642 = vector.broadcast %640 : f32 to vector<16x16xf32>
    %643 = arith.mulf %642, %641 : vector<16x16xf32>
    %644 = arith.addf %622, %643 : vector<16x16xf32>
    %c95 = arith.constant 95 : index
    %645 = memref.load %arg2[%c95] : memref<98xf32, #tpu.memory_space<smem>>
    %646 = vector.extract_strided_slice %624 {offsets = [0, 4], sizes = [16, 16], strides = [1, 1]} : vector<16x22xf32> to vector<16x16xf32>
    %647 = vector.broadcast %645 : f32 to vector<16x16xf32>
    %648 = arith.mulf %647, %646 : vector<16x16xf32>
    %649 = arith.addf %629, %648 : vector<16x16xf32>
    %c96 = arith.constant 96 : index
    %650 = memref.load %arg2[%c96] : memref<98xf32, #tpu.memory_space<smem>>
    %651 = vector.extract_strided_slice %624 {offsets = [0, 5], sizes = [16, 16], strides = [1, 1]} : vector<16x22xf32> to vector<16x16xf32>
    %652 = vector.broadcast %650 : f32 to vector<16x16xf32>
    %653 = arith.mulf %652, %651 : vector<16x16xf32>
    %654 = arith.addf %634, %653 : vector<16x16xf32>
    %c97 = arith.constant 97 : index
    %655 = memref.load %arg2[%c97] : memref<98xf32, #tpu.memory_space<smem>>
    %656 = vector.extract_strided_slice %624 {offsets = [0, 6], sizes = [16, 16], strides = [1, 1]} : vector<16x22xf32> to vector<16x16xf32>
    %657 = vector.broadcast %655 : f32 to vector<16x16xf32>
    %658 = arith.mulf %657, %656 : vector<16x16xf32>
    %659 = arith.addf %639, %658 : vector<16x16xf32>
    %660 = arith.addf %654, %659 : vector<16x16xf32>
    %661 = arith.addf %644, %649 : vector<16x16xf32>
    %662 = arith.addf %660, %661 : vector<16x16xf32>
    %663 = arith.negf %662 : vector<16x16xf32>
    %664 = math.exp %663 : vector<16x16xf32>
    %cst_151 = arith.constant 1.000000e+00 : f32
    %665 = vector.broadcast %cst_151 : f32 to vector<16x16xf32>
    %666 = arith.addf %665, %664 : vector<16x16xf32>
    %667 = arith.divf %665, %666 : vector<16x16xf32>
    %668 = vector.extract_strided_slice %667 {offsets = [0, 0], sizes = [1, 16], strides = [1, 1]} : vector<16x16xf32> to vector<1x16xf32>
    %c0_152 = arith.constant 0 : index
    %c0_153 = arith.constant 0 : index
    %669 = vector.load %arg5[%c0_152, %c0_153] : memref<1x256xf32, #tpu.memory_space<vmem>>, vector<1x16xf32>
    tpu.vector_store %arg5[%c0_152, %c0_153], %668 {strides = array<i32>} : memref<1x256xf32, #tpu.memory_space<vmem>>, vector<1x16xf32>,
    %670 = vector.extract_strided_slice %667 {offsets = [1, 0], sizes = [1, 16], strides = [1, 1]} : vector<16x16xf32> to vector<1x16xf32>
    %c0_154 = arith.constant 0 : index
    %c16_155 = arith.constant 16 : index
    %671 = vector.load %arg5[%c0_154, %c16_155] : memref<1x256xf32, #tpu.memory_space<vmem>>, vector<1x16xf32>
    tpu.vector_store %arg5[%c0_154, %c16_155], %670 {strides = array<i32>} : memref<1x256xf32, #tpu.memory_space<vmem>>, vector<1x16xf32>,
    %672 = vector.extract_strided_slice %667 {offsets = [2, 0], sizes = [1, 16], strides = [1, 1]} : vector<16x16xf32> to vector<1x16xf32>
    %c0_156 = arith.constant 0 : index
    %c32_157 = arith.constant 32 : index
    %673 = vector.load %arg5[%c0_156, %c32_157] : memref<1x256xf32, #tpu.memory_space<vmem>>, vector<1x16xf32>
    tpu.vector_store %arg5[%c0_156, %c32_157], %672 {strides = array<i32>} : memref<1x256xf32, #tpu.memory_space<vmem>>, vector<1x16xf32>,
    %674 = vector.extract_strided_slice %667 {offsets = [3, 0], sizes = [1, 16], strides = [1, 1]} : vector<16x16xf32> to vector<1x16xf32>
    %c0_158 = arith.constant 0 : index
    %c48_159 = arith.constant 48 : index
    %675 = vector.load %arg5[%c0_158, %c48_159] : memref<1x256xf32, #tpu.memory_space<vmem>>, vector<1x16xf32>
    tpu.vector_store %arg5[%c0_158, %c48_159], %674 {strides = array<i32>} : memref<1x256xf32, #tpu.memory_space<vmem>>, vector<1x16xf32>,
    %676 = vector.extract_strided_slice %667 {offsets = [4, 0], sizes = [1, 16], strides = [1, 1]} : vector<16x16xf32> to vector<1x16xf32>
    %c0_160 = arith.constant 0 : index
    %c64_161 = arith.constant 64 : index
    %677 = vector.load %arg5[%c0_160, %c64_161] : memref<1x256xf32, #tpu.memory_space<vmem>>, vector<1x16xf32>
    tpu.vector_store %arg5[%c0_160, %c64_161], %676 {strides = array<i32>} : memref<1x256xf32, #tpu.memory_space<vmem>>, vector<1x16xf32>,
    %678 = vector.extract_strided_slice %667 {offsets = [5, 0], sizes = [1, 16], strides = [1, 1]} : vector<16x16xf32> to vector<1x16xf32>
    %c0_162 = arith.constant 0 : index
    %c80_163 = arith.constant 80 : index
    %679 = vector.load %arg5[%c0_162, %c80_163] : memref<1x256xf32, #tpu.memory_space<vmem>>, vector<1x16xf32>
    tpu.vector_store %arg5[%c0_162, %c80_163], %678 {strides = array<i32>} : memref<1x256xf32, #tpu.memory_space<vmem>>, vector<1x16xf32>,
    %680 = vector.extract_strided_slice %667 {offsets = [6, 0], sizes = [1, 16], strides = [1, 1]} : vector<16x16xf32> to vector<1x16xf32>
    %c0_164 = arith.constant 0 : index
    %c96_165 = arith.constant 96 : index
    %681 = vector.load %arg5[%c0_164, %c96_165] : memref<1x256xf32, #tpu.memory_space<vmem>>, vector<1x16xf32>
    tpu.vector_store %arg5[%c0_164, %c96_165], %680 {strides = array<i32>} : memref<1x256xf32, #tpu.memory_space<vmem>>, vector<1x16xf32>,
    %682 = vector.extract_strided_slice %667 {offsets = [7, 0], sizes = [1, 16], strides = [1, 1]} : vector<16x16xf32> to vector<1x16xf32>
    %c0_166 = arith.constant 0 : index
    %c112 = arith.constant 112 : index
    %683 = vector.load %arg5[%c0_166, %c112] : memref<1x256xf32, #tpu.memory_space<vmem>>, vector<1x16xf32>
    tpu.vector_store %arg5[%c0_166, %c112], %682 {strides = array<i32>} : memref<1x256xf32, #tpu.memory_space<vmem>>, vector<1x16xf32>,
    %684 = vector.extract_strided_slice %667 {offsets = [8, 0], sizes = [1, 16], strides = [1, 1]} : vector<16x16xf32> to vector<1x16xf32>
    %c0_167 = arith.constant 0 : index
    %c128 = arith.constant 128 : index
    %685 = vector.load %arg5[%c0_167, %c128] : memref<1x256xf32, #tpu.memory_space<vmem>>, vector<1x16xf32>
    tpu.vector_store %arg5[%c0_167, %c128], %684 {strides = array<i32>} : memref<1x256xf32, #tpu.memory_space<vmem>>, vector<1x16xf32>,
    %686 = vector.extract_strided_slice %667 {offsets = [9, 0], sizes = [1, 16], strides = [1, 1]} : vector<16x16xf32> to vector<1x16xf32>
    %c0_168 = arith.constant 0 : index
    %c144 = arith.constant 144 : index
    %687 = vector.load %arg5[%c0_168, %c144] : memref<1x256xf32, #tpu.memory_space<vmem>>, vector<1x16xf32>
    tpu.vector_store %arg5[%c0_168, %c144], %686 {strides = array<i32>} : memref<1x256xf32, #tpu.memory_space<vmem>>, vector<1x16xf32>,
    %688 = vector.extract_strided_slice %667 {offsets = [10, 0], sizes = [1, 16], strides = [1, 1]} : vector<16x16xf32> to vector<1x16xf32>
    %c0_169 = arith.constant 0 : index
    %c160 = arith.constant 160 : index
    %689 = vector.load %arg5[%c0_169, %c160] : memref<1x256xf32, #tpu.memory_space<vmem>>, vector<1x16xf32>
    tpu.vector_store %arg5[%c0_169, %c160], %688 {strides = array<i32>} : memref<1x256xf32, #tpu.memory_space<vmem>>, vector<1x16xf32>,
    %690 = vector.extract_strided_slice %667 {offsets = [11, 0], sizes = [1, 16], strides = [1, 1]} : vector<16x16xf32> to vector<1x16xf32>
    %c0_170 = arith.constant 0 : index
    %c176 = arith.constant 176 : index
    %691 = vector.load %arg5[%c0_170, %c176] : memref<1x256xf32, #tpu.memory_space<vmem>>, vector<1x16xf32>
    tpu.vector_store %arg5[%c0_170, %c176], %690 {strides = array<i32>} : memref<1x256xf32, #tpu.memory_space<vmem>>, vector<1x16xf32>,
    %692 = vector.extract_strided_slice %667 {offsets = [12, 0], sizes = [1, 16], strides = [1, 1]} : vector<16x16xf32> to vector<1x16xf32>
    %c0_171 = arith.constant 0 : index
    %c192 = arith.constant 192 : index
    %693 = vector.load %arg5[%c0_171, %c192] : memref<1x256xf32, #tpu.memory_space<vmem>>, vector<1x16xf32>
    tpu.vector_store %arg5[%c0_171, %c192], %692 {strides = array<i32>} : memref<1x256xf32, #tpu.memory_space<vmem>>, vector<1x16xf32>,
    %694 = vector.extract_strided_slice %667 {offsets = [13, 0], sizes = [1, 16], strides = [1, 1]} : vector<16x16xf32> to vector<1x16xf32>
    %c0_172 = arith.constant 0 : index
    %c208 = arith.constant 208 : index
    %695 = vector.load %arg5[%c0_172, %c208] : memref<1x256xf32, #tpu.memory_space<vmem>>, vector<1x16xf32>
    tpu.vector_store %arg5[%c0_172, %c208], %694 {strides = array<i32>} : memref<1x256xf32, #tpu.memory_space<vmem>>, vector<1x16xf32>,
    %696 = vector.extract_strided_slice %667 {offsets = [14, 0], sizes = [1, 16], strides = [1, 1]} : vector<16x16xf32> to vector<1x16xf32>
    %c0_173 = arith.constant 0 : index
    %c224 = arith.constant 224 : index
    %697 = vector.load %arg5[%c0_173, %c224] : memref<1x256xf32, #tpu.memory_space<vmem>>, vector<1x16xf32>
    tpu.vector_store %arg5[%c0_173, %c224], %696 {strides = array<i32>} : memref<1x256xf32, #tpu.memory_space<vmem>>, vector<1x16xf32>,
    %698 = vector.extract_strided_slice %667 {offsets = [15, 0], sizes = [1, 16], strides = [1, 1]} : vector<16x16xf32> to vector<1x16xf32>
    %c0_174 = arith.constant 0 : index
    %c240 = arith.constant 240 : index
    %699 = vector.load %arg5[%c0_174, %c240] : memref<1x256xf32, #tpu.memory_space<vmem>>, vector<1x16xf32>
    tpu.vector_store %arg5[%c0_174, %c240], %698 {strides = array<i32>} : memref<1x256xf32, #tpu.memory_space<vmem>>, vector<1x16xf32>,
    %c0_175 = arith.constant 0 : index
    %c0_176 = arith.constant 0 : index
    %c0_177 = arith.constant 0 : index
    %700 = vector.load %arg1[%c0_175, %c0_176, %c0_177] : memref<1x4x256xf32, #tpu.memory_space<vmem>>, vector<1x4x256xf32>
    %701 = vector.shape_cast %700 : vector<1x4x256xf32> to vector<4x256xf32>
    %c0_178 = arith.constant 0 : index
    %c0_179 = arith.constant 0 : index
    %702 = vector.load %arg5[%c0_178, %c0_179] : memref<1x256xf32, #tpu.memory_space<vmem>>, vector<1x256xf32>
    %703 = vector.broadcast %702 : vector<1x256xf32> to vector<4x256xf32>
    %704 = arith.mulf %701, %703 : vector<4x256xf32>
    %c0_180 = arith.constant 0 : index
    %c0_181 = arith.constant 0 : index
    %c0_182 = arith.constant 0 : index
    %705 = vector.load %arg3[%c0_180, %c0_181, %c0_182] : memref<1x4x256xf32, #tpu.memory_space<vmem>>, vector<1x4x256xf32>
    %706 = vector.shape_cast %705 : vector<1x4x256xf32> to vector<4x256xf32>
    %707 = vector.shape_cast %704 : vector<4x256xf32> to vector<1x4x256xf32>
    tpu.vector_store %arg3[%c0_180, %c0_181, %c0_182], %707 {strides = array<i32>} : memref<1x4x256xf32, #tpu.memory_space<vmem>>, vector<1x4x256xf32>,
    return
  }
  func.func @transform_0(%arg0: i32) -> (i32, i32, i32) {
    %c0_i32 = arith.constant 0 : i32
    %c0_i32_0 = arith.constant 0 : i32
    %c0_i32_1 = arith.constant 0 : i32
    return %arg0, %c0_i32, %c0_i32_0 : i32, i32, i32
  }
  func.func @transform_1(%arg0: i32) -> i32 {
    %c0_i32 = arith.constant 0 : i32
    %c0_i32_0 = arith.constant 0 : i32
    return %c0_i32 : i32
  }
  func.func @transform_2(%arg0: i32) -> (i32, i32, i32) {
    %c0_i32 = arith.constant 0 : i32
    %c0_i32_0 = arith.constant 0 : i32
    %c0_i32_1 = arith.constant 0 : i32
    return %arg0, %c0_i32, %c0_i32_0 : i32, i32, i32
  }
}

</mosaic_0001>

<bundles_post_ra>
// kernel: tpu_custom_call.1
= control target key start
LH: loop header
LB: loop body
LE: loop exit
PB: predicated region body
PF: predicated region fallthrough
CT: control target
= control target key end

     0   :  { %s3384_s0 = inlined_call_operand.hbm [shape: f32[2,4,256], index: 0, kind: input, shape index: {}]   ;;  %s3385_s1 = inlined_call_operand.vmem [shape: f32[98], index: 1, kind: input, shape index: {}]   ;;  %s3386_s2 = inlined_call_operand.hbm [shape: f32[2,4,256], index: 2, kind: output, shape index: {}]  }
   0x1   :  { %3405 = sst [smem:[#allocation13_spill]] %s3384_s0 }
   0x2   :  { %3406 = sst [smem:[#allocation14_spill]] %s3385_s1 }
   0x3   :  { %7 = vsyncpa [#allocation5], 0 }
   0x4   :  { %9 = vsyncpa [#allocation5 + $0x1], 0 }
   0x5   :  { %10 = vsyncpa [#allocation7], 0 }
   0x6   :  { %11 = vsyncpa [#allocation6], 0 }
   0x7   :  { %13 = vsyncpa [#allocation6 + $0x1], 0  ;;  %s2352_s9 = smov 0   ;;  %s2354_s10 = smov 0  }
   0x8   :  { %s2356_s11 = smov 0   ;;  %s2358_s12 = smov 0  }
   0x9 LB: > { %s2373_s13 = sadd.s32 4294967295, %s2307_s12   ;;  %s1960_s14 = sadd.s32 4294967294, %s2307_s12   ;;  %s2307_s12 = sphi %s2358_s12, %s3434_s12   ;;  %s2303_s11 = sphi %s2356_s11, %s3433_s11   ;;  %s2299_s10 = sphi %s2354_s10, %s3432_s10   ;;  %s2295_s9 = sphi %s2352_s9, %s3431_s9  }
   0xa   : > { %p39_p0 = scmp.ne.s32.totalorder %s2299_s10, %s2295_s9  ;;  %p3387_p1 = scmp.eq.s32.totalorder %s2373_s13, 0 }
   0xb   : > { %p90_p3 = scmp.eq.s32.totalorder %s1960_s14, 1  ;;  %p1961_p5 = scmp.ge.s32.totalorder %s2307_s12, 1 }
   0xc   : > { %p2382_p4 = por %p3387_p1, %p39_p0  ;;  %p97_p7 = scmp.lt.s32.totalorder %s2307_s12, 3 }
   0xd   : > { %p2387_p6 = por %p90_p3, %p39_p0  ;;  %s3409_s1 = sld [smem:[#allocation14_spill]] }
   0xe   : > { %s3407_s15 = scalar_select %p2382_p4, 1, 0 }
   0xf   : > { %s3408_s16 = scalar_select %p2387_p6, 1, 0 }
  0x10   : > { %p2395_p8 = pnand %p1961_p5, %p97_p7  ;;  %s2403_s21 = sadd.s32 1, %s2307_s12  }
  0x11   : > { %s23_s23 = ssub.s32 %s2307_s12, %s2403_s21  ;;  %s26_s25 = sadd.s32 1, %s2303_s11 }
  0x12   : > { %p2085_p10 = pneg %p2395_p8  ;;  %p2413_p12 = scmp.eq.s32.totalorder %s23_s23, 0 }
  0x13   : > { %s110_s19 = sshll.u32 %s3409_s1, 4  ;;  %p33_p13 = scmp.ne.s32.totalorder %s2303_s11, %s2299_s10  ;;  %s111_s19 = int_to_ptr.vmem [resolvable:$true] %s110_s19 }
  0x14   : > { %p2407_p11 = pnand %p2085_p10, %p3387_p1  ;;  %s2192_s26 = scalar_lea.vmem %s111_s19, 16 }
  0x15   : > { %p2193_p0 = scmp.ne.s32.totalorder %s111_s19, %s2192_s26  ;;  %p2200_p9 = scmp.lt.s32.totalorder %s111_s19, %s111_s19 }
  0x16   : > { %p2194_p3 = pneg %p2407_p11  ;;  %p2201_p2 = scmp.lt.s32.totalorder %s2192_s26, %s2192_s26 }
  0x18   : > { %p2195_p5 = pnand %p2194_p3, %p2193_p0  ;;  %p2202_p10 = por %p2201_p2, %p2200_p9 }
  0x1a   : > { %p2196_p7 = pneg %p2195_p5 }
  0x1c   : > { %p2203_p1 = pnand %p2202_p10, %p2196_p7 }
  0x1e   : > { %2206 = shalt.err (!%p2203_p1)
}
  0x1f   : > { %s2309_s27 = smov [#allocation8]   ;;  %p34_p2 = scmp.eq.s32.totalorder %s2307_s12, 0 }
  0x20   : > { %2088 = dma.vmem_to_smem (!%p2407_p11), %s111_s19, 16, %s2309_s27, [#allocation7]  }
  0x21   : > { %s2427_s28 = scalar_select %p2413_p12, %s2303_s11, %s26_s25  }
  0x22   : > { %p3413_p1 = scmp.eq.s32.totalorder %s2373_s13, 1  ;;  %p2098_p0 = scmp.lt.s32.totalorder %s2307_s12, 2 }
  0x23   : > { %s121_s30 = sand.u32 1, %s2303_s11   ;;  %p35_p3 = por %p34_p2, %p33_p13 }
  0x24   : > { %p2435_p9 = por %p3413_p1, %p33_p13  ;;  %s1964_s3 = sshll.u32 %s121_s30, 3 }
  0x25   : > { %s2075_s4 = sshll.u32 %s2307_s12, 7  ;;  %s3415_s0 = sld [smem:[#allocation13_spill]] }
  0x26   : > { %s3414_s29 = scalar_select %p2435_p9, 1, 0 }
  0x27   : > { %s125_s8 = scalar_lea.vmem [#allocation4], %s1964_s3  ;;  %p2450_p11 = pnand %p2098_p0, %p35_p3 }
  0x28   : > { %s133_s14 = sshll.u32 %s125_s8, 4  ;;  %s122_s18 = scalar_lea.sflag [#allocation5], %s121_s30  ;;  %s2454_s14 = int_to_ptr.vmem [resolvable:$true] %s133_s14 }
  0x29   : > { %p2209_p13 = pneg %p2450_p11 }
  0x2b   : > { %s2448_s7 = scalar_lea.hbm %s3415_s0, %s2075_s4  ;;  %s2212_s24 = scalar_lea.hbm %s3415_s0, 256 }
  0x2c   : > { %s2207_s19 = scalar_lea.hbm %s2448_s7, 128  ;;  %p2213_p10 = scmp.lt.u32.totalorder %s2448_s7, %s3415_s0 }
  0x2d   : > { %p2208_p12 = scmp.ne.s32.totalorder %s2448_s7, %s2207_s19  ;;  %p2214_p2 = scmp.lt.u32.totalorder %s2212_s24, %s2207_s19 }
  0x2e   : > { %p2216_p0 = scmp.lt.u32.totalorder %s2207_s19, %s2448_s7 }
  0x2f   : > { %p2210_p5 = pnand %p2209_p13, %p2208_p12  ;;  %p2215_p1 = por %p2214_p2, %p2213_p10 }
  0x31   : > { %p2211_p7 = pneg %p2210_p5  ;;  %p2217_p3 = por %p2216_p0, %p2215_p1 }
  0x33   : > { %p2218_p6 = pnand %p2217_p3, %p2211_p7 }
  0x35   : > { %2221 = shalt.err (!%p2218_p6)
}
  0x36   : > { %s2222_s27 = scalar_lea.vmem %s2454_s14, 128  ;;  %s2310_s30 = smov [#allocation4]  }
  0x37   : > { %p2223_p12 = scmp.ne.s32.totalorder %s2454_s14, %s2222_s27  ;;  %s2227_s3 = sshll.u32 %s2310_s30, 4  ;;  %s2228_s3 = int_to_ptr.vmem [resolvable:$false] %s2227_s3 }
  0x38   : > { %s2229_s4 = scalar_lea.vmem %s2228_s3, 256  ;;  %p2230_p4 = scmp.lt.s32.totalorder %s2454_s14, %s2228_s3 }
  0x39   : > { %p2225_p5 = pnand %p2223_p12, %p2209_p13  ;;  %p2231_p10 = scmp.lt.s32.totalorder %s2229_s4, %s2222_s27 }
  0x3b   : > { %p2226_p9 = pneg %p2225_p5  ;;  %p2232_p2 = por %p2231_p10, %p2230_p4 }
  0x3d   : > { %p2233_p1 = pnand %p2232_p2, %p2226_p9 }
  0x3f   : > { %2236 = shalt.err (!%p2233_p1)
}
  0x40   : > { %2092 = dma.hbm_to_vmem [thread:$0]  (!%p2450_p11), %s2448_s7, 128, %s2454_s14, %s122_s18  }
  0x41   : > { %142 = sbr.rel (%p2395_p8) target bundleno = 924 (0x39c), region = 28  ;;  %s2484_s5 = sand.u32 (!%p2395_p8), 1, %s2299_s10  }
  0x42   : > { %s3390_s6 = sshll.u32 (!%p2395_p8), %s2484_s5, 3  ;;  %s145_s8 = scalar_lea.sflag (!%p2395_p8), [#allocation5], %s2484_s5 }
  0x43   : > { %s2490_s19 = scalar_lea.vmem (!%p2395_p8), [#allocation4], %s3390_s6  ;;  %p3417_p4 = scmp.ne.s32.totalorder (!%p2395_p8), %s3407_s15, 0 }
  0x48   : > { %2282 = dma.done.wait (%p3417_p4), %s145_s8, 128  }
  0x49   : > { %2284 = vsyncadd (%p3417_p4), %s145_s8, 4294967168  ;;  %p3418_p6 = scmp.eq.s32.totalorder %s2373_s13, 0 }
  0x4b   : > { %2286 = dma.done.wait (%p3418_p6), [#allocation7], 16   ;;  %p3419_p8 = pmov %p3418_p6 }
  0x4d   : > { %2288 = vsyncadd (%p3419_p8), [#allocation7], 4294967280 }
  0x4e   : > { %157 = sfence }
  0x4f   : > { %v174_v0 = vld [vmem:[%s2490_s19] sm:$0xff]  ;;  %vm178_vm0 = vcmask 1043456   ;;  %vm209_vm1 = vcmask 179200   ;;  %v2311_v3 = vmov 0.0   ;;  %s2312_s15 = smov 115   ;;  %s3397_s20 = smov 3  }
  0x50   : > { %v195_v1 = vsel %vm178_vm0, %v174_v0, -inf  ;;  %v179_v2 = vsel %vm178_vm0, %v174_v0, 0.0  ;;  %214 = vst.msk [vmem:[#allocation2 + $0x18] sm:$0xff] %vm209_vm1, %v2311_v3  ;;  %210 = vst.msk [vmem:[#allocation2] sm:$0xff] %vm209_vm1, %v2311_v3  ;;  %v176_v10 = vcombine.high %v174_v0, %v174_v0  ;;  %s2314_s7 = smov 99   ;;  %s2315_s14 = smov 83  }
  0x51   : > { %211 = vst.msk [vmem:[#allocation2 + $0x8] sm:$0xff] %vm209_vm1, %v2311_v3  ;;  %215 = vst.msk [vmem:[#allocation2 + $0x20] sm:$0xff] %vm209_vm1, %v2311_v3  ;;  %v196_v4 = vrot.slane %v195_v1, 4  ;;  %v180_v5 = vrot.slane %v179_v2, 4  ;;  %s2316_s17 = smov 67   ;;  %s2317_s18 = smov 51  }
  0x52   : > { %v186_v15 = vsel %vm178_vm0, %v176_v10, 0.0  ;;  %v202_v25 = vsel %vm178_vm0, %v176_v10, -inf  ;;  %s2318_s22 = smov 35   ;;  %vm212_vm2 = vcmask 177152   ;;  %s2319_s23 = smov 19   ;;  %vm221_vm3 = vcmask 147480  }
  0x53   : > { %v197_v6 = vmax.f32 %v195_v1, %v196_v4  ;;  %v181_v7 = vadd.f32 %v180_v5, %v179_v2  ;;  %v187_v19 = vrot.slane %v186_v15, 4  ;;  %v203_v27 = vrot.slane %v202_v25, 4  ;;  %213 = vst.msk [vmem:[#allocation2 + $0x10] sm:$0x3f] %vm212_vm2, %v2311_v3  ;;  %216 = vst.msk [vmem:[#allocation2 + $0x28] sm:$0x3f] %vm212_vm2, %v2311_v3 }
  0x54   : > { %s2539_s24 = sld [smem:[#allocation8 + $0x33]]  ;;  %s2543_s25 = sld [smem:[#allocation8 + $0x4]] }
  0x55   : > { %v198_v8 = vrot.slane %v197_v6, 2  ;;  %v182_v9 = vrot.slane %v181_v7, 2  ;;  %v188_v20 = vadd.f32 %v187_v19, %v186_v15  ;;  %v204_v28 = vmax.f32 %v202_v25, %v203_v27  ;;  %s2545_s26 = sld [smem:[#allocation8 + $0x37]]  ;;  %s2550_s27 = sld [smem:[#allocation8 + $0x5]] }
  0x56   : > { %s2561_s30 = sld [smem:[#allocation8 + $0x6]]  ;;  %s2563_s3 = sld [smem:[#allocation8 + $0x3f]] }
  0x57   : > { %v199_v11 = vmax.f32 %v197_v6, %v198_v8  ;;  %v183_v12 = vadd.f32 %v182_v9, %v181_v7  ;;  %v189_v21 = vrot.slane %v188_v20, 2  ;;  %v205_v29 = vrot.slane %v204_v28, 2  ;;  %s3399_s4 = smov 1   ;;  %s2577_s8 = sld [smem:[#allocation8 + $0x7]] }
  0x58   : > { %s2627_s6 = sld [smem:[#allocation8 + $0xa]]  ;;  %s3403_s0 = smov 126  }
  0x59   : > { %v200_v13 = vrot.slane %v199_v11, 1  ;;  %v184_v14 = vrot.slane %v183_v12, 1  ;;  %v190_v22 = vadd.f32 %v189_v21, %v188_v20  ;;  %v206_v30 = vmax.f32 %v204_v28, %v205_v29  ;;  %s3421_s1 = smov 1   ;;  %p3428_p11 = scmp.ne.s32.totalorder %s3414_s29, 0 }
  0x5a   : > { %v1018_v43 = vstv %s2539_s24  ;;  %v378_v48 = vstv %s2543_s25  ;;  %s2326_s25 = smov 123   ;;  %s3425_s24 = smov 2  }
  0x5b   : > { %v201_v16 = vmax.f32 %v199_v11, %v200_v13  ;;  %v185_v17 = vadd.f32 %v184_v14, %v183_v12  ;;  %v191_v23 = vrot.slane %v190_v22, 1  ;;  %v207_v31 = vrot.slane %v206_v30, 1 }
  0x5c   : > { %v1074_v49 = vstv %s2545_s26  ;;  %v392_v55 = vstv %s2550_s27  ;;  %v406_v59 = vstv %s2561_s30  ;;  %v1158_v60 = vstv %s2563_s3  ;;  %s3424_s27 = smov 3   ;;  %s2005_s26 = sld [smem:[#allocation8 + $0x23]] }
  0x5d   : > { %233 = vrot.lane.b32.xlu1 %v201_v16, %s2312_s15  ;;  %224 = vrot.lane.b32.xlu0 %v201_v16, %s3397_s20  ;;  %v193_v18 = vmul.f32 0.25, %v185_v17  ;;  %v192_v24 = vadd.f32 %v191_v23, %v190_v22  ;;  %v208_v32 = vmax.f32 %v206_v30, %v207_v31  ;;  %v422_v3 = vstv %s2577_s8  ;;  %s3426_s30 = smov 126   ;;  %s2013_s8 = sld [smem:[#allocation8 + $0x2b]] }
  0x5e   : > { %v464_v23 = vstv %s2627_s6  ;;  %s3422_s6 = smov 125   ;;  %s2061_s3 = sld [smem:[#allocation8 + $0x5b]] }
  0x5f   : > { %v194_v26 = vmul.f32 0.25, %v192_v24 }
  0x61   : > { %241 = vrot.lane.b32.xlu1 %v201_v16, %s2314_s7  ;;  %218 = vrot.lane.b32.xlu0 %v193_v18, %s3397_s20 }
  0x65   : > { %249 = vrot.lane.b32.xlu1 %v201_v16, %s2315_s14  ;;  %237 = vrot.lane.b32.xlu0 %v193_v18, %s2314_s7 }
  0x69   : > { %257 = vrot.lane.b32.xlu1 %v201_v16, %s2316_s17  ;;  %245 = vrot.lane.b32.xlu0 %v193_v18, %s2315_s14 }
  0x6d   : > { %229 = vrot.lane.b32.xlu1 %v193_v18, %s2312_s15  ;;  %253 = vrot.lane.b32.xlu0 %v193_v18, %s2316_s17 }
  0x71   : > { %265 = vrot.lane.b32.xlu1 %v201_v16, %s2317_s18  ;;  %261 = vrot.lane.b32.xlu0 %v193_v18, %s2317_s18 }
  0x75   : > { %273 = vrot.lane.b32.xlu1 %v201_v16, %s2318_s22  ;;  %269 = vrot.lane.b32.xlu0 %v193_v18, %s2318_s22 }
  0x79   : > { %277 = vrot.lane.b32.xlu0 %v193_v18, %s2319_s23  ;;  %286 = vrot.lane.b32.xlu1 %v194_v26, %s3397_s20 }
  0x7d   : > { %295 = vrot.lane.b32.xlu0 %v194_v26, %s2312_s15  ;;  %303 = vrot.lane.b32.xlu1 %v194_v26, %s2314_s7 }
  0x81   : > { %311 = vrot.lane.b32.xlu0 %v194_v26, %s2315_s14  ;;  %319 = vrot.lane.b32.xlu1 %v194_v26, %s2316_s17 }
  0x85   : > { %327 = vrot.lane.b32.xlu0 %v194_v26, %s2317_s18  ;;  %335 = vrot.lane.b32.xlu1 %v194_v26, %s2318_s22 }
  0x89   : > { %343 = vrot.lane.b32.xlu0 %v194_v26, %s2319_s23  ;;  %281 = vrot.lane.b32.xlu1 %v201_v16, %s2319_s23 }
  0x8d   : > { %291 = vrot.lane.b32.xlu0 %v208_v32, %s3397_s20  ;;  %299 = vrot.lane.b32.xlu1 %v208_v32, %s2312_s15  ;;  %s2579_s15 = sld [smem:[#allocation8 + $0xf]] }
  0x91   : > { %307 = vrot.lane.b32.xlu0 %v208_v32, %s2314_s7  ;;  %315 = vrot.lane.b32.xlu1 %v208_v32, %s2315_s14  ;;  %s3391_s7 = smov 124   ;;  %s3393_s14 = smov 125  }
  0x93   : > { %v536_v5 = vstv %s2579_s15  ;;  %s2017_s15 = sld [smem:[#allocation8 + $0x2f]] }
  0x95   : > { %323 = vrot.lane.b32.xlu0 %v208_v32, %s2316_s17  ;;  %331 = vrot.lane.b32.xlu1 %v208_v32, %s2317_s18  ;;  %s2590_s17 = sld [smem:[#allocation8 + $0x8]]  ;;  %s2592_s18 = sld [smem:[#allocation8 + $0x13]] }
  0x99   : > { %339 = vrot.lane.b32.xlu0 %v208_v32, %s2318_s22  ;;  %347 = vrot.lane.b32.xlu1 %v208_v32, %s2319_s23  ;;  %s2611_s22 = sld [smem:[#allocation8 + $0x9]]  ;;  %s2613_s23 = sld [smem:[#allocation8 + $0x17]] }
  0x9b   : > { %v436_v10 = vstv %s2590_s17  ;;  %v592_v11 = vstv %s2592_s18  ;;  %s2045_s17 = sld [smem:[#allocation8 + $0x4b]]  ;;  %s2049_s18 = sld [smem:[#allocation8 + $0x4f]] }
  0x9f   : > { %v450_v16 = vstv %s2611_s22  ;;  %v650_v18 = vstv %s2613_s23  ;;  %s2053_s22 = sld [smem:[#allocation8 + $0x53]]  ;;  %s2065_s23 = sld [smem:[#allocation8 + $0x5f]] }
  0xcf   : > { %v234_v33 = vpop.permute.xlu1 %233  ;;  %v225_v34 = vpop.permute.xlu0 %224 }
  0xd0   : > { %236 = vst.msk [vmem:[#allocation2 + $0x1c] sm:$0x1] %vm221_vm3, %v234_v33  ;;  %228 = vst.msk [vmem:[#allocation2 + $0x1b] sm:$0x1] %vm221_vm3, %v225_v34 }
  0xd3   : > { %v242_v35 = vpop.permute.xlu1 %241  ;;  %v219_v36 = vpop.permute.xlu0 %218 }
  0xd4   : > { %244 = vst.msk [vmem:[#allocation2 + $0x1d] sm:$0x1] %vm221_vm3, %v242_v35  ;;  %222 = vst.msk [vmem:[#allocation2 + $0x3] sm:$0x1] %vm221_vm3, %v219_v36 }
  0xd7   : > { %v250_v37 = vpop.permute.xlu1 %249  ;;  %v238_v38 = vpop.permute.xlu0 %237 }
  0xd8   : > { %252 = vst.msk [vmem:[#allocation2 + $0x1e] sm:$0x1] %vm221_vm3, %v250_v37  ;;  %240 = vst.msk [vmem:[#allocation2 + $0x5] sm:$0x1] %vm221_vm3, %v238_v38 }
  0xdb   : > { %v258_v39 = vpop.permute.xlu1 %257  ;;  %v246_v40 = vpop.permute.xlu0 %245 }
  0xdc   : > { %260 = vst.msk [vmem:[#allocation2 + $0x1f] sm:$0x1] %vm221_vm3, %v258_v39  ;;  %248 = vst.msk [vmem:[#allocation2 + $0x6] sm:$0x1] %vm221_vm3, %v246_v40 }
  0xdf   : > { %v230_v41 = vpop.permute.xlu1 %229  ;;  %v254_v42 = vpop.permute.xlu0 %253 }
  0xe0   : > { %232 = vst.msk [vmem:[#allocation2 + $0x4] sm:$0x1] %vm221_vm3, %v230_v41  ;;  %256 = vst.msk [vmem:[#allocation2 + $0x7] sm:$0x1] %vm221_vm3, %v254_v42 }
  0xe3   : > { %v266_v44 = vpop.permute.xlu1 %265  ;;  %v262_v45 = vpop.permute.xlu0 %261  ;;  %v2552_v46 = vld [vmem:[#allocation2 + $0x18] sm:$0xff] }
  0xe4   : > { %268 = vst.msk [vmem:[#allocation2 + $0x20] sm:$0x1] %vm221_vm3, %v266_v44  ;;  %264 = vst.msk [vmem:[#allocation2 + $0x8] sm:$0x1] %vm221_vm3, %v262_v45  ;;  %v1019_v47 = vmul.f32 %v1018_v43, %v2552_v46  ;;  %v1075_v54 = vmul.f32 %v1074_v49, %v2552_v46 }
  0xe6   : > { %1023 = vrot.lane.b32.xlu1 %v1019_v47, %s3399_s4  ;;  %s3401_s4 = smov 127  }
  0xe7   : > { %v274_v50 = vpop.permute.xlu1 %273  ;;  %v270_v51 = vpop.permute.xlu0 %269  ;;  %v2566_v52 = vld [vmem:[#allocation2] sm:$0xff] }
  0xe8   : > { %276 = vst.msk [vmem:[#allocation2 + $0x21] sm:$0x1] %vm221_vm3, %v274_v50  ;;  %272 = vst.msk [vmem:[#allocation2 + $0x9] sm:$0x1] %vm221_vm3, %v270_v51  ;;  %v379_v53 = vmul.f32 %v378_v48, %v2566_v52  ;;  %v393_v58 = vmul.f32 %v392_v55, %v2566_v52  ;;  %v407_v0 = vmul.f32 %v406_v59, %v2566_v52 }
  0xea   : > { %383 = vrot.lane.b32.xlu0 %v379_v53, %s3391_s7  ;;  %1079 = vrot.lane.b32.xlu1 %v1075_v54, %s3393_s14  ;;  %s3395_s14 = smov 2  }
  0xeb   : > { %v278_v56 = vpop.permute.xlu0 %277  ;;  %v287_v57 = vpop.permute.xlu1 %286  ;;  %v2605_v2 = vld [vmem:[#allocation2 + $0x1] sm:$0xff] }
  0xec   : > { %280 = vst.msk [vmem:[#allocation2 + $0xa] sm:$0x1] %vm221_vm3, %v278_v56  ;;  %289 = vst.msk [vmem:[#allocation2 + $0xb] sm:$0x1] %vm221_vm3, %v287_v57  ;;  %v423_v8 = vmul.f32 %v422_v3, %v2605_v2  ;;  %v437_v14 = vmul.f32 %v436_v10, %v2605_v2  ;;  %v451_v21 = vmul.f32 %v450_v16, %v2605_v2 }
  0xed   : > { %v465_v28 = vmul.f32 %v464_v23, %v2605_v2 }
  0xee   : > { %397 = vrot.lane.b32.xlu0 %v393_v58, %s3391_s7 }
  0xef   : > { %v296_v61 = vpop.permute.xlu0 %295  ;;  %v304_v62 = vpop.permute.xlu1 %303  ;;  %v2595_v63 = vld [vmem:[#allocation2 + $0x1a] sm:$0xff]  ;;  %v2608_v4 = vld [vmem:[#allocation2 + $0x2] sm:$0xff] }
  0xf0   : > { %298 = vst.msk [vmem:[#allocation2 + $0xc] sm:$0x1] %vm221_vm3, %v296_v61  ;;  %306 = vst.msk [vmem:[#allocation2 + $0xd] sm:$0x1] %vm221_vm3, %v304_v62  ;;  %v1159_v1 = vmul.f32 %v1158_v60, %v2595_v63  ;;  %v537_v9 = vmul.f32 %v536_v5, %v2608_v4  ;;  %v593_v15 = vmul.f32 %v592_v11, %v2608_v4 }
  0xf2   : > { %411 = vrot.lane.b32.xlu0 %v407_v0, %s3391_s7  ;;  %1163 = vrot.lane.b32.xlu1 %v1159_v1, %s3397_s20  ;;  %s2629_s7 = sld [smem:[#allocation8 + $0x1b]] }
  0xf3   : > { %v312_v6 = vpop.permute.xlu0 %311  ;;  %v320_v7 = vpop.permute.xlu1 %319  ;;  %v2642_v17 = vld [vmem:[#allocation2 + $0x3] sm:$0xff] }
  0xf4   : > { %314 = vst.msk [vmem:[#allocation2 + $0xe] sm:$0x1] %vm221_vm3, %v312_v6  ;;  %322 = vst.msk [vmem:[#allocation2 + $0xf] sm:$0x1] %vm221_vm3, %v320_v7  ;;  %v651_v22 = vmul.f32 %v650_v18, %v2642_v17 }
  0xf6   : > { %427 = vrot.lane.b32.xlu0 %v423_v8, %s3397_s20  ;;  %541 = vrot.lane.b32.xlu1 %v537_v9, %s3395_s14  ;;  %s2645_s14 = sld [smem:[#allocation8 + $0xb]]  ;;  %s2647_s20 = sld [smem:[#allocation8 + $0xd]] }
  0xf7   : > { %v328_v12 = vpop.permute.xlu0 %327  ;;  %v336_v13 = vpop.permute.xlu1 %335 }
  0xf8   : > { %330 = vst.msk [vmem:[#allocation2 + $0x10] sm:$0x1] %vm221_vm3, %v328_v12  ;;  %338 = vst.msk [vmem:[#allocation2 + $0x11] sm:$0x1] %vm221_vm3, %v336_v13  ;;  %v706_v24 = vstv %s2629_s7  ;;  %v904_v12 = vstv %s2013_s8  ;;  %s2037_s7 = sld [smem:[#allocation8 + $0x43]]  ;;  %s1988_s8 = sld [smem:[#allocation8 + $0x12]] }
  0xf9   : > { %v707_v29 = vmul.f32 %v706_v24, %v2642_v17 }
  0xfa   : > { %441 = vrot.lane.b32.xlu0 %v437_v14, %s3401_s4  ;;  %597 = vrot.lane.b32.xlu1 %v593_v15, %s3403_s0  ;;  %s2661_s4 = sld [smem:[#allocation8 + $0xc]]  ;;  %s3420_s0 = smov 127  }
  0xfb   : > { %v344_v19 = vpop.permute.xlu0 %343  ;;  %v282_v20 = vpop.permute.xlu1 %281  ;;  %v2672_v31 = vld [vmem:[#allocation2 + $0x8] sm:$0xff] }
  0xfc   : > { %346 = vst.msk [vmem:[#allocation2 + $0x12] sm:$0x1] %vm221_vm3, %v344_v19  ;;  %284 = vst.msk [vmem:[#allocation2 + $0x22] sm:$0x1] %vm221_vm3, %v282_v20  ;;  %v478_v30 = vstv %s2645_s14  ;;  %v506_v32 = vstv %s2647_s20  ;;  %v380_v37 = vmul.f32 %v378_v48, %v2672_v31  ;;  %s3423_s20 = smov 124   ;;  %v394_v42 = vmul.f32 %v392_v55, %v2672_v31  ;;  %s2041_s14 = sld [smem:[#allocation8 + $0x47]] }
  0xfd   : > { %v479_v36 = vmul.f32 %v478_v30, %v2605_v2  ;;  %v507_v47 = vmul.f32 %v506_v32, %v2605_v2  ;;  %v408_v48 = vmul.f32 %v406_v59, %v2672_v31 }
  0xfe   : > { %455 = vrot.lane.b32.xlu0 %v451_v21, %s3420_s0  ;;  %655 = vrot.lane.b32.xlu1 %v651_v22, %s3421_s1  ;;  %v1214_v20 = vstv %s2037_s7  ;;  %s1995_s7 = sld [smem:[#allocation8 + $0x19]] }
  0xff   : > { %v292_v25 = vpop.permute.xlu0 %291  ;;  %v300_v26 = vpop.permute.xlu1 %299  ;;  %v420_v27 = vld [vmem:[#allocation2 + $0x9] sm:$0xff]  ;;  %v1215_v22 = vmul.f32 %v1214_v20, %v2595_v63 }
 0x100   : > { %294 = vst.msk [vmem:[#allocation2 + $0x23] sm:$0x1] %vm221_vm3, %v292_v25  ;;  %302 = vst.msk [vmem:[#allocation2 + $0x24] sm:$0x1] %vm221_vm3, %v300_v26  ;;  %v2677_v33 = vmul.f32 %v506_v32, %v420_v27  ;;  %v492_v38 = vstv %s2661_s4  ;;  %v424_v51 = vmul.f32 %v422_v3, %v420_v27  ;;  %v438_v54 = vmul.f32 %v436_v10, %v420_v27  ;;  %v2718_v56 = vld [vmem:[#allocation2 + $0xa] sm:$0xff]  ;;  %s2009_s4 = sld [smem:[#allocation8 + $0x27]] }
 0x101   : > { %v493_v41 = vmul.f32 %v492_v38, %v2605_v2  ;;  %v452_v57 = vmul.f32 %v450_v16, %v420_v27  ;;  %v466_v58 = vmul.f32 %v464_v23, %v420_v27  ;;  %v480_v61 = vmul.f32 %v478_v30, %v420_v27  ;;  %v2744_v2 = vld [vmem:[#allocation2 + $0x5] sm:$0xff] }
 0x102   : > { %469 = vrot.lane.b32.xlu0 %v465_v28, %s3420_s0  ;;  %711 = vrot.lane.b32.xlu1 %v707_v29, %s3422_s6  ;;  %v494_v0 = vmul.f32 %v492_v38, %v420_v27  ;;  %v790_v3 = vstv %s2005_s26  ;;  %v960_v16 = vstv %s2017_s15  ;;  %s1984_s26 = sld [smem:[#allocation8 + $0xe]]  ;;  %s1991_s15 = sld [smem:[#allocation8 + $0x15]] }
 0x103   : > { %v308_v34 = vpop.permute.xlu0 %307  ;;  %v316_v35 = vpop.permute.xlu1 %315  ;;  %v2732_v59 = vld [vmem:[#allocation2 + $0xb] sm:$0xff]  ;;  %v791_v6 = vmul.f32 %v790_v3, %v2744_v2  ;;  %v1272_v25 = vstv %s2041_s14  ;;  %v1328_v28 = vstv %s2045_s17  ;;  %s1996_s14 = sld [smem:[#allocation8 + $0x1a]]  ;;  %s2003_s17 = sld [smem:[#allocation8 + $0x21]] }
 0x104   : > { %310 = vst.msk [vmem:[#allocation2 + $0x25] sm:$0x1] %vm221_vm3, %v308_v34  ;;  %318 = vst.msk [vmem:[#allocation2 + $0x26] sm:$0x1] %vm221_vm3, %v316_v35  ;;  %v652_v62 = vmul.f32 %v650_v18, %v2732_v59  ;;  %v708_v1 = vmul.f32 %v706_v24, %v2732_v59  ;;  %v2758_v13 = vld [vmem:[#allocation2 + $0xe] sm:$0xff]  ;;  %v2776_v24 = vld [vmem:[#allocation2 + $0x1b] sm:$0xff]  ;;  %v1386_v34 = vstv %s2049_s18 }
 0x105   : > { %v906_v15 = vmul.f32 %v904_v12, %v2758_v13  ;;  %v962_v19 = vmul.f32 %v960_v16, %v2758_v13  ;;  %v1273_v26 = vmul.f32 %v1272_v25, %v2776_v24  ;;  %s2848_s18 = sld [smem:[#allocation8 + $0x3]] }
 0x106   : > { %483 = vrot.lane.b32.xlu0 %v479_v36, %s3420_s0  ;;  %385 = vrot.lane.b32.xlu1 %v380_v37, %s3423_s20  ;;  %v846_v8 = vstv %s2009_s4  ;;  %v1442_v37 = vstv %s2053_s22  ;;  %s1987_s4 = sld [smem:[#allocation8 + $0x11]]  ;;  %s2004_s22 = sld [smem:[#allocation8 + $0x22]] }
 0x107   : > { %v324_v39 = vpop.permute.xlu0 %323  ;;  %v332_v40 = vpop.permute.xlu1 %331  ;;  %v847_v9 = vmul.f32 %v846_v8, %v2744_v2  ;;  %v2788_v32 = vld [vmem:[#allocation2 + $0x1c] sm:$0xff] }
 0x108   : > { %326 = vst.msk [vmem:[#allocation2 + $0x27] sm:$0x1] %vm221_vm3, %v324_v39  ;;  %334 = vst.msk [vmem:[#allocation2 + $0x28] sm:$0x1] %vm221_vm3, %v332_v40  ;;  %v1387_v35 = vmul.f32 %v1386_v34, %v2788_v32  ;;  %v1443_v39 = vmul.f32 %v1442_v37, %v2788_v32 }
 0x10a   : > { %497 = vrot.lane.b32.xlu0 %v493_v41, %s2326_s25  ;;  %399 = vrot.lane.b32.xlu1 %v394_v42, %s3423_s20  ;;  %v1526_v42 = vstv %s2061_s3  ;;  %s2007_s3 = sld [smem:[#allocation8 + $0x25]] }
 0x10b   : > { %v340_v44 = vpop.permute.xlu0 %339  ;;  %v348_v45 = vpop.permute.xlu1 %347  ;;  %v2800_v41 = vld [vmem:[#allocation2 + $0x1e] sm:$0xff] }
 0x10c   : > { %342 = vst.msk [vmem:[#allocation2 + $0x29] sm:$0x1] %vm221_vm3, %v340_v44  ;;  %350 = vst.msk [vmem:[#allocation2 + $0x2a] sm:$0x1] %vm221_vm3, %v348_v45  ;;  %v1527_v44 = vmul.f32 %v1526_v42, %v2800_v41 }
 0x10e   : > { %511 = vrot.lane.b32.xlu0 %v507_v47, %s2326_s25  ;;  %413 = vrot.lane.b32.xlu1 %v408_v48, %s3423_s20  ;;  %v1582_v47 = vstv %s2065_s23  ;;  %s2008_s23 = sld [smem:[#allocation8 + $0x26]] }
 0x10f   : > { %v2704_v50 = vld [vmem:[#allocation2 + $0x20] sm:$0xff] }
 0x110   : > { %v1020_v53 = vmul.f32 %v1018_v43, %v2704_v50  ;;  %v1076_v55 = vmul.f32 %v1074_v49, %v2704_v50  ;;  %v538_v43 = vmul.f32 %v536_v5, %v2718_v56  ;;  %v594_v49 = vmul.f32 %v592_v11, %v2718_v56  ;;  %v2746_v5 = vld [vmem:[#allocation2 + $0xd] sm:$0xff] }
 0x111   : > { %v792_v7 = vmul.f32 %v790_v3, %v2746_v5  ;;  %v848_v10 = vmul.f32 %v846_v8, %v2746_v5  ;;  %v2756_v11 = vld [vmem:[#allocation2 + $0x6] sm:$0xff]  ;;  %v622_v8 = vstv %s1991_s15  ;;  %s2015_s15 = sld [smem:[#allocation8 + $0x2d]] }
 0x112   : > { %429 = vrot.lane.b32.xlu1 %v424_v51, %s3424_s27  ;;  %1025 = vrot.lane.b32.xlu0 %v1020_v53, %s3421_s1  ;;  %v905_v14 = vmul.f32 %v904_v12, %v2756_v11  ;;  %v961_v18 = vmul.f32 %v960_v16, %v2756_v11  ;;  %v1583_v51 = vmul.f32 %v1582_v47, %v2800_v41 }
 0x113   : > { %v2768_v21 = vld [vmem:[#allocation2 + $0x22] sm:$0xff]  ;;  %v624_v12 = vmul.f32 %v622_v8, %v2732_v59 }
 0x114   : > { %v1160_v23 = vmul.f32 %v1158_v60, %v2768_v21  ;;  %v1216_v27 = vmul.f32 %v1214_v20, %v2768_v21  ;;  %v2782_v29 = vld [vmem:[#allocation2 + $0x23] sm:$0xff]  ;;  %v1329_v60 = vmul.f32 %v1328_v28, %v2776_v24  ;;  %v678_v20 = vstv %s1995_s7  ;;  %s2019_s7 = sld [smem:[#allocation8 + $0x31]] }
 0x115   : > { %v1274_v30 = vmul.f32 %v1272_v25, %v2782_v29  ;;  %v1330_v36 = vmul.f32 %v1328_v28, %v2782_v29  ;;  %v2794_v38 = vld [vmem:[#allocation2 + $0x24] sm:$0xff]  ;;  %v680_v25 = vmul.f32 %v678_v20, %v2732_v59 }
 0x116   : > { %443 = vrot.lane.b32.xlu1 %v438_v54, %s3420_s0  ;;  %1081 = vrot.lane.b32.xlu0 %v1076_v55, %s3422_s6  ;;  %v1388_v40 = vmul.f32 %v1386_v34, %v2794_v38  ;;  %v1444_v45 = vmul.f32 %v1442_v37, %v2794_v38  ;;  %v2806_v48 = vld [vmem:[#allocation2 + $0x26] sm:$0xff]  ;;  %v522_v55 = vstv %s1984_s26  ;;  %s2878_s26 = sld [smem:[#allocation8 + $0x1f]] }
 0x117   : > { %v1528_v53 = vmul.f32 %v1526_v42, %v2806_v48  ;;  %v1584_v54 = vmul.f32 %v1582_v47, %v2806_v48  ;;  %v2864_v37 = vld [vmem:[#allocation2 + $0x4] sm:$0xff] }
 0x11a   : > { %457 = vrot.lane.b32.xlu1 %v452_v57, %s3420_s0  ;;  %543 = vrot.lane.b32.xlu0 %v538_v43, %s3425_s24  ;;  %v524_v57 = vmul.f32 %v522_v55, %v2718_v56  ;;  %v523_v43 = vmul.f32 %v522_v55, %v2608_v4 }
 0x11e   : > { %471 = vrot.lane.b32.xlu1 %v466_v58, %s3420_s0  ;;  %599 = vrot.lane.b32.xlu0 %v594_v49, %s3426_s30  ;;  %v564_v58 = vstv %s1987_s4  ;;  %s2011_s4 = sld [smem:[#allocation8 + $0x29]] }
 0x122   : > { %485 = vrot.lane.b32.xlu1 %v480_v61, %s3420_s0  ;;  %657 = vrot.lane.b32.xlu0 %v652_v62, %s3421_s1  ;;  %v566_v62 = vmul.f32 %v564_v58, %v2718_v56 }
 0x126   : > { %499 = vrot.lane.b32.xlu1 %v494_v0, %s2326_s25  ;;  %713 = vrot.lane.b32.xlu0 %v708_v1, %s3422_s6  ;;  %v578_v0 = vstv %s1988_s8  ;;  %s2012_s8 = sld [smem:[#allocation8 + $0x2a]] }
 0x12a   : > { %795 = vrot.lane.b32.xlu1 %v791_v6, %s3424_s27  ;;  %797 = vrot.lane.b32.xlu0 %v792_v7, %s3424_s27  ;;  %v580_v6 = vmul.f32 %v578_v0, %v2718_v56  ;;  %v579_v7 = vmul.f32 %v578_v0, %v2608_v4 }
 0x12e   : > { %851 = vrot.lane.b32.xlu1 %v847_v9, %s3420_s0  ;;  %853 = vrot.lane.b32.xlu0 %v848_v10, %s3420_s0 }
 0x132   : > { %909 = vrot.lane.b32.xlu1 %v905_v14, %s3425_s24  ;;  %911 = vrot.lane.b32.xlu0 %v906_v15, %s3425_s24  ;;  %v623_v14 = vmul.f32 %v622_v8, %v2642_v17  ;;  %v740_v8 = vstv %s2878_s26  ;;  %s2036_s26 = sld [smem:[#allocation8 + $0x42]] }
 0x136   : > { %965 = vrot.lane.b32.xlu1 %v961_v18, %s3426_s30  ;;  %967 = vrot.lane.b32.xlu0 %v962_v19, %s3426_s30 }
 0x13a   : > { %1219 = vrot.lane.b32.xlu1 %v1215_v22, %s3420_s0  ;;  %1165 = vrot.lane.b32.xlu0 %v1160_v23, %s3424_s27 }
 0x13e   : > { %1277 = vrot.lane.b32.xlu1 %v1273_v26, %s3425_s24  ;;  %1221 = vrot.lane.b32.xlu0 %v1216_v27, %s3420_s0  ;;  %v679_v26 = vmul.f32 %v678_v20, %v2642_v17  ;;  %v692_v27 = vstv %s1996_s14  ;;  %v741_v20 = vmul.f32 %v740_v8, %v2864_v37  ;;  %s2020_s14 = sld [smem:[#allocation8 + $0x32]] }
 0x13f   : > { %v693_v34 = vmul.f32 %v692_v27, %v2642_v17 }
 0x142   : > { %1333 = vrot.lane.b32.xlu1 %v1329_v60, %s3426_s30  ;;  %1279 = vrot.lane.b32.xlu0 %v1274_v30, %s3425_s24  ;;  %v694_v30 = vmul.f32 %v692_v27, %v2732_v59 }
 0x146   : > { %1391 = vrot.lane.b32.xlu1 %v1387_v35, %s3421_s1  ;;  %1335 = vrot.lane.b32.xlu0 %v1330_v36, %s3426_s30  ;;  %v2862_v35 = vld [vmem:[#allocation2 + $0xc] sm:$0xff]  ;;  %v760_v36 = vstv %s2003_s17  ;;  %s2023_s17 = sld [smem:[#allocation8 + $0x35]] }
 0x14a   : > { %1447 = vrot.lane.b32.xlu1 %v1443_v39, %s3422_s6  ;;  %1393 = vrot.lane.b32.xlu0 %v1388_v40, %s3421_s1  ;;  %v372_v39 = vstv %s2848_s18  ;;  %s2031_s18 = sld [smem:[#allocation8 + $0x3d]] }
 0x14e   : > { %1531 = vrot.lane.b32.xlu1 %v1527_v44, %s3424_s27  ;;  %1449 = vrot.lane.b32.xlu0 %v1444_v45, %s3422_s6  ;;  %v762_v44 = vmul.f32 %v760_v36, %v2862_v35  ;;  %v774_v45 = vstv %s2004_s22  ;;  %s2024_s22 = sld [smem:[#allocation8 + $0x36]] }
 0x14f   : > { %v775_v55 = vmul.f32 %v774_v45, %v2864_v37 }
 0x152   : > { %1587 = vrot.lane.b32.xlu1 %v1583_v51, %s3420_s0  ;;  %1533 = vrot.lane.b32.xlu0 %v1528_v53, %s3424_s27  ;;  %s1992_s27 = sld [smem:[#allocation8 + $0x16]] }
 0x156   : > { %513 = vrot.lane.b32.xlu1 %v2677_v33, %s2326_s25  ;;  %1589 = vrot.lane.b32.xlu0 %v1584_v54, %s3420_s0  ;;  %v565_v33 = vmul.f32 %v564_v58, %v2608_v4  ;;  %v776_v54 = vmul.f32 %v774_v45, %v2862_v35 }
 0x158   : > { %v2820_v49 = vpop.permute.xlu1 %1023  ;;  %v636_v15 = vstv %s1992_s27  ;;  %s2016_s27 = sld [smem:[#allocation8 + $0x2e]] }
 0x159   : > { %v638_v18 = vmul.f32 %v636_v15, %v2732_v59  ;;  %v637_v19 = vmul.f32 %v636_v15, %v2642_v17  ;;  %v761_v59 = vmul.f32 %v760_v36, %v2864_v37  ;;  %v373_v17 = vmul.f32 %v372_v39, %v2566_v52 }
 0x15a   : > { %529 = vrot.lane.b32.xlu1 %v524_v57, %s3425_s24  ;;  %527 = vrot.lane.b32.xlu0 %v523_v43, %s3425_s24  ;;  %v818_v43 = vstv %s2007_s3  ;;  %s2032_s3 = sld [smem:[#allocation8 + $0x3e]] }
 0x15b   : > { %v819_v0 = vmul.f32 %v818_v43, %v2744_v2 }
 0x15c   : > { %v2824_v61 = vpop.permute.xlu0 %383  ;;  %v2830_v1 = vpop.permute.xlu1 %1079 }
 0x15e   : > { %571 = vrot.lane.b32.xlu1 %v566_v62, %s3426_s30  ;;  %569 = vrot.lane.b32.xlu0 %v565_v33, %s3426_s30  ;;  %v820_v33 = vmul.f32 %v818_v43, %v2746_v5  ;;  %v374_v43 = vmul.f32 %v372_v39, %v2672_v31 }
 0x160   : > { %v2832_v3 = vpop.permute.xlu0 %397 }
 0x162   : > { %585 = vrot.lane.b32.xlu1 %v580_v6, %s3426_s30  ;;  %583 = vrot.lane.b32.xlu0 %v579_v7, %s3426_s30  ;;  %v832_v7 = vstv %s2008_s23  ;;  %s2035_s23 = sld [smem:[#allocation8 + $0x41]] }
 0x164   : > { %v2838_v9 = vpop.permute.xlu0 %411  ;;  %v2840_v10 = vpop.permute.xlu1 %1163 }
 0x166   : > { %629 = vrot.lane.b32.xlu1 %v624_v12, %s3421_s1  ;;  %627 = vrot.lane.b32.xlu0 %v623_v14, %s3421_s1 }
 0x168   : > { %v428_v4 = vpop.permute.xlu0 %427  ;;  %v542_v16 = vpop.permute.xlu1 %541 }
 0x169   : > { %v433_v47 = vadd.f32 %v428_v4, %v373_v17  ;;  %v834_v4 = vmul.f32 %v832_v7, %v2746_v5 }
 0x16a   : > { %643 = vrot.lane.b32.xlu1 %v638_v18, %s3421_s1  ;;  %641 = vrot.lane.b32.xlu0 %v637_v19, %s3421_s1  ;;  %v874_v18 = vstv %s2011_s4  ;;  %s2039_s4 = sld [smem:[#allocation8 + $0x45]] }
 0x16b   : > { %v876_v27 = vmul.f32 %v874_v18, %v2746_v5 }
 0x16c   : > { %v2852_v22 = vpop.permute.xlu0 %441  ;;  %v598_v23 = vpop.permute.xlu1 %597 }
 0x16e   : > { %685 = vrot.lane.b32.xlu1 %v680_v25, %s3422_s6  ;;  %683 = vrot.lane.b32.xlu0 %v679_v26, %s3422_s6 }
 0x170   : > { %v2858_v28 = vpop.permute.xlu0 %455  ;;  %v656_v60 = vpop.permute.xlu1 %655 }
 0x172   : > { %699 = vrot.lane.b32.xlu1 %v694_v30, %s3422_s6  ;;  %697 = vrot.lane.b32.xlu0 %v693_v34, %s3422_s6  ;;  %v890_v30 = vstv %s2012_s8  ;;  %s2040_s8 = sld [smem:[#allocation8 + $0x46]] }
 0x174   : > { %v2869_v40 = vpop.permute.xlu0 %469  ;;  %v712_v42 = vpop.permute.xlu1 %711 }
 0x176   : > { %767 = vrot.lane.b32.xlu1 %v762_v44, %s3423_s20  ;;  %765 = vrot.lane.b32.xlu0 %v761_v59, %s3423_s20  ;;  %v891_v44 = vmul.f32 %v890_v30, %v2756_v11  ;;  %v932_v59 = vstv %s2015_s15  ;;  %s2043_s15 = sld [smem:[#allocation8 + $0x49]] }
 0x177   : > { %v934_v17 = vmul.f32 %v932_v59, %v2758_v13  ;;  %v933_v45 = vmul.f32 %v932_v59, %v2756_v11 }
 0x178   : > { %v484_v51 = vpop.permute.xlu0 %483  ;;  %v2880_v53 = vpop.permute.xlu1 %385 }
 0x179   : > { %v489_v57 = vadd.f32 %v484_v51, %v433_v47  ;;  %v946_v47 = vstv %s2016_s27  ;;  %s2992_s27 = sld [smem:[#allocation8 + $0x4a]] }
 0x17a   : > { %781 = vrot.lane.b32.xlu1 %v776_v54, %s3423_s20  ;;  %779 = vrot.lane.b32.xlu0 %v775_v55, %s3423_s20  ;;  %v948_v55 = vmul.f32 %v946_v47, %v2758_v13 }
 0x17b   : > { %v547_v52 = vadd.f32 %v542_v16, %v489_v57  ;;  %v833_v16 = vmul.f32 %v832_v7, %v2744_v2  ;;  %v947_v57 = vmul.f32 %v946_v47, %v2756_v11 }
 0x17c   : > { %v2886_v58 = vpop.permute.xlu0 %497  ;;  %v2888_v62 = vpop.permute.xlu1 %399 }
 0x17d   : > { %v603_v6 = vadd.f32 %v598_v23, %v547_v52  ;;  %v990_v52 = vstv %s2019_s7  ;;  %s3003_s7 = sld [smem:[#allocation8 + $0x4d]] }
 0x17e   : > { %825 = vrot.lane.b32.xlu1 %v820_v33, %s3420_s0  ;;  %823 = vrot.lane.b32.xlu0 %v819_v0, %s3420_s0  ;;  %v992_v7 = vmul.f32 %v990_v52, %v2704_v50 }
 0x17f   : > { %v661_v12 = vadd.f32 %v656_v60, %v603_v6  ;;  %v875_v60 = vmul.f32 %v874_v18, %v2744_v2 }
 0x180   : > { %v2895_v14 = vpop.permute.xlu0 %511  ;;  %v2897_v15 = vpop.permute.xlu1 %413 }
 0x181   : > { %v717_v19 = vadd.f32 %v712_v42, %v661_v12  ;;  %v892_v42 = vmul.f32 %v890_v30, %v2758_v13  ;;  %v991_v12 = vmul.f32 %v990_v52, %v2552_v46  ;;  %v1004_v13 = vstv %s2020_s14  ;;  %s3007_s14 = sld [smem:[#allocation8 + $0x3b]] }
 0x182   : > { %839 = vrot.lane.b32.xlu1 %v834_v4, %s3420_s0  ;;  %837 = vrot.lane.b32.xlu0 %v833_v16, %s3420_s0  ;;  %v1006_v18 = vmul.f32 %v1004_v13, %v2704_v50  ;;  %v1128_v52 = vstv %s2031_s18  ;;  %s3055_s18 = sld [smem:[#allocation8 + $0x59]] }
 0x183   : > { %v2906_v23 = vadd.f32 %v741_v20, %v717_v19  ;;  %v1005_v19 = vmul.f32 %v1004_v13, %v2552_v46 }
 0x184   : > { %v2908_v25 = vpop.permute.xlu0 %1025  ;;  %v430_v26 = vpop.permute.xlu1 %429 }
 0x185   : > { %v434_v33 = vadd.f32 %v430_v26, %v374_v43  ;;  %v1046_v26 = vstv %s2023_s17  ;;  %v2956_v43 = vld [vmem:[#allocation2 + $0x21] sm:$0xff]  ;;  %s3016_s17 = sld [smem:[#allocation8 + $0x4e]] }
 0x186   : > { %881 = vrot.lane.b32.xlu1 %v876_v27, %s2326_s25  ;;  %879 = vrot.lane.b32.xlu0 %v875_v60, %s2326_s25 }
 0x188   : > { %v2914_v34 = vpop.permute.xlu0 %1081  ;;  %v2916_v36 = vpop.permute.xlu1 %443 }
 0x18a   : > { %897 = vrot.lane.b32.xlu1 %v892_v42, %s3425_s24  ;;  %895 = vrot.lane.b32.xlu0 %v891_v44, %s3425_s24  ;;  %v1048_v42 = vmul.f32 %v1046_v26, %v2704_v50  ;;  %v1047_v44 = vmul.f32 %v1046_v26, %v2552_v46  ;;  %v1200_v26 = vstv %s2036_s26  ;;  %s3072_s26 = sld [smem:[#allocation8 + $0x2]] }
 0x18c   : > { %v544_v2 = vpop.permute.xlu0 %543  ;;  %v2922_v5 = vpop.permute.xlu1 %457 }
 0x18e   : > { %939 = vrot.lane.b32.xlu1 %v934_v17, %s3426_s30  ;;  %937 = vrot.lane.b32.xlu0 %v933_v45, %s3426_s30  ;;  %v1060_v17 = vstv %s2024_s22  ;;  %s3042_s22 = sld [smem:[#allocation8 + $0x52]] }
 0x190   : > { %v600_v51 = vpop.permute.xlu0 %599  ;;  %v2928_v54 = vpop.permute.xlu1 %471 }
 0x192   : > { %953 = vrot.lane.b32.xlu1 %v948_v55, %s3426_s30  ;;  %951 = vrot.lane.b32.xlu0 %v947_v57, %s3426_s30  ;;  %v1062_v55 = vmul.f32 %v1060_v17, %v2704_v50  ;;  %v1061_v57 = vmul.f32 %v1060_v17, %v2552_v46 }
 0x194   : > { %v658_v0 = vpop.permute.xlu0 %657  ;;  %v486_v6 = vpop.permute.xlu1 %485 }
 0x195   : > { %v490_v4 = vadd.f32 %v486_v6, %v434_v33  ;;  %v2958_v33 = vld [vmem:[#allocation2 + $0x19] sm:$0xff]  ;;  %v1130_v6 = vmul.f32 %v1128_v52, %v2956_v43 }
 0x196   : > { %997 = vrot.lane.b32.xlu1 %v992_v7, %s3421_s1  ;;  %995 = vrot.lane.b32.xlu0 %v991_v12, %s3421_s1  ;;  %v1129_v7 = vmul.f32 %v1128_v52, %v2958_v33  ;;  %v1142_v12 = vstv %s2032_s3  ;;  %s3057_s3 = sld [smem:[#allocation8 + $0x1]] }
 0x197   : > { %v548_v11 = vadd.f32 %v544_v2, %v490_v4  ;;  %v742_v2 = vmul.f32 %v740_v8, %v2862_v35  ;;  %v1143_v4 = vmul.f32 %v1142_v12, %v2958_v33  ;;  %v1144_v13 = vmul.f32 %v1142_v12, %v2956_v43 }
 0x198   : > { %v714_v39 = vpop.permute.xlu0 %713  ;;  %v2941_v16 = vpop.permute.xlu1 %499 }
 0x199   : > { %v604_v20 = vadd.f32 %v600_v51, %v548_v11  ;;  %v1186_v11 = vstv %s2035_s23  ;;  %s3070_s23 = sld [smem:[#allocation8 + $0x5a]] }
 0x19a   : > { %1011 = vrot.lane.b32.xlu1 %v1006_v18, %s3421_s1  ;;  %1009 = vrot.lane.b32.xlu0 %v1005_v19, %s3421_s1  ;;  %v1187_v19 = vmul.f32 %v1186_v11, %v2595_v63 }
 0x19b   : > { %v662_v27 = vadd.f32 %v658_v0, %v604_v20  ;;  %v1188_v20 = vmul.f32 %v1186_v11, %v2768_v21 }
 0x19c   : > { %v798_v60 = vpop.permute.xlu0 %797  ;;  %v796_v30 = vpop.permute.xlu1 %795 }
 0x19d   : > { %v718_v59 = vadd.f32 %v714_v39, %v662_v27  ;;  %v801_v12 = vadd.f32 %v796_v30, %v2906_v23 }
 0x19e   : > { %1053 = vrot.lane.b32.xlu1 %v1048_v42, %s3422_s6  ;;  %1051 = vrot.lane.b32.xlu0 %v1047_v44, %s3422_s6  ;;  %v1201_v44 = vmul.f32 %v1200_v26, %v2595_v63 }
 0x19f   : > { %v744_v45 = vadd.f32 %v742_v2, %v718_v59  ;;  %v1202_v59 = vmul.f32 %v1200_v26, %v2768_v21  ;;  %v1242_v2 = vstv %s2039_s4  ;;  %s3078_s4 = sld [smem:[#allocation8 + $0x1d]] }
 0x1a0   : > { %v854_v47 = vpop.permute.xlu0 %853  ;;  %v852_v51 = vpop.permute.xlu1 %851  ;;  %v1244_v52 = vmul.f32 %v1242_v2, %v2768_v21 }
 0x1a2   : > { %1067 = vrot.lane.b32.xlu1 %v1062_v55, %s3422_s6  ;;  %1065 = vrot.lane.b32.xlu0 %v1061_v57, %s3422_s6  ;;  %v1243_v57 = vmul.f32 %v1242_v2, %v2595_v63 }
 0x1a4   : > { %v912_v8 = vpop.permute.xlu0 %911  ;;  %v910_v0 = vpop.permute.xlu1 %909 }
 0x1a6   : > { %1135 = vrot.lane.b32.xlu1 %v1130_v6, %s3423_s20  ;;  %1133 = vrot.lane.b32.xlu0 %v1129_v7, %s3423_s20  ;;  %v1258_v6 = vstv %s2040_s8  ;;  %v802_v7 = vadd.f32 %v798_v60, %v744_v45  ;;  %s3090_s8 = sld [smem:[#allocation8 + $0x57]] }
 0x1a7   : > { %v1259_v63 = vmul.f32 %v1258_v6, %v2776_v24  ;;  %v1260_v21 = vmul.f32 %v1258_v6, %v2782_v29  ;;  %v1358_v6 = vstv %s3003_s7  ;;  %s3132_s7 = sld [smem:[#allocation8 + $0x1e]] }
 0x1a8   : > { %v968_v46 = vpop.permute.xlu0 %967  ;;  %v966_v50 = vpop.permute.xlu1 %965  ;;  %v858_v60 = vadd.f32 %v854_v47, %v802_v7 }
 0x1aa   : > { %1147 = vrot.lane.b32.xlu0 %v1143_v4, %s3423_s20  ;;  %1149 = vrot.lane.b32.xlu1 %v1144_v13, %s3423_s20  ;;  %v857_v4 = vadd.f32 %v852_v51, %v801_v12  ;;  %v916_v47 = vadd.f32 %v912_v8, %v858_v60  ;;  %v1108_v8 = vstv %s3007_s14  ;;  %s3158_s14 = sld [smem:[#allocation8 + $0x10]] }
 0x1ac   : > { %v2970_v39 = vpop.permute.xlu0 %1165  ;;  %v2972_v18 = vpop.permute.xlu1 %1219  ;;  %v915_v45 = vadd.f32 %v910_v0, %v857_v4  ;;  %v972_v0 = vadd.f32 %v968_v46, %v916_v47  ;;  %v1372_v4 = vstv %s3016_s17  ;;  %s1990_s17 = sld [smem:[#allocation8 + $0x14]] }
 0x1ad   : > { %v1373_v60 = vmul.f32 %v1372_v4, %v2788_v32 }
 0x1ae   : > { %1191 = vrot.lane.b32.xlu0 %v1187_v19, %s3420_s0  ;;  %1193 = vrot.lane.b32.xlu1 %v1188_v20, %s3420_s0  ;;  %v1300_v19 = vstv %s2043_s15  ;;  %v971_v23 = vadd.f32 %v966_v50, %v915_v45  ;;  %v1030_v46 = vadd.f32 %v2908_v25, %v972_v0  ;;  %v1374_v45 = vmul.f32 %v1372_v4, %v2794_v38  ;;  %s3094_s15 = sld [smem:[#allocation8 + $0x5e]] }
 0x1af   : > { %v1301_v20 = vmul.f32 %v1300_v19, %v2776_v24  ;;  %v1302_v26 = vmul.f32 %v1300_v19, %v2782_v29  ;;  %v1496_v4 = vstv %s3055_s18  ;;  %s2006_s18 = sld [smem:[#allocation8 + $0x24]] }
 0x1b0   : > { %v2978_v27 = vpop.permute.xlu0 %1221  ;;  %v2980_v42 = vpop.permute.xlu1 %1277  ;;  %v1029_v50 = vadd.f32 %v2820_v49, %v971_v23 }
 0x1b2   : > { %1205 = vrot.lane.b32.xlu0 %v1201_v44, %s3420_s0  ;;  %1207 = vrot.lane.b32.xlu1 %v1202_v59, %s3420_s0  ;;  %v1314_v44 = vstv %s2992_s27  ;;  %v1085_v49 = vadd.f32 %v2830_v1, %v1029_v50  ;;  %v1086_v1 = vadd.f32 %v2914_v34, %v1030_v46  ;;  %s3112_s27 = sld [smem:[#allocation8 + $0x61]] }
 0x1b4   : > { %v2986_v17 = vpop.permute.xlu0 %1279  ;;  %v2988_v55 = vpop.permute.xlu1 %1333 }
 0x1b6   : > { %1247 = vrot.lane.b32.xlu0 %v1243_v57, %s2326_s25  ;;  %1249 = vrot.lane.b32.xlu1 %v1244_v52, %s2326_s25  ;;  %v1315_v57 = vmul.f32 %v1314_v44, %v2776_v24  ;;  %v1316_v52 = vmul.f32 %v1314_v44, %v2782_v29  ;;  %v1359_v24 = vmul.f32 %v1358_v6, %v2788_v32 }
 0x1b7   : > { %v1360_v29 = vmul.f32 %v1358_v6, %v2794_v38 }
 0x1b8   : > { %v2997_v13 = vpop.permute.xlu0 %1335  ;;  %v2999_v11 = vpop.permute.xlu1 %1391 }
 0x1ba   : > { %1263 = vrot.lane.b32.xlu0 %v1259_v63, %s3425_s24  ;;  %1265 = vrot.lane.b32.xlu1 %v1260_v21, %s3425_s24  ;;  %s3028_s24 = sld [smem:[#allocation8 + $0x51]]  ;;  %v1109_v63 = vmul.f32 %v1108_v8, %v2958_v33 }
 0x1bc   : > { %v3009_v30 = vpop.permute.xlu0 %1393  ;;  %v3011_v51 = vpop.permute.xlu1 %1447  ;;  %v1111_v25 = vadd.f32 %v1109_v63, %v1085_v49  ;;  %v360_v63 = vstv %s3057_s3  ;;  %s2327_s3 = smov 122  }
 0x1be   : > { %1305 = vrot.lane.b32.xlu0 %v1301_v20, %s3426_s30  ;;  %1307 = vrot.lane.b32.xlu1 %v1302_v26, %s3426_s30  ;;  %v1110_v20 = vmul.f32 %v1108_v8, %v2956_v43  ;;  %v1169_v26 = vadd.f32 %v2840_v10, %v1111_v25 }
 0x1c0   : > { %v3021_v59 = vpop.permute.xlu0 %1449  ;;  %v3023_v2 = vpop.permute.xlu1 %1531  ;;  %v1414_v23 = vstv %s3028_s24  ;;  %v1112_v34 = vadd.f32 %v1110_v20, %v1086_v1  ;;  %v1510_v20 = vstv %s3070_s23  ;;  %s1994_s24 = sld [smem:[#allocation8 + $0x18]] }
 0x1c1   : > { %v1415_v0 = vmul.f32 %v1414_v23, %v2788_v32  ;;  %v1416_v50 = vmul.f32 %v1414_v23, %v2794_v38  ;;  %v362_v23 = vmul.f32 %v360_v63, %v2672_v31  ;;  %s2010_s23 = sld [smem:[#allocation8 + $0x28]] }
 0x1c2   : > { %1319 = vrot.lane.b32.xlu0 %v1315_v57, %s3426_s30  ;;  %1321 = vrot.lane.b32.xlu1 %v1316_v52, %s3426_s30  ;;  %v1428_v57 = vstv %s3042_s22  ;;  %v1170_v10 = vadd.f32 %v2970_v39, %v1112_v34  ;;  %v1225_v52 = vadd.f32 %v2972_v18, %v1169_v26  ;;  %s2002_s22 = sld [smem:[#allocation8 + $0x20]] }
 0x1c3   : > { %v1429_v46 = vmul.f32 %v1428_v57, %v2788_v32  ;;  %v1430_v49 = vmul.f32 %v1428_v57, %v2794_v38  ;;  %v404_v34 = vadd.f32 %v2888_v62, %v362_v23 }
 0x1c4   : > { %v3035_v7 = vpop.permute.xlu0 %1533  ;;  %v3037_v12 = vpop.permute.xlu1 %1587  ;;  %v1226_v32 = vadd.f32 %v2978_v27, %v1170_v10  ;;  %v1283_v38 = vadd.f32 %v2980_v42, %v1225_v52  ;;  %v366_v27 = vstv %s3072_s26  ;;  %s2014_s26 = sld [smem:[#allocation8 + $0x2c]] }
 0x1c5   : > { %v462_v62 = vadd.f32 %v2922_v5, %v404_v34 }
 0x1c6   : > { %1363 = vrot.lane.b32.xlu0 %v1359_v24, %s3421_s1  ;;  %1365 = vrot.lane.b32.xlu1 %v1360_v29, %s3421_s1  ;;  %v3084_v24 = vld [vmem:[#allocation2 + $0x1d] sm:$0xff]  ;;  %v3086_v29 = vld [vmem:[#allocation2 + $0x25] sm:$0xff]  ;;  %v1339_v57 = vadd.f32 %v2988_v55, %v1283_v38 }
 0x1c7   : > { %v1497_v1 = vmul.f32 %v1496_v4, %v3084_v24  ;;  %v1498_v25 = vmul.f32 %v1496_v4, %v3086_v29 }
 0x1c8   : > { %v3048_v21 = vpop.permute.xlu0 %1589  ;;  %v3050_v19 = vpop.permute.xlu1 %513 }
 0x1c9   : > { %v518_v5 = vadd.f32 %v3050_v19, %v462_v62 }
 0x1ca   : > { %1377 = vrot.lane.b32.xlu0 %v1373_v60, %s3421_s1  ;;  %1379 = vrot.lane.b32.xlu1 %v1374_v45, %s3421_s1  ;;  %s3076_s1 = sld [smem:[#allocation8 + $0x5d]]  ;;  %v3104_v60 = vld [vmem:[#allocation2] sm:$0xff] }
 0x1cb   : > { %v361_v45 = vmul.f32 %v3104_v60, %v360_v63  ;;  %v367_v4 = vmul.f32 %v3104_v60, %v366_v27 }
 0x1cc   : > { %v3063_v44 = vpop.permute.xlu0 %527  ;;  %v3065_v47 = vpop.permute.xlu1 %529 }
 0x1cd   : > { %v403_v42 = vadd.f32 %v2832_v3, %v361_v45  ;;  %v368_v3 = vmul.f32 %v366_v27, %v2672_v31 }
 0x1ce   : > { %1419 = vrot.lane.b32.xlu0 %v1415_v0, %s3422_s6  ;;  %1421 = vrot.lane.b32.xlu1 %v1416_v50, %s3422_s6  ;;  %v728_v0 = vstv %s3078_s4  ;;  %v1284_v50 = vadd.f32 %v2986_v17, %v1226_v32  ;;  %v1568_v17 = vstv %s3094_s15  ;;  %v417_v32 = vadd.f32 %v2838_v9, %v367_v4  ;;  %s3213_s4 = sld [smem:[#allocation8 + $0x34]]  ;;  %s3219_s15 = sld [smem:[#allocation8 + $0x39]] }
 0x1cf   : > { %v461_v63 = vadd.f32 %v2858_v28, %v403_v42  ;;  %v729_v55 = vmul.f32 %v728_v0, %v2864_v37  ;;  %v418_v31 = vadd.f32 %v2897_v15, %v368_v3 }
 0x1d0   : > { %v570_v6 = vpop.permute.xlu0 %569  ;;  %v572_v8 = vpop.permute.xlu1 %571  ;;  %v1554_v26 = vstv %s3076_s1  ;;  %v475_v42 = vadd.f32 %v2869_v40, %v417_v32  ;;  %s2018_s1 = sld [smem:[#allocation8 + $0x30]] }
 0x1d1   : > { %v517_v28 = vadd.f32 %v2895_v14, %v461_v63  ;;  %v1556_v27 = vmul.f32 %v1554_v26, %v2806_v48  ;;  %v476_v9 = vadd.f32 %v2928_v54, %v418_v31  ;;  %v576_v34 = vadd.f32 %v572_v8, %v518_v5 }
 0x1d2   : > { %1433 = vrot.lane.b32.xlu0 %v1429_v46, %s3422_s6  ;;  %1435 = vrot.lane.b32.xlu1 %v1430_v49, %s3422_s6  ;;  %v1511_v46 = vmul.f32 %v1510_v20, %v3084_v24  ;;  %v1512_v49 = vmul.f32 %v1510_v20, %v3086_v29  ;;  %v1555_v20 = vmul.f32 %v1554_v26, %v2800_v41 }
 0x1d3   : > { %v575_v14 = vadd.f32 %v570_v6, %v517_v28  ;;  %v534_v26 = vadd.f32 %v3065_v47, %v476_v9  ;;  %v1570_v8 = vmul.f32 %v1568_v17, %v2806_v48  ;;  %v2169_v9 = vld [vmem:[#allocation2 + $0x2] sm:$0xff] }
 0x1d4   : > { %v3098_v39 = vpop.permute.xlu0 %583  ;;  %v3100_v18 = vpop.permute.xlu1 %585 }
 0x1d5   : > { %v590_v4 = vadd.f32 %v3100_v18, %v534_v26  ;;  %v2171_v26 = vld [vmem:[#allocation2 + $0xb] sm:$0xff] }
 0x1d6   : > { %1501 = vrot.lane.b32.xlu0 %v1497_v1, %s3423_s20  ;;  %1503 = vrot.lane.b32.xlu1 %v1498_v25, %s3423_s20  ;;  %v1340_v1 = vadd.f32 %v2997_v13, %v1284_v50  ;;  %v1476_v25 = vstv %s3090_s8  ;;  %v1397_v13 = vadd.f32 %v2999_v11, %v1339_v57  ;;  %v533_v50 = vadd.f32 %v3063_v44, %v475_v42  ;;  %s3217_s8 = sld [smem:[#allocation8 + $0x3c]] }
 0x1d7   : > { %v1477_v11 = vmul.f32 %v1476_v25, %v3084_v24  ;;  %v1478_v54 = vmul.f32 %v1476_v25, %v3086_v29 }
 0x1d8   : > { %v628_v10 = vpop.permute.xlu0 %627  ;;  %v630_v52 = vpop.permute.xlu1 %629  ;;  %v1398_v38 = vadd.f32 %v3009_v30, %v1340_v1  ;;  %v1453_v15 = vadd.f32 %v3011_v51, %v1397_v13  ;;  %v1610_v30 = vstv %s3112_s27  ;;  %s3223_s27 = sld [smem:[#allocation8 + $0x40]] }
 0x1d9   : > { %v633_v40 = vadd.f32 %v628_v10, %v575_v14  ;;  %v634_v57 = vadd.f32 %v630_v52, %v576_v34  ;;  %v734_v52 = vstv %s3132_s7  ;;  %v1611_v18 = vmul.f32 %v1610_v30, %v2800_v41  ;;  %s3234_s7 = sld [smem:[#allocation8 + $0x3a]] }
 0x1da   : > { %1515 = vrot.lane.b32.xlu0 %v1511_v46, %s3423_s20  ;;  %1517 = vrot.lane.b32.xlu1 %v1512_v49, %s3423_s20  ;;  %v1454_v19 = vadd.f32 %v3021_v59, %v1398_v38  ;;  %v1569_v59 = vmul.f32 %v1568_v17, %v2800_v41  ;;  %v730_v46 = vmul.f32 %v728_v0, %v2862_v35  ;;  %v606_v14 = vstv %s1990_s17  ;;  %s3253_s17 = sld [smem:[#allocation8 + $0x48]] }
 0x1db   : > { %v589_v49 = vadd.f32 %v3098_v39, %v533_v50  ;;  %v1479_v47 = vadd.f32 %v1477_v11, %v1453_v15  ;;  %v1612_v17 = vmul.f32 %v1610_v30, %v2806_v48  ;;  %v735_v31 = vmul.f32 %v734_v52, %v2864_v37  ;;  %v2170_v15 = vld [vmem:[#allocation2 + $0xa] sm:$0xff] }
 0x1dc   : > { %v642_v45 = vpop.permute.xlu0 %641  ;;  %v644_v23 = vpop.permute.xlu1 %643  ;;  %v1480_v10 = vadd.f32 %v1478_v54, %v1454_v19  ;;  %v736_v5 = vmul.f32 %v734_v52, %v2862_v35  ;;  %v608_v19 = vmul.f32 %v2170_v15, %v606_v14  ;;  %v607_v11 = vmul.f32 %v2169_v9, %v606_v14 }
 0x1dd   : > { %v647_v3 = vadd.f32 %v642_v45, %v589_v49  ;;  %v648_v62 = vadd.f32 %v644_v23, %v590_v4  ;;  %v1537_v13 = vadd.f32 %v3023_v2, %v1479_v47  ;;  %v664_v30 = vstv %s1994_s24  ;;  %s2046_s24 = sld [smem:[#allocation8 + $0x4c]] }
 0x1de   : > { %1559 = vrot.lane.b32.xlu0 %v1555_v20, %s3420_s0  ;;  %1561 = vrot.lane.b32.xlu1 %v1556_v27, %s3420_s0  ;;  %v550_v27 = vstv %s3158_s14  ;;  %v804_v49 = vstv %s2006_s18  ;;  %s3242_s14 = sld [smem:[#allocation8 + $0x44]]  ;;  %s2058_s18 = sld [smem:[#allocation8 + $0x58]] }
 0x1df   : > { %v1593_v48 = vadd.f32 %v3037_v12, %v1537_v13  ;;  %v552_v42 = vmul.f32 %v550_v27, %v2718_v56  ;;  %v551_v12 = vmul.f32 %v2169_v9, %v550_v27  ;;  %v974_v13 = vstv %s2018_s1  ;;  %s2329_s1 = smov 16  }
 0x1e0   : > { %v684_v6 = vpop.permute.xlu0 %683  ;;  %v686_v51 = vpop.permute.xlu1 %685  ;;  %v1032_v15 = vstv %s3213_s4  ;;  %s2330_s4 = smov 32  }
 0x1e1   : > { %v689_v44 = vadd.f32 %v684_v6, %v633_v40  ;;  %v690_v63 = vadd.f32 %v686_v51, %v634_v57  ;;  %v666_v40 = vmul.f32 %v2171_v26, %v664_v30  ;;  %v2172_v57 = vld [vmem:[#allocation2 + $0x3] sm:$0xff]  ;;  %v746_v6 = vstv %s2002_s22  ;;  %s2050_s22 = sld [smem:[#allocation8 + $0x50]] }
 0x1e2   : > { %1573 = vrot.lane.b32.xlu0 %v1569_v59, %s3420_s0  ;;  %1575 = vrot.lane.b32.xlu1 %v1570_v8, %s3420_s0  ;;  %v665_v54 = vmul.f32 %v2172_v57, %v664_v30  ;;  %v748_v8 = vmul.f32 %v746_v6, %v2862_v35  ;;  %v2178_v30 = vld [vmem:[#allocation2 + $0x18] sm:$0xff]  ;;  %v1096_v57 = vstv %s3219_s15  ;;  %s2332_s15 = smov 48  }
 0x1e3   : > { %v3163_v1 = vadd.f32 %v729_v55, %v689_v44  ;;  %v3165_v0 = vadd.f32 %v730_v46, %v690_v63  ;;  %v1538_v55 = vadd.f32 %v3035_v7, %v1480_v10  ;;  %v747_v46 = vmul.f32 %v746_v6, %v2864_v37  ;;  %v2173_v63 = vld [vmem:[#allocation2 + $0xd] sm:$0xff]  ;;  %v2174_v10 = vld [vmem:[#allocation2 + $0x5] sm:$0xff] }
 0x1e4   : > { %v698_v39 = vpop.permute.xlu0 %697  ;;  %v700_v25 = vpop.permute.xlu1 %699  ;;  %v806_v47 = vmul.f32 %v2173_v63, %v804_v49  ;;  %v805_v52 = vmul.f32 %v2174_v10, %v804_v49  ;;  %v1033_v26 = vmul.f32 %v2178_v30, %v1032_v15 }
 0x1e5   : > { %v703_v32 = vadd.f32 %v698_v39, %v647_v3  ;;  %v704_v28 = vadd.f32 %v700_v25, %v648_v62  ;;  %v1594_v45 = vadd.f32 %v3048_v21, %v1538_v55  ;;  %v860_v3 = vstv %s2010_s23  ;;  %s2062_s23 = sld [smem:[#allocation8 + $0x5c]] }
 0x1e6   : > { %1615 = vrot.lane.b32.xlu0 %v1611_v18, %s2326_s25  ;;  %1617 = vrot.lane.b32.xlu1 %v1612_v17, %s2326_s25  ;;  %v862_v62 = vmul.f32 %v2173_v63, %v860_v3  ;;  %v861_v39 = vmul.f32 %v2174_v10, %v860_v3  ;;  %v918_v25 = vstv %s2014_s26  ;;  %s2066_s26 = sld [smem:[#allocation8 + $0x60]] }
 0x1e7   : > { %v3175_v38 = vadd.f32 %v735_v31, %v703_v32  ;;  %v3177_v41 = vadd.f32 %v736_v5, %v704_v28  ;;  %v2175_v32 = vld [vmem:[#allocation2 + $0xe] sm:$0xff]  ;;  %v2176_v31 = vld [vmem:[#allocation2 + $0x6] sm:$0xff] }
 0x1e8   : > { %v3181_v23 = vpop.permute.xlu0 %765  ;;  %v3183_v20 = vpop.permute.xlu1 %767  ;;  %v920_v28 = vmul.f32 %v2175_v32, %v918_v25  ;;  %v919_v5 = vmul.f32 %v2176_v31, %v918_v25  ;;  %v975_v9 = vmul.f32 %v2176_v31, %v974_v13 }
 0x1e9   : > { %v771_v55 = vadd.f32 %v3181_v23, %v3163_v1 }
 0x1ea   : > { %1637 = vrot.lane.b32.xlu1 %v1594_v45, %s3420_s0  ;;  %1635 = vrot.lane.b32.xlu0 %v1593_v48, %s3420_s0  ;;  %v772_v48 = vadd.f32 %v3183_v20, %v3165_v0 }
 0x1ec   : > { %v3188_v2 = vpop.permute.xlu0 %779  ;;  %v3190_v7 = vpop.permute.xlu1 %781 }
 0x1ed   : > { %v785_v1 = vadd.f32 %v3188_v2, %v3175_v38  ;;  %v786_v0 = vadd.f32 %v3190_v7, %v3177_v41  ;;  %v1172_v41 = vstv %s3223_s27  ;;  %s2333_s27 = smov 80  }
 0x1ee   : > { %557 = vrot.lane.b32.xlu1 %v552_v42, %s3426_s30  ;;  %555 = vrot.lane.b32.xlu0 %v551_v12, %s3426_s30  ;;  %v976_v42 = vmul.f32 %v2175_v32, %v974_v13 }
 0x1f0   : > { %v3195_v21 = vpop.permute.xlu0 %823  ;;  %v3197_v34 = vpop.permute.xlu1 %825 }
 0x1f1   : > { %v829_v12 = vadd.f32 %v3195_v21, %v771_v55  ;;  %v830_v14 = vadd.f32 %v3197_v34, %v772_v48  ;;  %v2177_v34 = vld [vmem:[#allocation2 + $0x20] sm:$0xff] }
 0x1f2   : > { %613 = vrot.lane.b32.xlu1 %v608_v19, %s2327_s3  ;;  %611 = vrot.lane.b32.xlu0 %v607_v11, %s2327_s3  ;;  %v1034_v11 = vmul.f32 %v2177_v34, %v1032_v15 }
 0x1f4   : > { %v3201_v56 = vpop.permute.xlu0 %837  ;;  %v3203_v50 = vpop.permute.xlu1 %839 }
 0x1f5   : > { %v844_v38 = vadd.f32 %v3203_v50, %v786_v0  ;;  %v1097_v50 = vmul.f32 %v1096_v57, %v2958_v33  ;;  %v2181_v0 = vld [vmem:[#allocation2 + $0x1b] sm:$0xff] }
 0x1f6   : > { %671 = vrot.lane.b32.xlu1 %v666_v40, %s3422_s6  ;;  %669 = vrot.lane.b32.xlu0 %v665_v54, %s3422_s6  ;;  %v1114_v40 = vstv %s3217_s8  ;;  %v843_v54 = vadd.f32 %v3201_v56, %v785_v1  ;;  %v1286_v1 = vstv %s3253_s17  ;;  %s2331_s8 = smov 64   ;;  %s2076_s17 = sshll.u32 %s2373_s13, 7 }
 0x1f7   : > { %v1116_v63 = vmul.f32 %v1114_v40, %v2956_v43  ;;  %v1115_v56 = vmul.f32 %v1114_v40, %v2958_v33  ;;  %v1400_v40 = vstv %s2050_s22  ;;  %s2336_s13 = smov [#allocation9]  }
 0x1f8   : > { %v880_v51 = vpop.permute.xlu0 %879  ;;  %v882_v59 = vpop.permute.xlu1 %881 }
 0x1f9   : > { %v885_v23 = vadd.f32 %v880_v51, %v829_v12  ;;  %v886_v20 = vadd.f32 %v882_v59, %v830_v14 }
 0x1fa   : > { %753 = vrot.lane.b32.xlu1 %v748_v8, %s3423_s20  ;;  %751 = vrot.lane.b32.xlu0 %v747_v46, %s3423_s20 }
 0x1fc   : > { %v896_v4 = vpop.permute.xlu0 %895  ;;  %v898_v44 = vpop.permute.xlu1 %897 }
 0x1fd   : > { %v901_v7 = vadd.f32 %v896_v4, %v843_v54  ;;  %v902_v51 = vadd.f32 %v898_v44, %v844_v38  ;;  %v1102_v4 = vstv %s3234_s7  ;;  %v2183_v38 = vld [vmem:[#allocation2 + $0x1c] sm:$0xff]  ;;  %s2334_s7 = smov 96  }
 0x1fe   : > { %811 = vrot.lane.b32.xlu1 %v806_v47, %s3420_s0  ;;  %809 = vrot.lane.b32.xlu0 %v805_v52, %s3420_s0  ;;  %v1098_v47 = vmul.f32 %v1096_v57, %v2956_v43  ;;  %v1103_v48 = vmul.f32 %v1102_v4, %v2958_v33 }
 0x200   : > { %v938_v35 = vpop.permute.xlu0 %937  ;;  %v940_v37 = vpop.permute.xlu1 %939 }
 0x201   : > { %v943_v2 = vadd.f32 %v938_v35, %v885_v23  ;;  %v944_v6 = vadd.f32 %v940_v37, %v886_v20  ;;  %v1287_v23 = vmul.f32 %v2181_v0, %v1286_v1  ;;  %v2182_v20 = vld [vmem:[#allocation2 + $0x23] sm:$0xff] }
 0x202   : > { %867 = vrot.lane.b32.xlu1 %v862_v62, %s2326_s25  ;;  %865 = vrot.lane.b32.xlu0 %v861_v39, %s2326_s25 }
 0x204   : > { %v952_v18 = vpop.permute.xlu0 %951  ;;  %v954_v17 = vpop.permute.xlu1 %953 }
 0x205   : > { %v957_v10 = vadd.f32 %v952_v18, %v901_v7  ;;  %v958_v52 = vadd.f32 %v954_v17, %v902_v51  ;;  %v2179_v18 = vld [vmem:[#allocation2 + $0x1a] sm:$0xff]  ;;  %v1482_v7 = vstv %s2058_s18 }
 0x206   : > { %925 = vrot.lane.b32.xlu1 %v920_v28, %s3426_s30  ;;  %923 = vrot.lane.b32.xlu0 %v919_v5, %s3426_s30  ;;  %v1173_v17 = vmul.f32 %v2179_v18, %v1172_v41  ;;  %v2180_v28 = vld [vmem:[#allocation2 + $0x22] sm:$0xff]  ;;  %v1228_v5 = vstv %s3242_s14  ;;  %s2335_s14 = smov 112  }
 0x207   : > { %v1174_v31 = vmul.f32 %v2180_v28, %v1172_v41  ;;  %v1229_v14 = vmul.f32 %v2179_v18, %v1228_v5  ;;  %v1230_v15 = vmul.f32 %v2180_v28, %v1228_v5 }
 0x208   : > { %v996_v45 = vpop.permute.xlu0 %995  ;;  %v998_v27 = vpop.permute.xlu1 %997 }
 0x209   : > { %v1001_v59 = vadd.f32 %v996_v45, %v943_v2  ;;  %v1002_v8 = vadd.f32 %v998_v27, %v944_v6  ;;  %v1104_v45 = vmul.f32 %v1102_v4, %v2956_v43  ;;  %v1401_v2 = vmul.f32 %v2183_v38, %v1400_v40  ;;  %v2184_v6 = vld [vmem:[#allocation2 + $0x24] sm:$0xff] }
 0x20a   : > { %981 = vrot.lane.b32.xlu1 %v976_v42, %s2327_s3  ;;  %979 = vrot.lane.b32.xlu0 %v975_v9, %s2327_s3  ;;  %v1402_v41 = vmul.f32 %v2184_v6, %v1400_v40 }
 0x20c   : > { %v1010_v21 = vpop.permute.xlu0 %1009  ;;  %v1012_v19 = vpop.permute.xlu1 %1011 }
 0x20d   : > { %v1015_v44 = vadd.f32 %v1010_v21, %v957_v10  ;;  %v1016_v37 = vadd.f32 %v1012_v19, %v958_v52  ;;  %v1288_v21 = vmul.f32 %v2182_v20, %v1286_v1  ;;  %v1342_v19 = vstv %s2046_s24  ;;  %v2186_v10 = vld [vmem:[#allocation2 + $0x26] sm:$0xff]  ;;  %s3427_s24 = sshll.u32 %s2484_s5, 3 }
 0x20e   : > { %1039 = vrot.lane.b32.xlu1 %v1034_v11, %s3422_s6  ;;  %1037 = vrot.lane.b32.xlu0 %v1033_v26, %s3422_s6  ;;  %v1343_v30 = vmul.f32 %v2181_v0, %v1342_v19  ;;  %v1344_v26 = vmul.f32 %v2182_v20, %v1342_v19  ;;  %s173_s22 = scalar_lea.vmem [#allocation9], %s3427_s24 }
 0x20f   : > { %s1878_s18 = sshll.u32 %s173_s22, 4  ;;  %s3342_s18 = int_to_ptr.vmem [resolvable:$true] %s1878_s18 }
 0x210   : > { %v1052_v46 = vpop.permute.xlu0 %1051  ;;  %v1054_v49 = vpop.permute.xlu1 %1053 }
 0x211   : > { %v1057_v3 = vadd.f32 %v1052_v46, %v1001_v59  ;;  %v1058_v35 = vadd.f32 %v1054_v49, %v1002_v8  ;;  %v1483_v8 = vmul.f32 %v1482_v7, %v3084_v24  ;;  %v1484_v46 = vmul.f32 %v1482_v7, %v3086_v29 }
 0x212   : > { %1121 = vrot.lane.b32.xlu1 %v1116_v63, %s3423_s20  ;;  %1119 = vrot.lane.b32.xlu0 %v1115_v56, %s3423_s20  ;;  %v1540_v49 = vstv %s2062_s23 }
 0x213   : > { %v3258_v62 = vadd.f32 %v1097_v50, %v1057_v3  ;;  %v3260_v39 = vadd.f32 %v1098_v47, %v1058_v35  ;;  %v2185_v50 = vld [vmem:[#allocation2 + $0x1e] sm:$0xff]  ;;  %v1542_v52 = vmul.f32 %v2186_v10, %v1540_v49  ;;  %v1596_v3 = vstv %s2066_s26 }
 0x214   : > { %v1066_v25 = vpop.permute.xlu0 %1065  ;;  %v1068_v32 = vpop.permute.xlu1 %1067  ;;  %v1541_v47 = vmul.f32 %v2185_v50, %v1540_v49 }
 0x215   : > { %v1071_v13 = vadd.f32 %v1066_v25, %v1015_v44  ;;  %v1072_v55 = vadd.f32 %v1068_v32, %v1016_v37  ;;  %v1597_v44 = vmul.f32 %v2185_v50, %v1596_v3  ;;  %v1598_v37 = vmul.f32 %v2186_v10, %v1596_v3 }
 0x216   : > { %1177 = vrot.lane.b32.xlu0 %v1173_v17, %s3420_s0  ;;  %1179 = vrot.lane.b32.xlu1 %v1174_v31, %s3420_s0 }
 0x217   : > { %v3267_v27 = vadd.f32 %v1103_v48, %v1071_v13  ;;  %v3269_v42 = vadd.f32 %v1104_v45, %v1072_v55 }
 0x218   : > { %v1134_v9 = vpop.permute.xlu0 %1133  ;;  %v1136_v12 = vpop.permute.xlu1 %1135 }
 0x219   : > { %v1139_v18 = vadd.f32 %v1134_v9, %v3258_v62  ;;  %v1140_v17 = vadd.f32 %v1136_v12, %v3260_v39 }
 0x21a   : > { %1233 = vrot.lane.b32.xlu0 %v1229_v14, %s2326_s25  ;;  %1235 = vrot.lane.b32.xlu1 %v1230_v15, %s2326_s25 }
 0x21c   : > { %v1148_v43 = vpop.permute.xlu0 %1147  ;;  %v1150_v33 = vpop.permute.xlu1 %1149 }
 0x21d   : > { %v1153_v55 = vadd.f32 %v1148_v43, %v3267_v27  ;;  %v1154_v48 = vadd.f32 %v1150_v33, %v3269_v42 }
 0x21e   : > { %1291 = vrot.lane.b32.xlu0 %v1287_v23, %s3426_s30  ;;  %1293 = vrot.lane.b32.xlu1 %v1288_v21, %s3426_s30 }
 0x220   : > { %v1192_v34 = vpop.permute.xlu0 %1191  ;;  %v1194_v11 = vpop.permute.xlu1 %1193 }
 0x221   : > { %v1197_v5 = vadd.f32 %v1192_v34, %v1139_v18  ;;  %v1198_v13 = vadd.f32 %v1194_v11, %v1140_v17 }
 0x222   : > { %1347 = vrot.lane.b32.xlu0 %v1343_v30, %s2327_s3  ;;  %1349 = vrot.lane.b32.xlu1 %v1344_v26, %s2327_s3  ;;  %s1998_s3 = sld [smem:[#allocation8 + $0x1c]] }
 0x224   : > { %v1206_v57 = vpop.permute.xlu0 %1205  ;;  %v1208_v54 = vpop.permute.xlu1 %1207 }
 0x225   : > { %v1211_v23 = vadd.f32 %v1206_v57, %v1153_v55  ;;  %v1212_v62 = vadd.f32 %v1208_v54, %v1154_v48 }
 0x226   : > { %1405 = vrot.lane.b32.xlu0 %v1401_v2, %s3422_s6  ;;  %1407 = vrot.lane.b32.xlu1 %v1402_v41, %s3422_s6  ;;  %s2055_s6 = sld [smem:[#allocation8 + $0x55]] }
 0x228   : > { %v1248_v51 = vpop.permute.xlu0 %1247  ;;  %v1250_v59 = vpop.permute.xlu1 %1249 }
 0x229   : > { %v1253_v45 = vadd.f32 %v1248_v51, %v1197_v5  ;;  %v1254_v14 = vadd.f32 %v1250_v59, %v1198_v13 }
 0x22a   : > { %1487 = vrot.lane.b32.xlu0 %v1483_v8, %s3423_s20  ;;  %1489 = vrot.lane.b32.xlu1 %v1484_v46, %s3423_s20  ;;  %s3290_s20 = sld [smem:[#allocation8 + $0x56]] }
 0x22c   : > { %v1264_v63 = vpop.permute.xlu0 %1263  ;;  %v1266_v56 = vpop.permute.xlu1 %1265  ;;  %v1464_v0 = vstv %s2055_s6  ;;  %s3340_s6 = scalar_lea.hbm %s3386_s2, %s2076_s17 }
 0x22d   : > { %v1269_v12 = vadd.f32 %v1264_v63, %v1211_v23  ;;  %v1270_v20 = vadd.f32 %v1266_v56, %v1212_v62  ;;  %v1465_v27 = vmul.f32 %v1464_v0, %v3084_v24  ;;  %v1466_v42 = vmul.f32 %v1464_v0, %v3086_v29 }
 0x22e   : > { %1545 = vrot.lane.b32.xlu0 %v1541_v47, %s3420_s0  ;;  %1547 = vrot.lane.b32.xlu1 %v1542_v52, %s3420_s0 }
 0x230   : > { %v1306_v35 = vpop.permute.xlu0 %1305  ;;  %v1308_v4 = vpop.permute.xlu1 %1307  ;;  %v1470_v40 = vstv %s3290_s20  ;;  %s1864_s20 = scalar_lea.sflag [#allocation6], %s2484_s5 }
 0x231   : > { %v1311_v9 = vadd.f32 %v1306_v35, %v1253_v45  ;;  %v1312_v39 = vadd.f32 %v1308_v4, %v1254_v14  ;;  %v1471_v59 = vmul.f32 %v1470_v40, %v3084_v24  ;;  %v1472_v8 = vmul.f32 %v1470_v40, %v3086_v29 }
 0x232   : > { %1601 = vrot.lane.b32.xlu0 %v1597_v44, %s2326_s25  ;;  %1603 = vrot.lane.b32.xlu1 %v1598_v37, %s2326_s25  ;;  %s353_s25 = sld [smem:[#allocation8]] }
 0x234   : > { %v1320_v25 = vpop.permute.xlu0 %1319  ;;  %v1322_v32 = vpop.permute.xlu1 %1321 }
 0x235   : > { %v1325_v43 = vadd.f32 %v1320_v25, %v1269_v12  ;;  %v1326_v33 = vadd.f32 %v1322_v32, %v1270_v20 }
 0x238   : > { %v1364_v28 = vpop.permute.xlu0 %1363  ;;  %v1366_v31 = vpop.permute.xlu1 %1365  ;;  %v354_v13 = vstv %s353_s25  ;;  %s2237_s25 = scalar_lea.vmem %s3342_s18, 128 }
 0x239   : > { %v1369_v21 = vadd.f32 %v1364_v28, %v1311_v9  ;;  %v1370_v19 = vadd.f32 %v1366_v31, %v1312_v39  ;;  %p2238_p9 = scmp.ne.s32.totalorder %s3342_s18, %s2237_s25 }
 0x23b   : > { %p2239_p13 = pnand %p2238_p9, %p3428_p11 }
 0x23c   : > { %v1378_v15 = vpop.permute.xlu0 %1377  ;;  %v1380_v1 = vpop.permute.xlu1 %1379 }
 0x23d   : > { %v1383_v57 = vadd.f32 %v1378_v15, %v1325_v43  ;;  %v1384_v38 = vadd.f32 %v1380_v1, %v1326_v33  ;;  %v355_v15 = vmul.f32 %v3104_v60, %v354_v13  ;;  %v2187_v1 = vld [vmem:[#allocation2 + $0x8] sm:$0xff]  ;;  %v722_v43 = vstv %s1998_s3  ;;  %p2240_p7 = pneg %p2239_p13 }
 0x23e   : > { %v356_v0 = vmul.f32 %v2187_v1, %v354_v13  ;;  %v2191_v13 = vld [vmem:[#allocation2 + $0x21] sm:$0xff] }
 0x23f   : > { %v389_v9 = vadd.f32 %v2824_v61, %v355_v15 }
 0x240   : > { %v1420_v34 = vpop.permute.xlu0 %1419  ;;  %v1422_v11 = vpop.permute.xlu1 %1421  ;;  %v390_v39 = vadd.f32 %v2880_v53, %v356_v0 }
 0x241   : > { %v1425_v30 = vadd.f32 %v1420_v34, %v1369_v21  ;;  %v1426_v26 = vadd.f32 %v1422_v11, %v1370_v19  ;;  %v447_v21 = vadd.f32 %v2852_v22, %v389_v9  ;;  %v2189_v22 = vld [vmem:[#allocation2 + $0xc] sm:$0xff] }
 0x242   : > { %v448_v19 = vadd.f32 %v2916_v36, %v390_v39 }
 0x243   : > { %v1467_v54 = vadd.f32 %v1465_v27, %v1425_v30  ;;  %v1468_v2 = vadd.f32 %v1466_v42, %v1426_v26  ;;  %v503_v60 = vadd.f32 %v2886_v58, %v447_v21 }
 0x244   : > { %v1434_v6 = vpop.permute.xlu0 %1433  ;;  %v1436_v41 = vpop.permute.xlu1 %1435  ;;  %v504_v34 = vadd.f32 %v2941_v16, %v448_v19 }
 0x245   : > { %v1439_v7 = vadd.f32 %v1434_v6, %v1383_v57  ;;  %v1440_v51 = vadd.f32 %v1436_v41, %v1384_v38  ;;  %v2188_v38 = vld [vmem:[#allocation2 + $0x4] sm:$0xff] }
 0x247   : > { %v1473_v46 = vadd.f32 %v1471_v59, %v1439_v7  ;;  %v1474_v49 = vadd.f32 %v1472_v8, %v1440_v51 }
 0x248   : > { %v1502_v63 = vpop.permute.xlu0 %1501  ;;  %v1504_v56 = vpop.permute.xlu1 %1503 }
 0x249   : > { %v1507_v4 = vadd.f32 %v1502_v63, %v1467_v54  ;;  %v1508_v44 = vadd.f32 %v1504_v56, %v1468_v2  ;;  %v723_v54 = vmul.f32 %v2188_v38, %v722_v43  ;;  %v724_v2 = vmul.f32 %v2189_v22, %v722_v43 }
 0x24c   : > { %v1516_v50 = vpop.permute.xlu0 %1515  ;;  %v1518_v47 = vpop.permute.xlu1 %1517 }
 0x24d   : > { %v1521_v17 = vadd.f32 %v1516_v50, %v1473_v46  ;;  %v1522_v28 = vadd.f32 %v1518_v47, %v1474_v49 }
 0x250   : > { %v1560_v10 = vpop.permute.xlu0 %1559  ;;  %v1562_v52 = vpop.permute.xlu1 %1561 }
 0x251   : > { %v1565_v37 = vadd.f32 %v1560_v10, %v1507_v4  ;;  %v1566_v25 = vadd.f32 %v1562_v52, %v1508_v44 }
 0x254   : > { %v1574_v3 = vpop.permute.xlu0 %1573  ;;  %v1576_v35 = vpop.permute.xlu1 %1575 }
 0x255   : > { %v1579_v55 = vadd.f32 %v1574_v3, %v1521_v17  ;;  %v1580_v48 = vadd.f32 %v1576_v35, %v1522_v28 }
 0x258   : > { %v1616_v32 = vpop.permute.xlu0 %1615  ;;  %v1618_v18 = vpop.permute.xlu1 %1617 }
 0x259   : > { %v1621_v31 = vadd.f32 %v1616_v32, %v1565_v37  ;;  %v1622_v5 = vadd.f32 %v1618_v18, %v1566_v25 }
 0x25b   : > { %1625 = vrot.lane.b32.xlu0 %v1621_v31, %s3420_s0  ;;  %1627 = vrot.lane.b32.xlu1 %v1622_v5, %s3420_s0  ;;  %s2026_s0 = sld [smem:[#allocation8 + $0x38]]  ;;  %v2190_v31 = vld [vmem:[#allocation2 + $0x19] sm:$0xff] }
 0x25c   : > { %v1636_v45 = vpop.permute.xlu0 %1635  ;;  %v1638_v14 = vpop.permute.xlu1 %1637 }
 0x25d   : > { %v1641_v23 = vadd.f32 %v1636_v45, %v1579_v55  ;;  %v1642_v62 = vadd.f32 %v1638_v14, %v1580_v48 }
 0x25f   : > { %1645 = vrot.lane.b32.xlu0 %v1641_v23, %s3426_s30  ;;  %1647 = vrot.lane.b32.xlu1 %v1642_v62, %s3426_s30  ;;  %s2054_s30 = sld [smem:[#allocation8 + $0x54]] }
 0x260   : > { %v556_v12 = vpop.permute.xlu0 %555  ;;  %v558_v20 = vpop.permute.xlu1 %557 }
 0x261   : > { %v561_v42 = vadd.f32 %v556_v12, %v503_v60  ;;  %v562_v61 = vadd.f32 %v558_v20, %v504_v34  ;;  %v1090_v44 = vstv %s2026_s0 }
 0x262   : > { %v1091_v5 = vmul.f32 %v2190_v31, %v1090_v44  ;;  %v1092_v55 = vmul.f32 %v2191_v13, %v1090_v44 }
 0x264   : > { %v612_v11 = vpop.permute.xlu0 %611  ;;  %v614_v27 = vpop.permute.xlu1 %613 }
 0x265   : > { %v617_v53 = vadd.f32 %v612_v11, %v561_v42  ;;  %v618_v33 = vadd.f32 %v614_v27, %v562_v61  ;;  %v1458_v43 = vstv %s2054_s30 }
 0x266   : > { %v1459_v38 = vmul.f32 %v1458_v43, %v3084_v24 }
 0x268   : > { %v670_v30 = vpop.permute.xlu0 %669  ;;  %v672_v26 = vpop.permute.xlu1 %671 }
 0x269   : > { %v675_v40 = vadd.f32 %v670_v30, %v617_v53  ;;  %v676_v57 = vadd.f32 %v672_v26, %v618_v33 }
 0x26b   : > { %v725_v36 = vadd.f32 %v723_v54, %v675_v40  ;;  %v726_v6 = vadd.f32 %v724_v2, %v676_v57  ;;  %v1460_v54 = vmul.f32 %v1458_v43, %v3086_v29 }
 0x26c   : > { %v752_v58 = vpop.permute.xlu0 %751  ;;  %v754_v41 = vpop.permute.xlu1 %753 }
 0x26d   : > { %v757_v8 = vadd.f32 %v752_v58, %v725_v36  ;;  %v758_v46 = vadd.f32 %v754_v41, %v726_v6 }
 0x270   : > { %v810_v16 = vpop.permute.xlu0 %809  ;;  %v812_v7 = vpop.permute.xlu1 %811 }
 0x271   : > { %v815_v56 = vadd.f32 %v810_v16, %v757_v8  ;;  %v816_v50 = vadd.f32 %v812_v7, %v758_v46 }
 0x274   : > { %v866_v51 = vpop.permute.xlu0 %865  ;;  %v868_v59 = vpop.permute.xlu1 %867 }
 0x275   : > { %v871_v47 = vadd.f32 %v866_v51, %v815_v56  ;;  %v872_v10 = vadd.f32 %v868_v59, %v816_v50 }
 0x278   : > { %v924_v49 = vpop.permute.xlu0 %923  ;;  %v926_v63 = vpop.permute.xlu1 %925 }
 0x279   : > { %v929_v35 = vadd.f32 %v924_v49, %v871_v47  ;;  %v930_v4 = vadd.f32 %v926_v63, %v872_v10 }
 0x27c   : > { %v980_v52 = vpop.permute.xlu0 %979  ;;  %v982_v3 = vpop.permute.xlu1 %981 }
 0x27d   : > { %v985_v37 = vadd.f32 %v980_v52, %v929_v35  ;;  %v986_v25 = vadd.f32 %v982_v3, %v930_v4 }
 0x280   : > { %v1038_v32 = vpop.permute.xlu0 %1037  ;;  %v1040_v18 = vpop.permute.xlu1 %1039 }
 0x281   : > { %v1043_v17 = vadd.f32 %v1038_v32, %v985_v37  ;;  %v1044_v28 = vadd.f32 %v1040_v18, %v986_v25  ;;  %v1665_v18 = vlaneseq }
 0x283   : > { %v1093_v48 = vadd.f32 %v1091_v5, %v1043_v17  ;;  %v1094_v45 = vadd.f32 %v1092_v55, %v1044_v28  ;;  %v2328_v17 = vmov 1966171168   ;;  %v3313_v5 = vshrl.u32 %v1665_v18, 7 }
 0x284   : > { %v1120_v14 = vpop.permute.xlu0 %1119  ;;  %v1122_v15 = vpop.permute.xlu1 %1121  ;;  %v1672_v28 = vunpack.c.l.s4 %v2328_v17  ;;  %vm1667_vm4 = vcmp.lt.s32.totalorder %v1665_v18, 16  ;;  %vm1696_vm5 = vcmp.ge.s32.totalorder %v1665_v18, 16  ;;  %vm1697_vm6 = vcmp.lt.s32.totalorder %v1665_v18, 32 }
 0x285   : > { %v1125_v9 = vadd.f32 %v1120_v14, %v1093_v48  ;;  %v1126_v39 = vadd.f32 %v1122_v15, %v1094_v45  ;;  %vm1698_vm7 = vmand %vm1696_vm5, %vm1697_vm6  ;;  %vm1704_vm8 = vcmp.ge.s32.totalorder %v1665_v18, 32  ;;  %vm1705_vm9 = vcmp.lt.s32.totalorder %v1665_v18, 48 }
 0x286   : > { %v1673_v31 = vunpack.c.0.s8 %v1672_v28  ;;  %vm1706_vm10 = vmand %vm1704_vm8, %vm1705_vm9  ;;  %vm1712_vm11 = vcmp.ge.s32.totalorder %v1665_v18, 48  ;;  %vm1713_vm12 = vcmp.lt.s32.totalorder %v1665_v18, 64  ;;  %vm1734_vm13 = vcmp.ge.s32.totalorder %v1665_v18, 64 }
 0x287   : > { %vm1735_vm14 = vcmp.lt.s32.totalorder %v1665_v18, 80  ;;  %vm1714_vm15 = vmand %vm1712_vm11, %vm1713_vm12  ;;  %vm1749_vm1 = vcmp.ge.s32.totalorder %v1665_v18, 80  ;;  %vm1750_vm2 = vcmp.lt.s32.totalorder %v1665_v18, 96  ;;  %vm1758_vm5 = vcmp.lt.s32.totalorder %v1665_v18, 112 }
 0x288   : > { %v1178_v1 = vpop.permute.xlu0 %1177  ;;  %v1180_v0 = vpop.permute.xlu1 %1179  ;;  %v1676_v13 = vsub.s32 %v1673_v31, %v3313_v5  ;;  %vm1736_vm0 = vmand %vm1734_vm13, %vm1735_vm14  ;;  %vm1766_vm8 = vcmp.lt.s32.totalorder %v1665_v18, 128 }
 0x289   : > { %v1183_v21 = vadd.f32 %v1178_v1, %v1125_v9  ;;  %v1184_v19 = vadd.f32 %v1180_v0, %v1126_v39  ;;  %vm1751_vm3 = vmand %vm1749_vm1, %vm1750_vm2 }
 0x28c   : > { %v1234_v23 = vpop.permute.xlu0 %1233  ;;  %v1236_v62 = vpop.permute.xlu1 %1235 }
 0x28d   : > { %v1239_v60 = vadd.f32 %v1234_v23, %v1183_v21  ;;  %v1240_v34 = vadd.f32 %v1236_v62, %v1184_v19 }
 0x290   : > { %v1292_v12 = vpop.permute.xlu0 %1291  ;;  %v1294_v20 = vpop.permute.xlu1 %1293 }
 0x291   : > { %v1297_v42 = vadd.f32 %v1292_v12, %v1239_v60  ;;  %v1298_v61 = vadd.f32 %v1294_v20, %v1240_v34 }
 0x294   : > { %v1348_v11 = vpop.permute.xlu0 %1347  ;;  %v1350_v27 = vpop.permute.xlu1 %1349 }
 0x295   : > { %v1353_v53 = vadd.f32 %v1348_v11, %v1297_v42  ;;  %v1354_v33 = vadd.f32 %v1350_v27, %v1298_v61 }
 0x298   : > { %v1406_v30 = vpop.permute.xlu0 %1405  ;;  %v1408_v26 = vpop.permute.xlu1 %1407 }
 0x299   : > { %v1411_v40 = vadd.f32 %v1406_v30, %v1353_v53  ;;  %v1412_v57 = vadd.f32 %v1408_v26, %v1354_v33 }
 0x29b   : > { %v1461_v22 = vadd.f32 %v1459_v38, %v1411_v40  ;;  %v1462_v2 = vadd.f32 %v1460_v54, %v1412_v57 }
 0x29c   : > { %v1488_v36 = vpop.permute.xlu0 %1487  ;;  %v1490_v6 = vpop.permute.xlu1 %1489 }
 0x29d   : > { %v1493_v51 = vadd.f32 %v1488_v36, %v1461_v22  ;;  %v1494_v59 = vadd.f32 %v1490_v6, %v1462_v2 }
 0x2a0   : > { %v1546_v58 = vpop.permute.xlu0 %1545  ;;  %v1548_v41 = vpop.permute.xlu1 %1547 }
 0x2a1   : > { %v1551_v8 = vadd.f32 %v1546_v58, %v1493_v51  ;;  %v1552_v46 = vadd.f32 %v1548_v41, %v1494_v59 }
 0x2a4   : > { %v1602_v16 = vpop.permute.xlu0 %1601  ;;  %v1604_v7 = vpop.permute.xlu1 %1603 }
 0x2a5   : > { %v1607_v56 = vadd.f32 %v1602_v16, %v1551_v8  ;;  %v1608_v50 = vadd.f32 %v1604_v7, %v1552_v46 }
 0x2cd   : > { %v1626_v49 = vpop.permute.xlu0 %1625  ;;  %v1628_v63 = vpop.permute.xlu1 %1627 }
 0x2ce   : > { %v1631_v47 = vadd.f32 %v1626_v49, %v1607_v56  ;;  %v1632_v24 = vadd.f32 %v1628_v63, %v1608_v50  ;;  %v1853_v49 = vsub.s32 0, %v3313_v5  ;;  %v1857_v63 = vsub.s32 1, %v3313_v5 }
 0x2d1   : > { %v1646_v10 = vpop.permute.xlu0 %1645  ;;  %v1648_v29 = vpop.permute.xlu1 %1647 }
 0x2d2   : > { %v1651_v52 = vadd.f32 %v1646_v10, %v1631_v47  ;;  %v1652_v3 = vadd.f32 %v1648_v29, %v1632_v24  ;;  %v1848_v24 = vld [vmem:[%s2490_s19] sm:$0xff]  ;;  %s2241_s19 = sshll.u32 %s2336_s13, 4  ;;  %s2242_s19 = int_to_ptr.vmem [resolvable:$false] %s2241_s19 }
 0x2d3   : > { %s2243_s3 = scalar_lea.vmem %s2242_s19, 256  ;;  %p2244_p0 = scmp.lt.s32.totalorder %s3342_s18, %s2242_s19 }
 0x2d4   : > { %v2068_v35 = vmul.f32 -1.442695, %v1651_v52  ;;  %v2069_v4 = vmul.f32 -1.442695, %v1652_v3  ;;  %p2245_p3 = scmp.lt.s32.totalorder %s2243_s3, %s2237_s25 }
 0x2d6   : > { %2160 = vpow2.f32 %v2068_v35  ;;  %p2246_p12 = por %p2245_p3, %p2244_p0 }
 0x2d7   : > { %2162 = vpow2.f32 %v2069_v4 }
 0x2d8   : > { %p2247_p5 = pnand %p2246_p12, %p2240_p7 }
 0x2e0   : > { %v2161_v44 = vpop.eup %2160 }
 0x2e1   : > { %v2163_v37 = vpop.eup %2162  ;;  %v1659_v25 = vadd.f32 1.0, %v2161_v44 }
 0x2e2   : > { %v1660_v32 = vadd.f32 1.0, %v2163_v37 }
 0x2e3   : > { %2164 = vrcp.f32 %v1659_v25 }
 0x2e4   : > { %2166 = vrcp.f32 %v1660_v32 }
 0x2ed   : > { %v2165_v55 = vpop.eup %2164 }
 0x2ee   : > { %v2167_v48 = vpop.eup %2166  ;;  %v1677_v45 = vrot.slane %v2165_v55, %v1676_v13  ;;  %1669 = vst.msk [vmem:[#allocation3] sm:$0x1] %vm1667_vm4, %v2165_v55  ;;  %v1716_v62 = vcombine.high %v2165_v55, %v2165_v55 }
 0x2ef   : > { %v1777_v14 = vrot.slane %v2167_v48, %v1676_v13  ;;  %1769 = vst.msk [vmem:[#allocation3 + $0x1] sm:$0x1] %vm1667_vm4, %v2167_v48  ;;  %v1807_v12 = vcombine.high %v2167_v48, %v2167_v48  ;;  %vm1757_vm4 = vcmp.ge.s32.totalorder %v1665_v18, 96 }
 0x2f0   : > { %v1678_v15 = vcombine.high %v1677_v45, %v1677_v45  ;;  %v1685_v23 = vrot.slane %v1677_v45, %v1676_v13  ;;  %v1723_v21 = vrot.slane %v1716_v62, %v1676_v13  ;;  %vm1759_vm6 = vmand %vm1757_vm4, %vm1758_vm5 }
 0x2f1   : > { %v1778_v1 = vcombine.high %v1777_v14, %v1777_v14  ;;  %v1785_v39 = vrot.slane %v1777_v14, %v1676_v13  ;;  %v1814_v60 = vrot.slane %v1807_v12, %v1676_v13 }
 0x2f2   : > { %v1692_v0 = vrot.slane %v1678_v15, %v1676_v13  ;;  %v1700_v20 = vcombine.high %v1685_v23, %v1685_v23  ;;  %v1730_v34 = vrot.slane %v1723_v21, %v1676_v13  ;;  %v1738_v42 = vcombine.high %v1723_v21, %v1723_v21 }
 0x2f3   : > { %v1792_v9 = vrot.slane %v1778_v1, %v1676_v13  ;;  %v1797_v19 = vcombine.high %v1785_v39, %v1785_v39  ;;  %v1821_v11 = vrot.slane %v1814_v60, %v1676_v13  ;;  %v1826_v43 = vcombine.high %v1814_v60, %v1814_v60 }
 0x2f4   : > { %1693 = vrot.lane.b32.xlu0 %v1692_v0, %s2329_s1  ;;  %v1708_v27 = vcombine.high %v1692_v0, %v1692_v0  ;;  %v1745_v53 = vrot.slane %v1738_v42, %v1676_v13  ;;  %v1753_v30 = vcombine.high %v1730_v34, %v1730_v34 }
 0x2f5   : > { %1793 = vrot.lane.b32.xlu1 %v1792_v9, %s2329_s1  ;;  %v1802_v61 = vcombine.high %v1792_v9, %v1792_v9  ;;  %v1833_v33 = vrot.slane %v1826_v43, %v1676_v13  ;;  %v1838_v26 = vcombine.high %v1821_v11, %v1821_v11 }
 0x2f6   : > { %v1761_v40 = vcombine.high %v1745_v53, %v1745_v53 }
 0x2f7   : > { %v1843_v57 = vcombine.high %v1833_v33, %v1833_v33 }
 0x2f8   : > { %1701 = vrot.lane.b32.xlu0 %v1700_v20, %s2330_s4 }
 0x2f9   : > { %1798 = vrot.lane.b32.xlu1 %v1797_v19, %s2330_s4 }
 0x2fc   : > { %1731 = vrot.lane.b32.xlu0 %v1730_v34, %s2331_s8 }
 0x2fd   : > { %1822 = vrot.lane.b32.xlu1 %v1821_v11, %s2331_s8 }
 0x300   : > { %1709 = vrot.lane.b32.xlu0 %v1708_v27, %s2332_s15 }
 0x301   : > { %1803 = vrot.lane.b32.xlu1 %v1802_v61, %s2332_s15 }
 0x304   : > { %1746 = vrot.lane.b32.xlu0 %v1745_v53, %s2333_s27 }
 0x305   : > { %1834 = vrot.lane.b32.xlu1 %v1833_v33, %s2333_s27 }
 0x308   : > { %1754 = vrot.lane.b32.xlu0 %v1753_v30, %s2334_s7 }
 0x309   : > { %1839 = vrot.lane.b32.xlu1 %v1838_v26, %s2334_s7 }
 0x30c   : > { %1762 = vrot.lane.b32.xlu0 %v1761_v40, %s2335_s14 }
 0x30d   : > { %1844 = vrot.lane.b32.xlu1 %v1843_v57, %s2335_s14 }
 0x366   : > { %v1694_v38 = vpop.permute.xlu0 %1693 }
 0x367   : > { %1699 = vst.msk [vmem:[#allocation3] sm:$0x1] %vm1698_vm7, %v1694_v38  ;;  %v1794_v54 = vpop.permute.xlu1 %1793 }
 0x368   : > { %1796 = vst.msk [vmem:[#allocation3 + $0x1] sm:$0x1] %vm1698_vm7, %v1794_v54  ;;  %vm1765_vm7 = vcmp.ge.s32.totalorder %v1665_v18, 112 }
 0x369   : > { %vm1767_vm9 = vmand %vm1765_vm7, %vm1766_vm8 }
 0x36a   : > { %v1702_v22 = vpop.permute.xlu0 %1701 }
 0x36b   : > { %1707 = vst.msk [vmem:[#allocation3] sm:$0x1] %vm1706_vm10, %v1702_v22  ;;  %v1799_v2 = vpop.permute.xlu1 %1798 }
 0x36c   : > { %1801 = vst.msk [vmem:[#allocation3 + $0x1] sm:$0x1] %vm1706_vm10, %v1799_v2 }
 0x36e   : > { %v1732_v36 = vpop.permute.xlu0 %1731 }
 0x36f   : > { %v1823_v6 = vpop.permute.xlu1 %1822 }
 0x372   : > { %v1710_v58 = vpop.permute.xlu0 %1709 }
 0x373   : > { %1715 = vst.msk [vmem:[#allocation3] sm:$0x1] %vm1714_vm15, %v1710_v58  ;;  %v1804_v41 = vpop.permute.xlu1 %1803 }
 0x374   : > { %1806 = vst.msk [vmem:[#allocation3 + $0x1] sm:$0x1] %vm1714_vm15, %v1804_v41 }
 0x375   : > { %1737 = vst.msk [vmem:[#allocation3] sm:$0x1] %vm1736_vm0, %v1732_v36  ;;  %1825 = vst.msk [vmem:[#allocation3 + $0x1] sm:$0x1] %vm1736_vm0, %v1823_v6 }
 0x376   : > { %v1747_v16 = vpop.permute.xlu0 %1746 }
 0x377   : > { %1752 = vst.msk [vmem:[#allocation3] sm:$0x1] %vm1751_vm3, %v1747_v16  ;;  %v1835_v7 = vpop.permute.xlu1 %1834 }
 0x378   : > { %1837 = vst.msk [vmem:[#allocation3 + $0x1] sm:$0x1] %vm1751_vm3, %v1835_v7 }
 0x37a   : > { %v1755_v51 = vpop.permute.xlu0 %1754 }
 0x37b   : > { %1760 = vst.msk [vmem:[#allocation3] sm:$0x1] %vm1759_vm6, %v1755_v51  ;;  %v1840_v59 = vpop.permute.xlu1 %1839 }
 0x37c   : > { %1842 = vst.msk [vmem:[#allocation3 + $0x1] sm:$0x1] %vm1759_vm6, %v1840_v59 }
 0x37e   : > { %v1763_v8 = vpop.permute.xlu0 %1762 }
 0x37f   : > { %1768 = vst.msk [vmem:[#allocation3] sm:$0x1] %vm1767_vm9, %v1763_v8  ;;  %v1845_v46 = vpop.permute.xlu1 %1844 }
 0x380   : > { %1847 = vst.msk [vmem:[#allocation3 + $0x1] sm:$0x1] %vm1767_vm9, %v1845_v46 }
 0x387   : > { %v1849_v56 = vld [vmem:[#allocation3] sm:$0x3] }
 0x388   : > { %v1854_v50 = vrot.slane %v1849_v56, %v1853_v49  ;;  %v1858_v47 = vrot.slane %v1849_v56, %v1857_v63 }
 0x38a   : > { %v1859_v10 = vcombine.low %v1854_v50, %v1858_v47 }
 0x38c   : > { %v1861_v29 = vmul.f32 %v1859_v10, %v1848_v24 }
 0x38e   : > { %1862 = vst [vmem:[%s173_s22] sm:$0xff] %v1861_v29 }
 0x38f   : > { %2250 = shalt.err (!%p2247_p5)
}
 0x390   : > { %s2251_s5 = scalar_lea.hbm %s3340_s6, 128  ;;  %s2255_s1 = scalar_lea.hbm %s3386_s2, 256 }
 0x391   : > { %p2252_p10 = scmp.ne.s32.totalorder %s3340_s6, %s2251_s5  ;;  %p2256_p4 = scmp.lt.u32.totalorder %s3340_s6, %s3386_s2 }
 0x392   : > { %p2257_p6 = scmp.lt.u32.totalorder %s2255_s1, %s2251_s5  ;;  %p2259_p9 = scmp.lt.u32.totalorder %s2251_s5, %s3340_s6 }
 0x393   : > { %p2253_p2 = pnand %p2252_p10, %p3428_p11 }
 0x394   : > { %p2258_p8 = por %p2257_p6, %p2256_p4 }
 0x395   : > { %p2254_p1 = pneg %p2253_p2 }
 0x396   : > { %p2260_p13 = por %p2259_p9, %p2258_p8 }
 0x398   : > { %p2261_p7 = pnand %p2260_p13, %p2254_p1 }
 0x39a   : > { %2264 = shalt.err (!%p2261_p7)
}
 0x39b   : > { %2083 = dma.vmem_to_hbm [thread:$0]  (%p3428_p11), %s3342_s18, 128, %s3340_s6, %s1864_s20  }
 0x39c PF: > { %s1890_s15 = sand.u32 1, %s2295_s9   ;;  %p3429_p0 = scmp.ne.s32.totalorder %s3408_s16, 0 }
 0x39d   : > { %p3430_p3 = scmp.ge.s32.totalorder %s2307_s12, 2  ;;  %s1891_s27 = scalar_lea.sflag [#allocation6], %s1890_s15 }
 0x39f   : > { %p2094_p12 = pnand %p3430_p3, %p3429_p0 }
 0x3a1   : > { %2290 = dma.done.wait (!%p2094_p12), %s1891_s27, 128  }
 0x3a2   : > { %2292 = vsyncadd (!%p2094_p12), %s1891_s27, 4294967168  ;;  %p16_p5 = scmp.ge.s32.totalorder %s2403_s21, 4   ;;  %s3431_s9 = smov %s2299_s10 }
 0x3a3   : > { %s3432_s10 = smov %s2303_s11  ;;  %s3433_s11 = smov %s2427_s28 }
 0x3a4   : > { %s3434_s12 = smov %s2403_s21  ;;  %18 = sbr.rel (!%p16_p5) target bundleno = 9 (0x9), region = 79 }
 0x3ab   :  { %1896 = vsyncpa [#allocation5], 1 }
 0x3ac   :  { %1898 = vsyncpa [#allocation5 + $0x1], 1 }
 0x3ad   :  { %1899 = vsyncpa [#allocation6], 1 }
 0x3ae   :  { %1901 = vsyncpa [#allocation6 + $0x1], 1 }
 0x3af   :  { %1902 = vsyncpa [#allocation7], 1 }
 0x3b0   :  { %1904 = vsyncpa [#allocation7 + $0x1], 1 }

</bundles_post_ra>
